<compile_context>
chip_gen: v6e
topology: v6e:2x2x1
jax: 0.10.0
libtpu: 0.0.40
codegen_flags: <defaults>
</compile_context>

<pallas_src>
import functools

import jax
import jax.numpy as jnp
from jax.experimental import pallas as pl
from jax.experimental.pallas import tpu as pltpu

IN_ALPHABET_SIZE = 27  # len(IN_LOOKUP) in the reference module
MAX_LEN = 32
_LANE = 128
_BF16_SUBLANE = 16


def _round_up(n, m):
    return ((n + m - 1) // m) * m


def _cnn_kernel(x_ref, w_in_ref, b_in_ref, w_hid_ref, b_hid_ref,
                w_lin_ref, b_lin_ref, out_ref, *, kernel_size, hidden_layers,
                tb):
    """Activations are (C_pad, L*tb) bf16 with lane index l*tb + b.

    tb % 128 == 0, so every slice below starts at a lane offset that is a
    multiple of 128 -> lane-dense VPU/MXU work, no relayouts, no copies.
    """
    k = kernel_size

    def conv_relu(h, l_in, w_tap, b):
        # h: (ci_pad, l_in*tb) bf16; w_tap(dk): (c_pad, ci_pad) bf16;
        # b: (c_pad, 1) f32.  Per-tap accumulating dots (f32 accumulator; the
        # MXU result buffer accumulates these in place on v7x).
        l_out = l_in - k + 1
        acc = jnp.dot(w_tap(0), h[:, :l_out * tb],
                      preferred_element_type=jnp.float32)
        for dk in range(1, k):
            acc = acc + jnp.dot(w_tap(dk),
                                h[:, dk * tb: dk * tb + l_out * tb],
                                preferred_element_type=jnp.float32)
        y = jnp.maximum(acc + b, 0.0)
        return y.astype(jnp.bfloat16), l_out

    x = x_ref[...]                       # (cin_pad, MAX_LEN*tb) bf16
    l_cur = x.shape[1] // tb

    # input conv + ReLU
    h, l_cur = conv_relu(x, l_cur, lambda dk: w_in_ref[dk], b_in_ref[...])
    # hidden convs + ReLU (static Python loop: hidden_layers is compile-time)
    for i in range(hidden_layers):
        h, l_cur = conv_relu(h, l_cur,
                             lambda dk, i=i: w_hid_ref[i, dk], b_hid_ref[i])

    # final linear: Lf accumulating dots of per-slab weight blocks against the
    # lane-aligned time slabs of h (no gather/concat copies).
    acc = jnp.dot(w_lin_ref[0], h[:, :tb], preferred_element_type=jnp.float32)
    for l in range(1, l_cur):
        acc = acc + jnp.dot(w_lin_ref[l], h[:, l * tb:(l + 1) * tb],
                            preferred_element_type=jnp.float32)
    out_ref[...] = acc + b_lin_ref[...]       # (E, tb) f32, lane-dense


def _tpu_tuning(batch):
    """Per-generation (tb, vmem_limit_bytes).  Conservative fallback if the
    hardware query is unavailable."""
    tb_max, vmem_limit, two_core = 512, 32 * 1024 * 1024, False
    try:
        info = pltpu.get_tpu_info()
        vmem_bytes = getattr(info, "vmem_capacity_bytes", 128 * 1024 * 1024)
        if vmem_bytes <= 64 * 1024 * 1024:
            # v7x-like: 64 MiB VMEM per TC, 2 TensorCores per chip.
            tb_max, vmem_limit, two_core = 512, 40 * 1024 * 1024, True
        else:
            # v5e / v6e: 128 MiB VMEM, single TC -> bigger blocks.
            tb_max, vmem_limit, two_core = 1024, 64 * 1024 * 1024, False
    except Exception:
        pass
    if two_core:
        # ensure >= 2 grid steps when possible so both TCs get work
        tb = min(tb_max, max(_LANE, _round_up(pl.cdiv(batch, 2), _LANE)))
    else:
        tb = min(tb_max, _round_up(batch, _LANE))
    return tb, vmem_limit


def cnn_forward(x_ncw, params, *, kernel_size, hidden_layers, channels,
                embedding_size):
    """x_ncw: (B, 27, 32) float32 (PyTorch NCW). Returns (B, embedding_size)."""
    w_in, b_in, w_hid, b_hid, w_lin, b_lin = params
    B = x_ncw.shape[0]
    k = kernel_size
    Lf = MAX_LEN - (k - 1) * (hidden_layers + 1)

    # bf16 min tile is (16, 128) -> round channel pads to 16 sublanes.
    cin_pad = _round_up(IN_ALPHABET_SIZE, _BF16_SUBLANE)   # 27 -> 32
    c_pad = _round_up(channels, _BF16_SUBLANE)

    tb, vmem_limit = _tpu_tuning(B)
    nb = pl.cdiv(B, tb)
    b_pad = nb * tb

    # ---- layout glue (plain JAX; one pass over x, weights are tiny) ----
    # x: NCW (B, 27, 32) -> (nb, cin_pad, 32*tb) bf16 with column index l*tb+b.
    # bf16 cast fused into this pass so the transpose moves half the bytes.
    # TODO(synk): producing x in this layout upstream (or allow_input_fusion)
    # would remove this extra HBM round-trip entirely.
    xb = x_ncw.astype(jnp.bfloat16)
    xp = jnp.pad(xb,
                 ((0, b_pad - B), (0, cin_pad - IN_ALPHABET_SIZE), (0, 0)))
    x2 = (xp.reshape(nb, tb, cin_pad, MAX_LEN)
            .transpose(0, 2, 3, 1)
            .reshape(nb, cin_pad, MAX_LEN * tb))

    def pack_conv(w, b, ci, ci_pad):
        # w: (channels, ci, k) -> (k, c_pad, ci_pad) bf16 (per-tap matrices),
        # b: (channels,) -> (c_pad, 1) f32.
        wt = jnp.transpose(w, (2, 0, 1))                       # (k, Co, Ci)
        wt = jnp.pad(wt, ((0, 0), (0, c_pad - channels), (0, ci_pad - ci)))
        bt = jnp.pad(b, (0, c_pad - channels)).reshape(c_pad, 1)
        return wt.astype(jnp.bfloat16), bt.astype(jnp.float32)

    w_in_k, b_in_k = pack_conv(w_in, b_in, IN_ALPHABET_SIZE, cin_pad)

    hk = max(hidden_layers, 1)
    if hidden_layers > 0:
        wh = jnp.transpose(w_hid, (0, 3, 1, 2))                # (H, k, Co, Ci)
        wh = jnp.pad(wh, ((0, 0), (0, 0), (0, c_pad - channels),
                          (0, c_pad - channels)))
        w_hid_k = wh.astype(jnp.bfloat16)                      # (H, k, c_pad, c_pad)
        b_hid_k = jnp.pad(b_hid, ((0, 0), (0, c_pad - channels))
                          ).reshape(hidden_layers, c_pad, 1).astype(jnp.float32)
    else:  # dummy (never read; loop is static)
        w_hid_k = jnp.zeros((1, k, c_pad, c_pad), jnp.bfloat16)
        b_hid_k = jnp.zeros((1, c_pad, 1), jnp.float32)

    # torch flatten index is c*Lf + l ; kernel contracts per time-slab l with a
    # (E, c_pad) block -> repack as (Lf, E, c_pad).
    wl = jnp.transpose(w_lin.reshape(embedding_size, channels, Lf), (2, 0, 1))
    wl = jnp.pad(wl, ((0, 0), (0, 0), (0, c_pad - channels)))
    w_lin_k = wl.astype(jnp.bfloat16)                          # (Lf, E, c_pad)
    b_lin_k = b_lin.reshape(embedding_size, 1).astype(jnp.float32)

    kernel = functools.partial(_cnn_kernel, kernel_size=k,
                               hidden_layers=hidden_layers, tb=tb)
    const2 = lambda i: (0, 0)        # weights resident across the batch grid
    const3 = lambda i: (0, 0, 0)
    const4 = lambda i: (0, 0, 0, 0)

    out_eb = pl.pallas_call(
        kernel,
        out_shape=jax.ShapeDtypeStruct((embedding_size, b_pad), jnp.float32),
        grid=(nb,),
        in_specs=[
            pl.BlockSpec((None, cin_pad, MAX_LEN * tb), lambda i: (i, 0, 0)),
            pl.BlockSpec((k, c_pad, cin_pad), const3),
            pl.BlockSpec((c_pad, 1), const2),
            pl.BlockSpec((hk, k, c_pad, c_pad), const4),
            pl.BlockSpec((hk, c_pad, 1), const3),
            pl.BlockSpec((Lf, embedding_size, c_pad), const3),
            pl.BlockSpec((embedding_size, 1), const2),
        ],
        out_specs=pl.BlockSpec((embedding_size, tb), lambda i: (0, i)),
        compiler_params=pltpu.CompilerParams(
            dimension_semantics=("parallel",),
            vmem_limit_bytes=vmem_limit),
    )(x2, w_in_k, b_in_k, w_hid_k, b_hid_k, w_lin_k, b_lin_k)

    return out_eb.T[:B]                                    # (B, E)


def torch_style_reference(x_ncw, params, *, kernel_size, hidden_layers):
    """Pure-JAX emulation of the PyTorch forward (NCW layout) for checking."""
    w_in, b_in, w_hid, b_hid, w_lin, b_lin = params
    hi = jax.lax.Precision.HIGHEST

    def conv1d_ncw(x, w, b):  # x (B,Ci,L), w (Co,Ci,k), b (Co,)
        l_out = x.shape[2] - kernel_size + 1
        out = jnp.zeros((x.shape[0], w.shape[0], l_out), jnp.float32)
        for dk in range(kernel_size):
            out = out + jnp.einsum('bil,oi->bol', x[:, :, dk:dk + l_out],
                                   w[:, :, dk], precision=hi)
        return out + b[None, :, None]

    h = jax.nn.relu(conv1d_ncw(x_ncw, w_in, b_in))
    for i in range(hidden_layers):
        h = jax.nn.relu(conv1d_ncw(h, w_hid[i], b_hid[i]))
    flat = h.reshape(h.shape[0], -1)            # channel-major, like torch .view
    return jnp.dot(flat, w_lin.T, precision=hi) + b_lin[None, :]


def init_params(key, *, kernel_size, hidden_layers, channels, embedding_size):
    Lf = MAX_LEN - (kernel_size - 1) * (hidden_layers + 1)
    last_layer_size = Lf * channels
    ks = jax.random.split(key, 6)
    w_in = 0.1 * jax.random.normal(ks[0], (channels, IN_ALPHABET_SIZE,
                                           kernel_size), jnp.float32)
    b_in = 0.1 * jax.random.normal(ks[1], (channels,), jnp.float32)
    w_hid = 0.1 * jax.random.normal(ks[2], (hidden_layers, channels, channels,
                                            kernel_size), jnp.float32)
    b_hid = 0.1 * jax.random.normal(ks[3], (hidden_layers, channels),
                                    jnp.float32)
    w_lin = 0.1 * jax.random.normal(ks[4], (embedding_size, last_layer_size),
                                    jnp.float32)
    b_lin = 0.1 * jax.random.normal(ks[5], (embedding_size,), jnp.float32)
    return (w_in, b_in, w_hid, b_hid, w_lin, b_lin)


if __name__ == "__main__":
    kernel_size = 3
    hidden_layers = 2
    channels = 8
    embedding_size = 16
    batch = 2

    key = jax.random.PRNGKey(0)
    k_x, k_p = jax.random.split(key)
    # Input as in PyTorch: (B, len(IN_ALPHABET)=27, MAX_LEN=32), NCW layout.
    x = jax.random.normal(k_x, (batch, IN_ALPHABET_SIZE, MAX_LEN), jnp.float32)
    params = init_params(k_p, kernel_size=kernel_size,
                         hidden_layers=hidden_layers, channels=channels,
                         embedding_size=embedding_size)

    out = cnn_forward(x, params, kernel_size=kernel_size,
                      hidden_layers=hidden_layers, channels=channels,
                      embedding_size=embedding_size)
    out = jax.block_until_ready(out)

    ref = torch_style_reference(x, params, kernel_size=kernel_size,
                                hidden_layers=hidden_layers)
    assert out.shape == (batch, embedding_size)
    err = jnp.max(jnp.abs(out - ref))
    # bf16 activations/weights (f32 accumulation) -> relaxed tolerance.
    assert jnp.allclose(out, ref, atol=5e-2, rtol=5e-2), f"max err {err}"
    print("KERNEL_OK")
</pallas_src>

<mosaic_0001>
module attributes {stable_mosaic.version = 11 : i64} {
  func.func @_cnn_kernel(%arg0: i32, %arg1: memref<1x32x4096xbf16, #tpu.memory_space<vmem>>, %arg2: memref<3x16x32xbf16, #tpu.memory_space<vmem>>, %arg3: memref<16x1xf32, #tpu.memory_space<vmem>>, %arg4: memref<2x3x16x16xbf16, #tpu.memory_space<vmem>>, %arg5: memref<2x16x1xf32, #tpu.memory_space<vmem>>, %arg6: memref<26x16x16xbf16, #tpu.memory_space<vmem>>, %arg7: memref<16x1xf32, #tpu.memory_space<vmem>>, %arg8: memref<16x128xf32, #tpu.memory_space<vmem>>) attributes {dimension_semantics = [#tpu.dimension_semantics<parallel>], iteration_bounds = array<i64: 1>, scalar_prefetch = 0 : i64, scratch_operands = 0 : i64, tpu.core_type = #tpu.core_type<tc>, window_params = [{transform_indices = @transform_0, window_bounds = array<i64: 1, 32, 4096>}, {pipeline_mode = #tpu.pipeline_mode<synchronous>, transform_indices = @transform_1, window_bounds = array<i64: 3, 16, 32>}, {pipeline_mode = #tpu.pipeline_mode<synchronous>, transform_indices = @transform_2, window_bounds = array<i64: 16, 1>}, {pipeline_mode = #tpu.pipeline_mode<synchronous>, transform_indices = @transform_3, window_bounds = array<i64: 2, 3, 16, 16>}, {pipeline_mode = #tpu.pipeline_mode<synchronous>, transform_indices = @transform_4, window_bounds = array<i64: 2, 16, 1>}, {pipeline_mode = #tpu.pipeline_mode<synchronous>, transform_indices = @transform_5, window_bounds = array<i64: 26, 16, 16>}, {pipeline_mode = #tpu.pipeline_mode<synchronous>, transform_indices = @transform_6, window_bounds = array<i64: 16, 1>}, {transform_indices = @transform_7, window_bounds = array<i64: 16, 128>}]} {
    %c0 = arith.constant 0 : index
    %c0_0 = arith.constant 0 : index
    %c0_1 = arith.constant 0 : index
    %0 = vector.load %arg1[%c0, %c0_0, %c0_1] : memref<1x32x4096xbf16, #tpu.memory_space<vmem>>, vector<1x32x4096xbf16>
    %1 = vector.shape_cast %0 : vector<1x32x4096xbf16> to vector<32x4096xbf16>
    %c0_2 = arith.constant 0 : index
    %c0_3 = arith.constant 0 : index
    %2 = vector.load %arg3[%c0_2, %c0_3] : memref<16x1xf32, #tpu.memory_space<vmem>>, vector<16x1xf32>
    %c0_4 = arith.constant 0 : index
    %c0_5 = arith.constant 0 : index
    %c0_6 = arith.constant 0 : index
    %3 = vector.load %arg2[%c0_4, %c0_5, %c0_6] : memref<3x16x32xbf16, #tpu.memory_space<vmem>>, vector<1x16x32xbf16>
    %4 = vector.shape_cast %3 : vector<1x16x32xbf16> to vector<16x32xbf16>
    %5 = vector.extract_strided_slice %1 {offsets = [0, 0], sizes = [32, 3840], strides = [1, 1]} : vector<32x4096xbf16> to vector<32x3840xbf16>
    %cst = arith.constant dense<0.000000e+00> : vector<16x3840xf32>
    %6 = tpu.matmul %4, %5, %cst {dimension_numbers = #tpu.dot_dimension_numbers<[1], [0], [0], [1], [0, 0, 1, 1], [], []>} : vector<16x32xbf16>, vector<32x3840xbf16>, vector<16x3840xf32> -> vector<16x3840xf32>
    %c1 = arith.constant 1 : index
    %c0_7 = arith.constant 0 : index
    %c0_8 = arith.constant 0 : index
    %7 = vector.load %arg2[%c1, %c0_7, %c0_8] : memref<3x16x32xbf16, #tpu.memory_space<vmem>>, vector<1x16x32xbf16>
    %8 = vector.shape_cast %7 : vector<1x16x32xbf16> to vector<16x32xbf16>
    %9 = vector.extract_strided_slice %1 {offsets = [0, 128], sizes = [32, 3840], strides = [1, 1]} : vector<32x4096xbf16> to vector<32x3840xbf16>
    %cst_9 = arith.constant dense<0.000000e+00> : vector<16x3840xf32>
    %10 = tpu.matmul %8, %9, %cst_9 {dimension_numbers = #tpu.dot_dimension_numbers<[1], [0], [0], [1], [0, 0, 1, 1], [], []>} : vector<16x32xbf16>, vector<32x3840xbf16>, vector<16x3840xf32> -> vector<16x3840xf32>
    %11 = arith.addf %6, %10 : vector<16x3840xf32>
    %c2 = arith.constant 2 : index
    %c0_10 = arith.constant 0 : index
    %c0_11 = arith.constant 0 : index
    %12 = vector.load %arg2[%c2, %c0_10, %c0_11] : memref<3x16x32xbf16, #tpu.memory_space<vmem>>, vector<1x16x32xbf16>
    %13 = vector.shape_cast %12 : vector<1x16x32xbf16> to vector<16x32xbf16>
    %14 = vector.extract_strided_slice %1 {offsets = [0, 256], sizes = [32, 3840], strides = [1, 1]} : vector<32x4096xbf16> to vector<32x3840xbf16>
    %cst_12 = arith.constant dense<0.000000e+00> : vector<16x3840xf32>
    %15 = tpu.matmul %13, %14, %cst_12 {dimension_numbers = #tpu.dot_dimension_numbers<[1], [0], [0], [1], [0, 0, 1, 1], [], []>} : vector<16x32xbf16>, vector<32x3840xbf16>, vector<16x3840xf32> -> vector<16x3840xf32>
    %16 = arith.addf %11, %15 : vector<16x3840xf32>
    %17 = vector.broadcast %2 : vector<16x1xf32> to vector<16x3840xf32>
    %18 = arith.addf %16, %17 : vector<16x3840xf32>
    %cst_13 = arith.constant 0.000000e+00 : f32
    %19 = vector.broadcast %cst_13 : f32 to vector<16x3840xf32>
    %20 = arith.maximumf %18, %19 : vector<16x3840xf32>
    %21 = arith.truncf %20 : vector<16x3840xf32> to vector<16x3840xbf16>
    %c0_14 = arith.constant 0 : index
    %c0_15 = arith.constant 0 : index
    %c0_16 = arith.constant 0 : index
    %22 = vector.load %arg5[%c0_14, %c0_15, %c0_16] : memref<2x16x1xf32, #tpu.memory_space<vmem>>, vector<1x16x1xf32>
    %23 = vector.shape_cast %22 : vector<1x16x1xf32> to vector<16x1xf32>
    %c0_17 = arith.constant 0 : index
    %c0_18 = arith.constant 0 : index
    %c0_19 = arith.constant 0 : index
    %c0_20 = arith.constant 0 : index
    %24 = vector.load %arg4[%c0_17, %c0_18, %c0_19, %c0_20] : memref<2x3x16x16xbf16, #tpu.memory_space<vmem>>, vector<1x1x16x16xbf16>
    %25 = vector.shape_cast %24 : vector<1x1x16x16xbf16> to vector<16x16xbf16>
    %26 = vector.extract_strided_slice %21 {offsets = [0, 0], sizes = [16, 3584], strides = [1, 1]} : vector<16x3840xbf16> to vector<16x3584xbf16>
    %cst_21 = arith.constant dense<0.000000e+00> : vector<16x3584xf32>
    %27 = tpu.matmul %25, %26, %cst_21 {dimension_numbers = #tpu.dot_dimension_numbers<[1], [0], [0], [1], [0, 0, 1, 1], [], []>} : vector<16x16xbf16>, vector<16x3584xbf16>, vector<16x3584xf32> -> vector<16x3584xf32>
    %c0_22 = arith.constant 0 : index
    %c1_23 = arith.constant 1 : index
    %c0_24 = arith.constant 0 : index
    %c0_25 = arith.constant 0 : index
    %28 = vector.load %arg4[%c0_22, %c1_23, %c0_24, %c0_25] : memref<2x3x16x16xbf16, #tpu.memory_space<vmem>>, vector<1x1x16x16xbf16>
    %29 = vector.shape_cast %28 : vector<1x1x16x16xbf16> to vector<16x16xbf16>
    %30 = vector.extract_strided_slice %21 {offsets = [0, 128], sizes = [16, 3584], strides = [1, 1]} : vector<16x3840xbf16> to vector<16x3584xbf16>
    %cst_26 = arith.constant dense<0.000000e+00> : vector<16x3584xf32>
    %31 = tpu.matmul %29, %30, %cst_26 {dimension_numbers = #tpu.dot_dimension_numbers<[1], [0], [0], [1], [0, 0, 1, 1], [], []>} : vector<16x16xbf16>, vector<16x3584xbf16>, vector<16x3584xf32> -> vector<16x3584xf32>
    %32 = arith.addf %27, %31 : vector<16x3584xf32>
    %c0_27 = arith.constant 0 : index
    %c2_28 = arith.constant 2 : index
    %c0_29 = arith.constant 0 : index
    %c0_30 = arith.constant 0 : index
    %33 = vector.load %arg4[%c0_27, %c2_28, %c0_29, %c0_30] : memref<2x3x16x16xbf16, #tpu.memory_space<vmem>>, vector<1x1x16x16xbf16>
    %34 = vector.shape_cast %33 : vector<1x1x16x16xbf16> to vector<16x16xbf16>
    %35 = vector.extract_strided_slice %21 {offsets = [0, 256], sizes = [16, 3584], strides = [1, 1]} : vector<16x3840xbf16> to vector<16x3584xbf16>
    %cst_31 = arith.constant dense<0.000000e+00> : vector<16x3584xf32>
    %36 = tpu.matmul %34, %35, %cst_31 {dimension_numbers = #tpu.dot_dimension_numbers<[1], [0], [0], [1], [0, 0, 1, 1], [], []>} : vector<16x16xbf16>, vector<16x3584xbf16>, vector<16x3584xf32> -> vector<16x3584xf32>
    %37 = arith.addf %32, %36 : vector<16x3584xf32>
    %38 = vector.broadcast %23 : vector<16x1xf32> to vector<16x3584xf32>
    %39 = arith.addf %37, %38 : vector<16x3584xf32>
    %cst_32 = arith.constant 0.000000e+00 : f32
    %40 = vector.broadcast %cst_32 : f32 to vector<16x3584xf32>
    %41 = arith.maximumf %39, %40 : vector<16x3584xf32>
    %42 = arith.truncf %41 : vector<16x3584xf32> to vector<16x3584xbf16>
    %c1_33 = arith.constant 1 : index
    %c0_34 = arith.constant 0 : index
    %c0_35 = arith.constant 0 : index
    %43 = vector.load %arg5[%c1_33, %c0_34, %c0_35] : memref<2x16x1xf32, #tpu.memory_space<vmem>>, vector<1x16x1xf32>
    %44 = vector.shape_cast %43 : vector<1x16x1xf32> to vector<16x1xf32>
    %c1_36 = arith.constant 1 : index
    %c0_37 = arith.constant 0 : index
    %c0_38 = arith.constant 0 : index
    %c0_39 = arith.constant 0 : index
    %45 = vector.load %arg4[%c1_36, %c0_37, %c0_38, %c0_39] : memref<2x3x16x16xbf16, #tpu.memory_space<vmem>>, vector<1x1x16x16xbf16>
    %46 = vector.shape_cast %45 : vector<1x1x16x16xbf16> to vector<16x16xbf16>
    %47 = vector.extract_strided_slice %42 {offsets = [0, 0], sizes = [16, 3328], strides = [1, 1]} : vector<16x3584xbf16> to vector<16x3328xbf16>
    %cst_40 = arith.constant dense<0.000000e+00> : vector<16x3328xf32>
    %48 = tpu.matmul %46, %47, %cst_40 {dimension_numbers = #tpu.dot_dimension_numbers<[1], [0], [0], [1], [0, 0, 1, 1], [], []>} : vector<16x16xbf16>, vector<16x3328xbf16>, vector<16x3328xf32> -> vector<16x3328xf32>
    %c1_41 = arith.constant 1 : index
    %c1_42 = arith.constant 1 : index
    %c0_43 = arith.constant 0 : index
    %c0_44 = arith.constant 0 : index
    %49 = vector.load %arg4[%c1_41, %c1_42, %c0_43, %c0_44] : memref<2x3x16x16xbf16, #tpu.memory_space<vmem>>, vector<1x1x16x16xbf16>
    %50 = vector.shape_cast %49 : vector<1x1x16x16xbf16> to vector<16x16xbf16>
    %51 = vector.extract_strided_slice %42 {offsets = [0, 128], sizes = [16, 3328], strides = [1, 1]} : vector<16x3584xbf16> to vector<16x3328xbf16>
    %cst_45 = arith.constant dense<0.000000e+00> : vector<16x3328xf32>
    %52 = tpu.matmul %50, %51, %cst_45 {dimension_numbers = #tpu.dot_dimension_numbers<[1], [0], [0], [1], [0, 0, 1, 1], [], []>} : vector<16x16xbf16>, vector<16x3328xbf16>, vector<16x3328xf32> -> vector<16x3328xf32>
    %53 = arith.addf %48, %52 : vector<16x3328xf32>
    %c1_46 = arith.constant 1 : index
    %c2_47 = arith.constant 2 : index
    %c0_48 = arith.constant 0 : index
    %c0_49 = arith.constant 0 : index
    %54 = vector.load %arg4[%c1_46, %c2_47, %c0_48, %c0_49] : memref<2x3x16x16xbf16, #tpu.memory_space<vmem>>, vector<1x1x16x16xbf16>
    %55 = vector.shape_cast %54 : vector<1x1x16x16xbf16> to vector<16x16xbf16>
    %56 = vector.extract_strided_slice %42 {offsets = [0, 256], sizes = [16, 3328], strides = [1, 1]} : vector<16x3584xbf16> to vector<16x3328xbf16>
    %cst_50 = arith.constant dense<0.000000e+00> : vector<16x3328xf32>
    %57 = tpu.matmul %55, %56, %cst_50 {dimension_numbers = #tpu.dot_dimension_numbers<[1], [0], [0], [1], [0, 0, 1, 1], [], []>} : vector<16x16xbf16>, vector<16x3328xbf16>, vector<16x3328xf32> -> vector<16x3328xf32>
    %58 = arith.addf %53, %57 : vector<16x3328xf32>
    %59 = vector.broadcast %44 : vector<16x1xf32> to vector<16x3328xf32>
    %60 = arith.addf %58, %59 : vector<16x3328xf32>
    %cst_51 = arith.constant 0.000000e+00 : f32
    %61 = vector.broadcast %cst_51 : f32 to vector<16x3328xf32>
    %62 = arith.maximumf %60, %61 : vector<16x3328xf32>
    %63 = arith.truncf %62 : vector<16x3328xf32> to vector<16x3328xbf16>
    %c0_52 = arith.constant 0 : index
    %c0_53 = arith.constant 0 : index
    %c0_54 = arith.constant 0 : index
    %64 = vector.load %arg6[%c0_52, %c0_53, %c0_54] : memref<26x16x16xbf16, #tpu.memory_space<vmem>>, vector<1x16x16xbf16>
    %65 = vector.shape_cast %64 : vector<1x16x16xbf16> to vector<16x16xbf16>
    %66 = vector.extract_strided_slice %63 {offsets = [0, 0], sizes = [16, 128], strides = [1, 1]} : vector<16x3328xbf16> to vector<16x128xbf16>
    %cst_55 = arith.constant dense<0.000000e+00> : vector<16x128xf32>
    %67 = tpu.matmul %65, %66, %cst_55 {dimension_numbers = #tpu.dot_dimension_numbers<[1], [0], [0], [1], [0, 0, 1, 1], [], []>} : vector<16x16xbf16>, vector<16x128xbf16>, vector<16x128xf32> -> vector<16x128xf32>
    %c1_56 = arith.constant 1 : index
    %c0_57 = arith.constant 0 : index
    %c0_58 = arith.constant 0 : index
    %68 = vector.load %arg6[%c1_56, %c0_57, %c0_58] : memref<26x16x16xbf16, #tpu.memory_space<vmem>>, vector<1x16x16xbf16>
    %69 = vector.shape_cast %68 : vector<1x16x16xbf16> to vector<16x16xbf16>
    %70 = vector.extract_strided_slice %63 {offsets = [0, 128], sizes = [16, 128], strides = [1, 1]} : vector<16x3328xbf16> to vector<16x128xbf16>
    %cst_59 = arith.constant dense<0.000000e+00> : vector<16x128xf32>
    %71 = tpu.matmul %69, %70, %cst_59 {dimension_numbers = #tpu.dot_dimension_numbers<[1], [0], [0], [1], [0, 0, 1, 1], [], []>} : vector<16x16xbf16>, vector<16x128xbf16>, vector<16x128xf32> -> vector<16x128xf32>
    %72 = arith.addf %67, %71 : vector<16x128xf32>
    %c2_60 = arith.constant 2 : index
    %c0_61 = arith.constant 0 : index
    %c0_62 = arith.constant 0 : index
    %73 = vector.load %arg6[%c2_60, %c0_61, %c0_62] : memref<26x16x16xbf16, #tpu.memory_space<vmem>>, vector<1x16x16xbf16>
    %74 = vector.shape_cast %73 : vector<1x16x16xbf16> to vector<16x16xbf16>
    %75 = vector.extract_strided_slice %63 {offsets = [0, 256], sizes = [16, 128], strides = [1, 1]} : vector<16x3328xbf16> to vector<16x128xbf16>
    %cst_63 = arith.constant dense<0.000000e+00> : vector<16x128xf32>
    %76 = tpu.matmul %74, %75, %cst_63 {dimension_numbers = #tpu.dot_dimension_numbers<[1], [0], [0], [1], [0, 0, 1, 1], [], []>} : vector<16x16xbf16>, vector<16x128xbf16>, vector<16x128xf32> -> vector<16x128xf32>
    %77 = arith.addf %72, %76 : vector<16x128xf32>
    %c3 = arith.constant 3 : index
    %c0_64 = arith.constant 0 : index
    %c0_65 = arith.constant 0 : index
    %78 = vector.load %arg6[%c3, %c0_64, %c0_65] : memref<26x16x16xbf16, #tpu.memory_space<vmem>>, vector<1x16x16xbf16>
    %79 = vector.shape_cast %78 : vector<1x16x16xbf16> to vector<16x16xbf16>
    %80 = vector.extract_strided_slice %63 {offsets = [0, 384], sizes = [16, 128], strides = [1, 1]} : vector<16x3328xbf16> to vector<16x128xbf16>
    %cst_66 = arith.constant dense<0.000000e+00> : vector<16x128xf32>
    %81 = tpu.matmul %79, %80, %cst_66 {dimension_numbers = #tpu.dot_dimension_numbers<[1], [0], [0], [1], [0, 0, 1, 1], [], []>} : vector<16x16xbf16>, vector<16x128xbf16>, vector<16x128xf32> -> vector<16x128xf32>
    %82 = arith.addf %77, %81 : vector<16x128xf32>
    %c4 = arith.constant 4 : index
    %c0_67 = arith.constant 0 : index
    %c0_68 = arith.constant 0 : index
    %83 = vector.load %arg6[%c4, %c0_67, %c0_68] : memref<26x16x16xbf16, #tpu.memory_space<vmem>>, vector<1x16x16xbf16>
    %84 = vector.shape_cast %83 : vector<1x16x16xbf16> to vector<16x16xbf16>
    %85 = vector.extract_strided_slice %63 {offsets = [0, 512], sizes = [16, 128], strides = [1, 1]} : vector<16x3328xbf16> to vector<16x128xbf16>
    %cst_69 = arith.constant dense<0.000000e+00> : vector<16x128xf32>
    %86 = tpu.matmul %84, %85, %cst_69 {dimension_numbers = #tpu.dot_dimension_numbers<[1], [0], [0], [1], [0, 0, 1, 1], [], []>} : vector<16x16xbf16>, vector<16x128xbf16>, vector<16x128xf32> -> vector<16x128xf32>
    %87 = arith.addf %82, %86 : vector<16x128xf32>
    %c5 = arith.constant 5 : index
    %c0_70 = arith.constant 0 : index
    %c0_71 = arith.constant 0 : index
    %88 = vector.load %arg6[%c5, %c0_70, %c0_71] : memref<26x16x16xbf16, #tpu.memory_space<vmem>>, vector<1x16x16xbf16>
    %89 = vector.shape_cast %88 : vector<1x16x16xbf16> to vector<16x16xbf16>
    %90 = vector.extract_strided_slice %63 {offsets = [0, 640], sizes = [16, 128], strides = [1, 1]} : vector<16x3328xbf16> to vector<16x128xbf16>
    %cst_72 = arith.constant dense<0.000000e+00> : vector<16x128xf32>
    %91 = tpu.matmul %89, %90, %cst_72 {dimension_numbers = #tpu.dot_dimension_numbers<[1], [0], [0], [1], [0, 0, 1, 1], [], []>} : vector<16x16xbf16>, vector<16x128xbf16>, vector<16x128xf32> -> vector<16x128xf32>
    %92 = arith.addf %87, %91 : vector<16x128xf32>
    %c6 = arith.constant 6 : index
    %c0_73 = arith.constant 0 : index
    %c0_74 = arith.constant 0 : index
    %93 = vector.load %arg6[%c6, %c0_73, %c0_74] : memref<26x16x16xbf16, #tpu.memory_space<vmem>>, vector<1x16x16xbf16>
    %94 = vector.shape_cast %93 : vector<1x16x16xbf16> to vector<16x16xbf16>
    %95 = vector.extract_strided_slice %63 {offsets = [0, 768], sizes = [16, 128], strides = [1, 1]} : vector<16x3328xbf16> to vector<16x128xbf16>
    %cst_75 = arith.constant dense<0.000000e+00> : vector<16x128xf32>
    %96 = tpu.matmul %94, %95, %cst_75 {dimension_numbers = #tpu.dot_dimension_numbers<[1], [0], [0], [1], [0, 0, 1, 1], [], []>} : vector<16x16xbf16>, vector<16x128xbf16>, vector<16x128xf32> -> vector<16x128xf32>
    %97 = arith.addf %92, %96 : vector<16x128xf32>
    %c7 = arith.constant 7 : index
    %c0_76 = arith.constant 0 : index
    %c0_77 = arith.constant 0 : index
    %98 = vector.load %arg6[%c7, %c0_76, %c0_77] : memref<26x16x16xbf16, #tpu.memory_space<vmem>>, vector<1x16x16xbf16>
    %99 = vector.shape_cast %98 : vector<1x16x16xbf16> to vector<16x16xbf16>
    %100 = vector.extract_strided_slice %63 {offsets = [0, 896], sizes = [16, 128], strides = [1, 1]} : vector<16x3328xbf16> to vector<16x128xbf16>
    %cst_78 = arith.constant dense<0.000000e+00> : vector<16x128xf32>
    %101 = tpu.matmul %99, %100, %cst_78 {dimension_numbers = #tpu.dot_dimension_numbers<[1], [0], [0], [1], [0, 0, 1, 1], [], []>} : vector<16x16xbf16>, vector<16x128xbf16>, vector<16x128xf32> -> vector<16x128xf32>
    %102 = arith.addf %97, %101 : vector<16x128xf32>
    %c8 = arith.constant 8 : index
    %c0_79 = arith.constant 0 : index
    %c0_80 = arith.constant 0 : index
    %103 = vector.load %arg6[%c8, %c0_79, %c0_80] : memref<26x16x16xbf16, #tpu.memory_space<vmem>>, vector<1x16x16xbf16>
    %104 = vector.shape_cast %103 : vector<1x16x16xbf16> to vector<16x16xbf16>
    %105 = vector.extract_strided_slice %63 {offsets = [0, 1024], sizes = [16, 128], strides = [1, 1]} : vector<16x3328xbf16> to vector<16x128xbf16>
    %cst_81 = arith.constant dense<0.000000e+00> : vector<16x128xf32>
    %106 = tpu.matmul %104, %105, %cst_81 {dimension_numbers = #tpu.dot_dimension_numbers<[1], [0], [0], [1], [0, 0, 1, 1], [], []>} : vector<16x16xbf16>, vector<16x128xbf16>, vector<16x128xf32> -> vector<16x128xf32>
    %107 = arith.addf %102, %106 : vector<16x128xf32>
    %c9 = arith.constant 9 : index
    %c0_82 = arith.constant 0 : index
    %c0_83 = arith.constant 0 : index
    %108 = vector.load %arg6[%c9, %c0_82, %c0_83] : memref<26x16x16xbf16, #tpu.memory_space<vmem>>, vector<1x16x16xbf16>
    %109 = vector.shape_cast %108 : vector<1x16x16xbf16> to vector<16x16xbf16>
    %110 = vector.extract_strided_slice %63 {offsets = [0, 1152], sizes = [16, 128], strides = [1, 1]} : vector<16x3328xbf16> to vector<16x128xbf16>
    %cst_84 = arith.constant dense<0.000000e+00> : vector<16x128xf32>
    %111 = tpu.matmul %109, %110, %cst_84 {dimension_numbers = #tpu.dot_dimension_numbers<[1], [0], [0], [1], [0, 0, 1, 1], [], []>} : vector<16x16xbf16>, vector<16x128xbf16>, vector<16x128xf32> -> vector<16x128xf32>
    %112 = arith.addf %107, %111 : vector<16x128xf32>
    %c10 = arith.constant 10 : index
    %c0_85 = arith.constant 0 : index
    %c0_86 = arith.constant 0 : index
    %113 = vector.load %arg6[%c10, %c0_85, %c0_86] : memref<26x16x16xbf16, #tpu.memory_space<vmem>>, vector<1x16x16xbf16>
    %114 = vector.shape_cast %113 : vector<1x16x16xbf16> to vector<16x16xbf16>
    %115 = vector.extract_strided_slice %63 {offsets = [0, 1280], sizes = [16, 128], strides = [1, 1]} : vector<16x3328xbf16> to vector<16x128xbf16>
    %cst_87 = arith.constant dense<0.000000e+00> : vector<16x128xf32>
    %116 = tpu.matmul %114, %115, %cst_87 {dimension_numbers = #tpu.dot_dimension_numbers<[1], [0], [0], [1], [0, 0, 1, 1], [], []>} : vector<16x16xbf16>, vector<16x128xbf16>, vector<16x128xf32> -> vector<16x128xf32>
    %117 = arith.addf %112, %116 : vector<16x128xf32>
    %c11 = arith.constant 11 : index
    %c0_88 = arith.constant 0 : index
    %c0_89 = arith.constant 0 : index
    %118 = vector.load %arg6[%c11, %c0_88, %c0_89] : memref<26x16x16xbf16, #tpu.memory_space<vmem>>, vector<1x16x16xbf16>
    %119 = vector.shape_cast %118 : vector<1x16x16xbf16> to vector<16x16xbf16>
    %120 = vector.extract_strided_slice %63 {offsets = [0, 1408], sizes = [16, 128], strides = [1, 1]} : vector<16x3328xbf16> to vector<16x128xbf16>
    %cst_90 = arith.constant dense<0.000000e+00> : vector<16x128xf32>
    %121 = tpu.matmul %119, %120, %cst_90 {dimension_numbers = #tpu.dot_dimension_numbers<[1], [0], [0], [1], [0, 0, 1, 1], [], []>} : vector<16x16xbf16>, vector<16x128xbf16>, vector<16x128xf32> -> vector<16x128xf32>
    %122 = arith.addf %117, %121 : vector<16x128xf32>
    %c12 = arith.constant 12 : index
    %c0_91 = arith.constant 0 : index
    %c0_92 = arith.constant 0 : index
    %123 = vector.load %arg6[%c12, %c0_91, %c0_92] : memref<26x16x16xbf16, #tpu.memory_space<vmem>>, vector<1x16x16xbf16>
    %124 = vector.shape_cast %123 : vector<1x16x16xbf16> to vector<16x16xbf16>
    %125 = vector.extract_strided_slice %63 {offsets = [0, 1536], sizes = [16, 128], strides = [1, 1]} : vector<16x3328xbf16> to vector<16x128xbf16>
    %cst_93 = arith.constant dense<0.000000e+00> : vector<16x128xf32>
    %126 = tpu.matmul %124, %125, %cst_93 {dimension_numbers = #tpu.dot_dimension_numbers<[1], [0], [0], [1], [0, 0, 1, 1], [], []>} : vector<16x16xbf16>, vector<16x128xbf16>, vector<16x128xf32> -> vector<16x128xf32>
    %127 = arith.addf %122, %126 : vector<16x128xf32>
    %c13 = arith.constant 13 : index
    %c0_94 = arith.constant 0 : index
    %c0_95 = arith.constant 0 : index
    %128 = vector.load %arg6[%c13, %c0_94, %c0_95] : memref<26x16x16xbf16, #tpu.memory_space<vmem>>, vector<1x16x16xbf16>
    %129 = vector.shape_cast %128 : vector<1x16x16xbf16> to vector<16x16xbf16>
    %130 = vector.extract_strided_slice %63 {offsets = [0, 1664], sizes = [16, 128], strides = [1, 1]} : vector<16x3328xbf16> to vector<16x128xbf16>
    %cst_96 = arith.constant dense<0.000000e+00> : vector<16x128xf32>
    %131 = tpu.matmul %129, %130, %cst_96 {dimension_numbers = #tpu.dot_dimension_numbers<[1], [0], [0], [1], [0, 0, 1, 1], [], []>} : vector<16x16xbf16>, vector<16x128xbf16>, vector<16x128xf32> -> vector<16x128xf32>
    %132 = arith.addf %127, %131 : vector<16x128xf32>
    %c14 = arith.constant 14 : index
    %c0_97 = arith.constant 0 : index
    %c0_98 = arith.constant 0 : index
    %133 = vector.load %arg6[%c14, %c0_97, %c0_98] : memref<26x16x16xbf16, #tpu.memory_space<vmem>>, vector<1x16x16xbf16>
    %134 = vector.shape_cast %133 : vector<1x16x16xbf16> to vector<16x16xbf16>
    %135 = vector.extract_strided_slice %63 {offsets = [0, 1792], sizes = [16, 128], strides = [1, 1]} : vector<16x3328xbf16> to vector<16x128xbf16>
    %cst_99 = arith.constant dense<0.000000e+00> : vector<16x128xf32>
    %136 = tpu.matmul %134, %135, %cst_99 {dimension_numbers = #tpu.dot_dimension_numbers<[1], [0], [0], [1], [0, 0, 1, 1], [], []>} : vector<16x16xbf16>, vector<16x128xbf16>, vector<16x128xf32> -> vector<16x128xf32>
    %137 = arith.addf %132, %136 : vector<16x128xf32>
    %c15 = arith.constant 15 : index
    %c0_100 = arith.constant 0 : index
    %c0_101 = arith.constant 0 : index
    %138 = vector.load %arg6[%c15, %c0_100, %c0_101] : memref<26x16x16xbf16, #tpu.memory_space<vmem>>, vector<1x16x16xbf16>
    %139 = vector.shape_cast %138 : vector<1x16x16xbf16> to vector<16x16xbf16>
    %140 = vector.extract_strided_slice %63 {offsets = [0, 1920], sizes = [16, 128], strides = [1, 1]} : vector<16x3328xbf16> to vector<16x128xbf16>
    %cst_102 = arith.constant dense<0.000000e+00> : vector<16x128xf32>
    %141 = tpu.matmul %139, %140, %cst_102 {dimension_numbers = #tpu.dot_dimension_numbers<[1], [0], [0], [1], [0, 0, 1, 1], [], []>} : vector<16x16xbf16>, vector<16x128xbf16>, vector<16x128xf32> -> vector<16x128xf32>
    %142 = arith.addf %137, %141 : vector<16x128xf32>
    %c16 = arith.constant 16 : index
    %c0_103 = arith.constant 0 : index
    %c0_104 = arith.constant 0 : index
    %143 = vector.load %arg6[%c16, %c0_103, %c0_104] : memref<26x16x16xbf16, #tpu.memory_space<vmem>>, vector<1x16x16xbf16>
    %144 = vector.shape_cast %143 : vector<1x16x16xbf16> to vector<16x16xbf16>
    %145 = vector.extract_strided_slice %63 {offsets = [0, 2048], sizes = [16, 128], strides = [1, 1]} : vector<16x3328xbf16> to vector<16x128xbf16>
    %cst_105 = arith.constant dense<0.000000e+00> : vector<16x128xf32>
    %146 = tpu.matmul %144, %145, %cst_105 {dimension_numbers = #tpu.dot_dimension_numbers<[1], [0], [0], [1], [0, 0, 1, 1], [], []>} : vector<16x16xbf16>, vector<16x128xbf16>, vector<16x128xf32> -> vector<16x128xf32>
    %147 = arith.addf %142, %146 : vector<16x128xf32>
    %c17 = arith.constant 17 : index
    %c0_106 = arith.constant 0 : index
    %c0_107 = arith.constant 0 : index
    %148 = vector.load %arg6[%c17, %c0_106, %c0_107] : memref<26x16x16xbf16, #tpu.memory_space<vmem>>, vector<1x16x16xbf16>
    %149 = vector.shape_cast %148 : vector<1x16x16xbf16> to vector<16x16xbf16>
    %150 = vector.extract_strided_slice %63 {offsets = [0, 2176], sizes = [16, 128], strides = [1, 1]} : vector<16x3328xbf16> to vector<16x128xbf16>
    %cst_108 = arith.constant dense<0.000000e+00> : vector<16x128xf32>
    %151 = tpu.matmul %149, %150, %cst_108 {dimension_numbers = #tpu.dot_dimension_numbers<[1], [0], [0], [1], [0, 0, 1, 1], [], []>} : vector<16x16xbf16>, vector<16x128xbf16>, vector<16x128xf32> -> vector<16x128xf32>
    %152 = arith.addf %147, %151 : vector<16x128xf32>
    %c18 = arith.constant 18 : index
    %c0_109 = arith.constant 0 : index
    %c0_110 = arith.constant 0 : index
    %153 = vector.load %arg6[%c18, %c0_109, %c0_110] : memref<26x16x16xbf16, #tpu.memory_space<vmem>>, vector<1x16x16xbf16>
    %154 = vector.shape_cast %153 : vector<1x16x16xbf16> to vector<16x16xbf16>
    %155 = vector.extract_strided_slice %63 {offsets = [0, 2304], sizes = [16, 128], strides = [1, 1]} : vector<16x3328xbf16> to vector<16x128xbf16>
    %cst_111 = arith.constant dense<0.000000e+00> : vector<16x128xf32>
    %156 = tpu.matmul %154, %155, %cst_111 {dimension_numbers = #tpu.dot_dimension_numbers<[1], [0], [0], [1], [0, 0, 1, 1], [], []>} : vector<16x16xbf16>, vector<16x128xbf16>, vector<16x128xf32> -> vector<16x128xf32>
    %157 = arith.addf %152, %156 : vector<16x128xf32>
    %c19 = arith.constant 19 : index
    %c0_112 = arith.constant 0 : index
    %c0_113 = arith.constant 0 : index
    %158 = vector.load %arg6[%c19, %c0_112, %c0_113] : memref<26x16x16xbf16, #tpu.memory_space<vmem>>, vector<1x16x16xbf16>
    %159 = vector.shape_cast %158 : vector<1x16x16xbf16> to vector<16x16xbf16>
    %160 = vector.extract_strided_slice %63 {offsets = [0, 2432], sizes = [16, 128], strides = [1, 1]} : vector<16x3328xbf16> to vector<16x128xbf16>
    %cst_114 = arith.constant dense<0.000000e+00> : vector<16x128xf32>
    %161 = tpu.matmul %159, %160, %cst_114 {dimension_numbers = #tpu.dot_dimension_numbers<[1], [0], [0], [1], [0, 0, 1, 1], [], []>} : vector<16x16xbf16>, vector<16x128xbf16>, vector<16x128xf32> -> vector<16x128xf32>
    %162 = arith.addf %157, %161 : vector<16x128xf32>
    %c20 = arith.constant 20 : index
    %c0_115 = arith.constant 0 : index
    %c0_116 = arith.constant 0 : index
    %163 = vector.load %arg6[%c20, %c0_115, %c0_116] : memref<26x16x16xbf16, #tpu.memory_space<vmem>>, vector<1x16x16xbf16>
    %164 = vector.shape_cast %163 : vector<1x16x16xbf16> to vector<16x16xbf16>
    %165 = vector.extract_strided_slice %63 {offsets = [0, 2560], sizes = [16, 128], strides = [1, 1]} : vector<16x3328xbf16> to vector<16x128xbf16>
    %cst_117 = arith.constant dense<0.000000e+00> : vector<16x128xf32>
    %166 = tpu.matmul %164, %165, %cst_117 {dimension_numbers = #tpu.dot_dimension_numbers<[1], [0], [0], [1], [0, 0, 1, 1], [], []>} : vector<16x16xbf16>, vector<16x128xbf16>, vector<16x128xf32> -> vector<16x128xf32>
    %167 = arith.addf %162, %166 : vector<16x128xf32>
    %c21 = arith.constant 21 : index
    %c0_118 = arith.constant 0 : index
    %c0_119 = arith.constant 0 : index
    %168 = vector.load %arg6[%c21, %c0_118, %c0_119] : memref<26x16x16xbf16, #tpu.memory_space<vmem>>, vector<1x16x16xbf16>
    %169 = vector.shape_cast %168 : vector<1x16x16xbf16> to vector<16x16xbf16>
    %170 = vector.extract_strided_slice %63 {offsets = [0, 2688], sizes = [16, 128], strides = [1, 1]} : vector<16x3328xbf16> to vector<16x128xbf16>
    %cst_120 = arith.constant dense<0.000000e+00> : vector<16x128xf32>
    %171 = tpu.matmul %169, %170, %cst_120 {dimension_numbers = #tpu.dot_dimension_numbers<[1], [0], [0], [1], [0, 0, 1, 1], [], []>} : vector<16x16xbf16>, vector<16x128xbf16>, vector<16x128xf32> -> vector<16x128xf32>
    %172 = arith.addf %167, %171 : vector<16x128xf32>
    %c22 = arith.constant 22 : index
    %c0_121 = arith.constant 0 : index
    %c0_122 = arith.constant 0 : index
    %173 = vector.load %arg6[%c22, %c0_121, %c0_122] : memref<26x16x16xbf16, #tpu.memory_space<vmem>>, vector<1x16x16xbf16>
    %174 = vector.shape_cast %173 : vector<1x16x16xbf16> to vector<16x16xbf16>
    %175 = vector.extract_strided_slice %63 {offsets = [0, 2816], sizes = [16, 128], strides = [1, 1]} : vector<16x3328xbf16> to vector<16x128xbf16>
    %cst_123 = arith.constant dense<0.000000e+00> : vector<16x128xf32>
    %176 = tpu.matmul %174, %175, %cst_123 {dimension_numbers = #tpu.dot_dimension_numbers<[1], [0], [0], [1], [0, 0, 1, 1], [], []>} : vector<16x16xbf16>, vector<16x128xbf16>, vector<16x128xf32> -> vector<16x128xf32>
    %177 = arith.addf %172, %176 : vector<16x128xf32>
    %c23 = arith.constant 23 : index
    %c0_124 = arith.constant 0 : index
    %c0_125 = arith.constant 0 : index
    %178 = vector.load %arg6[%c23, %c0_124, %c0_125] : memref<26x16x16xbf16, #tpu.memory_space<vmem>>, vector<1x16x16xbf16>
    %179 = vector.shape_cast %178 : vector<1x16x16xbf16> to vector<16x16xbf16>
    %180 = vector.extract_strided_slice %63 {offsets = [0, 2944], sizes = [16, 128], strides = [1, 1]} : vector<16x3328xbf16> to vector<16x128xbf16>
    %cst_126 = arith.constant dense<0.000000e+00> : vector<16x128xf32>
    %181 = tpu.matmul %179, %180, %cst_126 {dimension_numbers = #tpu.dot_dimension_numbers<[1], [0], [0], [1], [0, 0, 1, 1], [], []>} : vector<16x16xbf16>, vector<16x128xbf16>, vector<16x128xf32> -> vector<16x128xf32>
    %182 = arith.addf %177, %181 : vector<16x128xf32>
    %c24 = arith.constant 24 : index
    %c0_127 = arith.constant 0 : index
    %c0_128 = arith.constant 0 : index
    %183 = vector.load %arg6[%c24, %c0_127, %c0_128] : memref<26x16x16xbf16, #tpu.memory_space<vmem>>, vector<1x16x16xbf16>
    %184 = vector.shape_cast %183 : vector<1x16x16xbf16> to vector<16x16xbf16>
    %185 = vector.extract_strided_slice %63 {offsets = [0, 3072], sizes = [16, 128], strides = [1, 1]} : vector<16x3328xbf16> to vector<16x128xbf16>
    %cst_129 = arith.constant dense<0.000000e+00> : vector<16x128xf32>
    %186 = tpu.matmul %184, %185, %cst_129 {dimension_numbers = #tpu.dot_dimension_numbers<[1], [0], [0], [1], [0, 0, 1, 1], [], []>} : vector<16x16xbf16>, vector<16x128xbf16>, vector<16x128xf32> -> vector<16x128xf32>
    %187 = arith.addf %182, %186 : vector<16x128xf32>
    %c25 = arith.constant 25 : index
    %c0_130 = arith.constant 0 : index
    %c0_131 = arith.constant 0 : index
    %188 = vector.load %arg6[%c25, %c0_130, %c0_131] : memref<26x16x16xbf16, #tpu.memory_space<vmem>>, vector<1x16x16xbf16>
    %189 = vector.shape_cast %188 : vector<1x16x16xbf16> to vector<16x16xbf16>
    %190 = vector.extract_strided_slice %63 {offsets = [0, 3200], sizes = [16, 128], strides = [1, 1]} : vector<16x3328xbf16> to vector<16x128xbf16>
    %cst_132 = arith.constant dense<0.000000e+00> : vector<16x128xf32>
    %191 = tpu.matmul %189, %190, %cst_132 {dimension_numbers = #tpu.dot_dimension_numbers<[1], [0], [0], [1], [0, 0, 1, 1], [], []>} : vector<16x16xbf16>, vector<16x128xbf16>, vector<16x128xf32> -> vector<16x128xf32>
    %192 = arith.addf %187, %191 : vector<16x128xf32>
    %c0_133 = arith.constant 0 : index
    %c0_134 = arith.constant 0 : index
    %193 = vector.load %arg7[%c0_133, %c0_134] : memref<16x1xf32, #tpu.memory_space<vmem>>, vector<16x1xf32>
    %194 = vector.broadcast %193 : vector<16x1xf32> to vector<16x128xf32>
    %195 = arith.addf %192, %194 : vector<16x128xf32>
    %c0_135 = arith.constant 0 : index
    %c0_136 = arith.constant 0 : index
    %196 = vector.load %arg8[%c0_135, %c0_136] : memref<16x128xf32, #tpu.memory_space<vmem>>, vector<16x128xf32>
    tpu.vector_store %arg8[%c0_135, %c0_136], %195 {strides = array<i32>} : memref<16x128xf32, #tpu.memory_space<vmem>>, vector<16x128xf32>,
    return
  }
  func.func @transform_0(%arg0: i32) -> (i32, i32, i32) {
    %c0_i32 = arith.constant 0 : i32
    %c0_i32_0 = arith.constant 0 : i32
    %c0_i32_1 = arith.constant 0 : i32
    return %arg0, %c0_i32, %c0_i32_0 : i32, i32, i32
  }
  func.func @transform_1(%arg0: i32) -> (i32, i32, i32) {
    %c0_i32 = arith.constant 0 : i32
    %c0_i32_0 = arith.constant 0 : i32
    %c0_i32_1 = arith.constant 0 : i32
    %c0_i32_2 = arith.constant 0 : i32
    return %c0_i32, %c0_i32_0, %c0_i32_1 : i32, i32, i32
  }
  func.func @transform_2(%arg0: i32) -> (i32, i32) {
    %c0_i32 = arith.constant 0 : i32
    %c0_i32_0 = arith.constant 0 : i32
    %c0_i32_1 = arith.constant 0 : i32
    return %c0_i32, %c0_i32_0 : i32, i32
  }
  func.func @transform_3(%arg0: i32) -> (i32, i32, i32, i32) {
    %c0_i32 = arith.constant 0 : i32
    %c0_i32_0 = arith.constant 0 : i32
    %c0_i32_1 = arith.constant 0 : i32
    %c0_i32_2 = arith.constant 0 : i32
    %c0_i32_3 = arith.constant 0 : i32
    return %c0_i32, %c0_i32_0, %c0_i32_1, %c0_i32_2 : i32, i32, i32, i32
  }
  func.func @transform_4(%arg0: i32) -> (i32, i32, i32) {
    %c0_i32 = arith.constant 0 : i32
    %c0_i32_0 = arith.constant 0 : i32
    %c0_i32_1 = arith.constant 0 : i32
    %c0_i32_2 = arith.constant 0 : i32
    return %c0_i32, %c0_i32_0, %c0_i32_1 : i32, i32, i32
  }
  func.func @transform_5(%arg0: i32) -> (i32, i32, i32) {
    %c0_i32 = arith.constant 0 : i32
    %c0_i32_0 = arith.constant 0 : i32
    %c0_i32_1 = arith.constant 0 : i32
    %c0_i32_2 = arith.constant 0 : i32
    return %c0_i32, %c0_i32_0, %c0_i32_1 : i32, i32, i32
  }
  func.func @transform_6(%arg0: i32) -> (i32, i32) {
    %c0_i32 = arith.constant 0 : i32
    %c0_i32_0 = arith.constant 0 : i32
    %c0_i32_1 = arith.constant 0 : i32
    return %c0_i32, %c0_i32_0 : i32, i32
  }
  func.func @transform_7(%arg0: i32) -> (i32, i32) {
    %c0_i32 = arith.constant 0 : i32
    %c0_i32_0 = arith.constant 0 : i32
    return %c0_i32, %arg0 : i32, i32
  }
}

</mosaic_0001>

<bundles_post_ra>
// kernel: tpu_custom_call.1
= control target key start
LH: loop header
LB: loop body
LE: loop exit
PB: predicated region body
PF: predicated region fallthrough
CT: control target
= control target key end

     0   :  { %12 = vsyncpa [#allocation3], 0  ;;  %s11136_s0 = inlined_call_operand.hbm [shape: bf16[1,32,4096], index: 0, kind: input, shape index: {}]   ;;  %s11137_s1 = inlined_call_operand.vmem [shape: bf16[3,16,32], index: 1, kind: input, shape index: {}]   ;;  %s11138_s2 = inlined_call_operand.vmem [shape: f32[16,1], index: 2, kind: input, shape index: {}]   ;;  %s11139_s3 = inlined_call_operand.vmem [shape: bf16[2,3,16,16], index: 3, kind: input, shape index: {}]   ;;  %s11140_s4 = inlined_call_operand.vmem [shape: f32[2,16,1], index: 4, kind: input, shape index: {}]   ;;  %s11141_s5 = inlined_call_operand.vmem [shape: bf16[26,16,16], index: 5, kind: input, shape index: {}]   ;;  %s11142_s6 = inlined_call_operand.vmem [shape: f32[16,1], index: 6, kind: input, shape index: {}]   ;;  %s11143_s7 = inlined_call_operand.hbm [shape: f32[16,128], index: 7, kind: output, shape index: {}]  }
   0x1   :  { %13 = vsyncpa [#allocation4], 0  ;;  %s8614_s24 = smov [#allocation2]  }
   0x2   :  { %s19_s25 = sshll.u32 %s8614_s24, 4  ;;  %s20_s25 = int_to_ptr.vmem [resolvable:$true] %s19_s25 }
   0x3   :  { %s8578_s26 = scalar_lea.vmem %s20_s25, 8192  ;;  %p8583_p1 = scmp.lt.s32.totalorder %s20_s25, %s20_s25 }
   0x4   :  { %p8579_p0 = scmp.ne.s32.totalorder %s20_s25, %s8578_s26  ;;  %p8584_p2 = scmp.lt.s32.totalorder %s8578_s26, %s8578_s26 }
   0x6   :  { %p8585_p3 = por %p8584_p2, %p8583_p1 }
   0x8   :  { %p8586_p4 = pnand %p8585_p3, %p8579_p0 }
   0xa   :  { %8589 = shalt.err (!%p8586_p4)
}
   0xb   :  { %s8615_s27 = smov 2048   ;;  %s8616_s28 = smov 128  }
   0xc   :  { %25 = dma.hbm_to_vmem [thread:$0]  %s11136_s0, 8192, %s20_s25, [#allocation3], %s8615_s27, %s8615_s27, %s8616_s28  }
   0xd   :  { %8610 = dma.done.wait [#allocation3], 8192  }
   0xe   :  { %8611 = vsyncadd [#allocation3], 4294959104  ;;  %v11162_v0 = vmov 0   ;;  %v75_v1 = vld [vmem:[#allocation2 + $0x108] sm:$0xff]  ;;  %v76_v3 = vld [vmem:[#allocation2 + $0x110] sm:$0xff]  ;;  %vm422_vm0 = vcmask 261120  }
   0xf   :  { %458 = vmatprep.mubr.bf16.mxu0 %v11162_v0  ;;  %501 = vmatprep.mubr.bf16.mxu1 %v11162_v0  ;;  %v91_v2 = vld [vmem:[#allocation2 + $0x188] sm:$0xff]  ;;  %v92_v5 = vld [vmem:[#allocation2 + $0x190] sm:$0xff]  ;;  %v8672_v6 = vld [vmem:[#allocation2 + $0x100] sm:$0xff]  ;;  %vm2628_vm1 = vcmask 130048   ;;  %vm8619_vm2 = vmmov 0  }
  0x10   :  { %8533 = vset.pattern.permute.xlu0 %v11162_v0  ;;  %8534 = vset.pattern.permute.xlu1 %v11162_v0  ;;  %v8670_v4 = vcombine.low %v75_v1, %v91_v2  ;;  %v8674_v7 = vld [vmem:[#allocation2 + $0x180] sm:$0xff]  ;;  %v8676_v8 = vcombine.high %v75_v1, %v91_v2  ;;  %v8678_v9 = vcombine.low %v76_v3, %v92_v5  ;;  %v43_v11 = vld [vmem:[#allocation2 + $0x8] sm:$0xff]  ;;  %v44_v13 = vld [vmem:[#allocation2 + $0x10] sm:$0xff] }
  0x11   :  { %v8682_v10 = vcombine.high %v8672_v6, %v8674_v7  ;;  %v59_v12 = vld [vmem:[#allocation2 + $0x88] sm:$0xff]  ;;  %v60_v15 = vld [vmem:[#allocation2 + $0x90] sm:$0xff]  ;;  %v8687_v16 = vld [vmem:[#allocation2] sm:$0xff]  ;;  %v8713_v32 = vcombine.high %v76_v3, %v92_v5 }
  0x12   :  { %438 = vmatprep.subr.bf16.mxu0 %v8670_v4  ;;  %v8685_v14 = vcombine.low %v43_v11, %v59_v12  ;;  %v8689_v17 = vld [vmem:[#allocation2 + $0x80] sm:$0xff]  ;;  %481 = vmatprep.subr.bf16.mxu1 %v8678_v9  ;;  %v8693_v18 = vcombine.low %v44_v13, %v60_v15  ;;  %v8701_v20 = vcombine.high %v43_v11, %v59_v12  ;;  %v77_v21 = vld [vmem:[#allocation2 + $0x118] sm:$0xff]  ;;  %v8709_v28 = vld [vmem:[%s11137_s1 + $0x8] sm:$0xff]  }
  0x13   :  { %439 = vmatpush1.bf16.msra.mxu0 %v8682_v10  ;;  %v8697_v19 = vcombine.high %v8687_v16, %v8689_v17  ;;  %482 = vmatpush1.bf16.msra.mxu1 %v8676_v8  ;;  %v93_v22 = vld [vmem:[#allocation2 + $0x198] sm:$0xff]  ;;  %v78_v23 = vld [vmem:[#allocation2 + $0x120] sm:$0xff]  ;;  %v79_v36 = vld [vmem:[#allocation2 + $0x128] sm:$0xff]  ;;  %v8727_v40 = vcombine.high %v44_v13, %v60_v15 }
  0x14   :  { %440 = vmatprep.subr.bf16.mxu0 %v8685_v14  ;;  %483 = vmatprep.subr.bf16.mxu1 %v8693_v18  ;;  %v8704_v24 = vcombine.low %v77_v21, %v93_v22  ;;  %v94_v25 = vld [vmem:[#allocation2 + $0x1a0] sm:$0xff]  ;;  %v45_v26 = vld [vmem:[#allocation2 + $0x18] sm:$0xff]  ;;  %v8717_v33 = vcombine.high %v77_v21, %v93_v22  ;;  %v95_v37 = vld [vmem:[#allocation2 + $0x1a8] sm:$0xff] }
  0x15   :  { %v61_v27 = vld [vmem:[#allocation2 + $0x98] sm:$0xff]  ;;  %v8711_v29 = vcombine.low %v78_v23, %v94_v25  ;;  %v46_v30 = vld [vmem:[#allocation2 + $0x20] sm:$0xff]  ;;  %v80_v38 = vld [vmem:[#allocation2 + $0x130] sm:$0xff]  ;;  %v8736_v42 = vcombine.low %v79_v36, %v95_v37  ;;  %v8743_v48 = vcombine.high %v78_v23, %v94_v25  ;;  %v8747_v49 = vcombine.high %v79_v36, %v95_v37 }
  0x16   :  { %v62_v31 = vld [vmem:[#allocation2 + $0xa0] sm:$0xff]  ;;  %v8720_v34 = vcombine.low %v45_v26, %v61_v27  ;;  %v96_v39 = vld [vmem:[#allocation2 + $0x1b0] sm:$0xff]  ;;  %v8733_v41 = vcombine.high %v45_v26, %v61_v27  ;;  %v47_v44 = vld [vmem:[#allocation2 + $0x28] sm:$0xff] }
  0x17   :  { %441 = vmatpush1.bf16.msra.mxu0 %v8697_v19  ;;  %484 = vmatpush1.bf16.msra.mxu1 %v8701_v20  ;;  %v8723_v35 = vcombine.low %v46_v30, %v62_v31  ;;  %v8740_v43 = vcombine.low %v80_v38, %v96_v39  ;;  %v63_v45 = vld [vmem:[#allocation2 + $0xa8] sm:$0xff]  ;;  %v48_v46 = vld [vmem:[#allocation2 + $0x30] sm:$0xff]  ;;  %v81_v52 = vld [vmem:[#allocation2 + $0x138] sm:$0xff]  ;;  %v8757_v56 = vcombine.high %v46_v30, %v62_v31 }
  0x18   :  { %524 = vmatprep.subr.bf16.mxu0 %v8704_v24  ;;  %567 = vmatprep.subr.bf16.mxu1 %v8711_v29  ;;  %v64_v47 = vld [vmem:[#allocation2 + $0xb0] sm:$0xff]  ;;  %v8750_v50 = vcombine.low %v47_v44, %v63_v45  ;;  %v97_v53 = vld [vmem:[#allocation2 + $0x1b8] sm:$0xff]  ;;  %v82_v54 = vld [vmem:[#allocation2 + $0x140] sm:$0xff]  ;;  %v8763_v57 = vcombine.high %v47_v44, %v63_v45  ;;  %v8773_v1 = vcombine.high %v80_v38, %v96_v39 }
  0x19   :  { %v8753_v51 = vcombine.low %v48_v46, %v64_v47  ;;  %v98_v55 = vld [vmem:[#allocation2 + $0x1c0] sm:$0xff]  ;;  %v8766_v58 = vcombine.low %v81_v52, %v97_v53  ;;  %v49_v59 = vld [vmem:[#allocation2 + $0x38] sm:$0xff]  ;;  %v83_v2 = vld [vmem:[#allocation2 + $0x148] sm:$0xff]  ;;  %v8777_v5 = vcombine.high %v81_v52, %v97_v53  ;;  %v8787_v21 = vcombine.high %v48_v46, %v64_v47 }
  0x1a   :  { %8063 = vmatmul.mubr.msk.bf16.vlgmr.msra.gmra.mxu0 %vm422_vm0, %v8709_v28  ;;  %8064 = vmatmul.mubr.msk.bf16.vlgmr.msra.gmra.mxu1 %vm422_vm0, %v8709_v28  ;;  %v65_v60 = vld [vmem:[#allocation2 + $0xb8] sm:$0xff]  ;;  %v8770_v61 = vcombine.low %v82_v54, %v98_v55  ;;  %v50_v62 = vld [vmem:[#allocation2 + $0x40] sm:$0xff]  ;;  %v99_v3 = vld [vmem:[#allocation2 + $0x1c8] sm:$0xff]  ;;  %v8803_v36 = vcombine.high %v82_v54, %v98_v55 }
  0x1b   :  { %525 = vmatpush1.bf16.msra.mxu0 %v8713_v32  ;;  %568 = vmatpush1.bf16.msra.mxu1 %v8717_v33  ;;  %v66_v63 = vld [vmem:[#allocation2 + $0xc0] sm:$0xff]  ;;  %v8780_v11 = vcombine.low %v49_v59, %v65_v60  ;;  %v84_v12 = vld [vmem:[#allocation2 + $0x150] sm:$0xff]  ;;  %v51_v22 = vld [vmem:[#allocation2 + $0x48] sm:$0xff]  ;;  %v8793_v25 = vcombine.high %v49_v59, %v65_v60  ;;  %v8796_v26 = vcombine.low %v83_v2, %v99_v3 }
  0x1c   :  { %526 = vmatprep.subr.bf16.mxu0 %v8720_v34  ;;  %569 = vmatprep.subr.bf16.mxu1 %v8723_v35  ;;  %v100_v13 = vld [vmem:[#allocation2 + $0x1d0] sm:$0xff]  ;;  %v8783_v15 = vcombine.low %v50_v62, %v66_v63  ;;  %v67_v23 = vld [vmem:[#allocation2 + $0xc8] sm:$0xff]  ;;  %v85_v37 = vld [vmem:[#allocation2 + $0x158] sm:$0xff]  ;;  %v8807_v39 = vcombine.high %v83_v2, %v99_v3  ;;  %v8817_v52 = vcombine.high %v50_v62, %v66_v63 }
  0x1d   :  { %544 = vmatprep.mubr.bf16.mxu0 %v11162_v0  ;;  %587 = vmatprep.mubr.bf16.mxu1 %v11162_v0  ;;  %11172 = vst [vmem:[#allocation8_spill] sm:$0xff] %v8796_v26  ;;  %v52_v27 = vld [vmem:[#allocation2 + $0x50] sm:$0xff]  ;;  %v8800_v31 = vcombine.low %v84_v12, %v100_v13  ;;  %v101_v38 = vld [vmem:[#allocation2 + $0x1d8] sm:$0xff]  ;;  %v8810_v44 = vcombine.low %v51_v22, %v67_v23  ;;  %v86_v45 = vld [vmem:[#allocation2 + $0x160] sm:$0xff] }
  0x1e   :  { %v68_v30 = vld [vmem:[#allocation2 + $0xd0] sm:$0xff]  ;;  %v102_v46 = vld [vmem:[#allocation2 + $0x1e0] sm:$0xff]  ;;  %v53_v53 = vld [vmem:[#allocation2 + $0x58] sm:$0xff]  ;;  %v8823_v55 = vcombine.high %v51_v22, %v67_v23  ;;  %v8826_v59 = vcombine.low %v85_v37, %v101_v38  ;;  %v8833_v63 = vcombine.high %v84_v12, %v100_v13  ;;  %v8837_v23 = vcombine.high %v85_v37, %v101_v38 }
  0x1f   :  { %527 = vmatpush1.bf16.msra.mxu0 %v8727_v40  ;;  %570 = vmatpush1.bf16.msra.mxu1 %v8733_v41  ;;  %11173 = vst [vmem:[#allocation9_spill] sm:$0xff] %v8800_v31  ;;  %11174 = vst [vmem:[#allocation10_spill] sm:$0xff] %v8810_v44  ;;  %v8813_v47 = vcombine.low %v52_v27, %v68_v30  ;;  %v69_v54 = vld [vmem:[#allocation2 + $0xd8] sm:$0xff]  ;;  %v54_v60 = vld [vmem:[#allocation2 + $0x60] sm:$0xff]  ;;  %v8830_v62 = vcombine.low %v86_v45, %v102_v46 }
  0x20   :  { %610 = vmatprep.subr.bf16.mxu0 %v8736_v42  ;;  %653 = vmatprep.subr.bf16.mxu1 %v8740_v43  ;;  %11176 = vst [vmem:[#allocation12_spill] sm:$0xff] %v8823_v55  ;;  %11177 = vst [vmem:[#allocation13_spill] sm:$0xff] %v8826_v59  ;;  %v70_v2 = vld [vmem:[#allocation2 + $0xe0] sm:$0xff]  ;;  %v87_v3 = vld [vmem:[#allocation2 + $0x168] sm:$0xff]  ;;  %v8847_v12 = vcombine.high %v52_v27, %v68_v30  ;;  %v8853_v13 = vcombine.high %v53_v53, %v69_v54 }
  0x21   :  { %11175 = vst [vmem:[#allocation11_spill] sm:$0xff] %v8813_v47  ;;  %11178 = vst [vmem:[#allocation14_spill] sm:$0xff] %v8830_v62  ;;  %v103_v22 = vld [vmem:[#allocation2 + $0x1e8] sm:$0xff] }
  0x22   :  { %8065 = vmatmul.mubr.msk.bf16.vlgmr.msra.gmra.mxu0 %vm422_vm0, %v8709_v28  ;;  %8066 = vmatmul.mubr.msk.bf16.vlgmr.msra.gmra.mxu1 %vm422_vm0, %v8709_v28  ;;  %v8856_v37 = vcombine.low %v87_v3, %v103_v22  ;;  %v55_v27 = vld [vmem:[#allocation2 + $0x68] sm:$0xff] }
  0x23   :  { %611 = vmatpush1.bf16.msra.mxu0 %v8743_v48  ;;  %654 = vmatpush1.bf16.msra.mxu1 %v8747_v49  ;;  %v71_v30 = vld [vmem:[#allocation2 + $0xe8] sm:$0xff] }
  0x24   :  { %612 = vmatprep.subr.bf16.mxu0 %v8750_v50  ;;  %655 = vmatprep.subr.bf16.mxu1 %v8753_v51  ;;  %11181 = vst [vmem:[#allocation17_spill] sm:$0xff] %v8856_v37 }
  0x25   :  { %630 = vmatprep.mubr.bf16.mxu0 %v11162_v0  ;;  %673 = vmatprep.mubr.bf16.mxu1 %v11162_v0 }
  0x27   :  { %613 = vmatpush1.bf16.msra.mxu0 %v8757_v56  ;;  %656 = vmatpush1.bf16.msra.mxu1 %v8763_v57 }
  0x28   :  { %696 = vmatprep.subr.bf16.mxu0 %v8766_v58  ;;  %739 = vmatprep.subr.bf16.mxu1 %v8770_v61 }
  0x2a   :  { %8067 = vmatmul.mubr.msk.bf16.vlgmr.msra.gmra.mxu0 %vm422_vm0, %v8709_v28  ;;  %8068 = vmatmul.mubr.msk.bf16.vlgmr.msra.gmra.mxu1 %vm422_vm0, %v8709_v28 }
  0x2b   :  { %697 = vmatpush1.bf16.msra.mxu0 %v8773_v1  ;;  %740 = vmatpush1.bf16.msra.mxu1 %v8777_v5 }
  0x2c   :  { %698 = vmatprep.subr.bf16.mxu0 %v8780_v11  ;;  %741 = vmatprep.subr.bf16.mxu1 %v8783_v15 }
  0x2d   :  { %716 = vmatprep.mubr.bf16.mxu0 %v11162_v0  ;;  %759 = vmatprep.mubr.bf16.mxu1 %v11162_v0 }
  0x2f   :  { %699 = vmatpush1.bf16.msra.mxu0 %v8787_v21  ;;  %742 = vmatpush1.bf16.msra.mxu1 %v8793_v25 }
  0x30   :  { %782 = vmatprep.subr.bf16.mxu0 %v8796_v26  ;;  %825 = vmatprep.subr.bf16.mxu1 %v8800_v31  ;;  %v104_v31 = vld [vmem:[#allocation2 + $0x1f0] sm:$0xff]  ;;  %v8843_v26 = vcombine.low %v54_v60, %v70_v2 }
  0x32   :  { %8069 = vmatmul.mubr.msk.bf16.vlgmr.msra.gmra.mxu0 %vm422_vm0, %v8709_v28  ;;  %8070 = vmatmul.mubr.msk.bf16.vlgmr.msra.gmra.mxu1 %vm422_vm0, %v8709_v28  ;;  %11180 = vst [vmem:[#allocation16_spill] sm:$0xff] %v8843_v26 }
  0x33   :  { %783 = vmatpush1.bf16.msra.mxu0 %v8803_v36  ;;  %826 = vmatpush1.bf16.msra.mxu1 %v8807_v39 }
  0x34   :  { %784 = vmatprep.subr.bf16.mxu0 %v8810_v44  ;;  %827 = vmatprep.subr.bf16.mxu1 %v8813_v47  ;;  %v8840_v44 = vcombine.low %v53_v53, %v69_v54  ;;  %v88_v47 = vld [vmem:[#allocation2 + $0x170] sm:$0xff]  ;;  %v8867_v53 = vcombine.high %v87_v3, %v103_v22  ;;  %v8870_v54 = vcombine.low %v55_v27, %v71_v30  ;;  %v8885_v3 = vld [vmem:[#allocation2 + $0xf8] sm:$0xff] }
  0x35   :  { %802 = vmatprep.mubr.bf16.mxu0 %v11162_v0  ;;  %845 = vmatprep.mubr.bf16.mxu1 %v11162_v0  ;;  %v8860_v38 = vcombine.low %v88_v47, %v104_v31  ;;  %v8887_v22 = vcombine.high %v54_v60, %v70_v2  ;;  %v11183_v60 = vmov 0   ;;  %v8905_v2 = vcombine.high %v88_v47, %v104_v31  ;;  %v11185_v47 = vld [vmem:[#allocation9_spill] sm:$0xff] }
  0x36   :  { %11179 = vst [vmem:[#allocation15_spill] sm:$0xff] %v8840_v44 }
  0x37   :  { %785 = vmatpush1.bf16.msra.mxu0 %v8817_v52  ;;  %828 = vmatpush1.bf16.msra.mxu1 %v8823_v55  ;;  %11182 = vst [vmem:[#allocation18_spill] sm:$0xff] %v8860_v38  ;;  %v8863_v55 = vcombine.high %v86_v45, %v102_v46  ;;  %v8883_v46 = vld [vmem:[#allocation2 + $0x78] sm:$0xff]  ;;  %v8895_v45 = vcombine.high %v55_v27, %v71_v30 }
  0x38   :  { %868 = vmatprep.subr.bf16.mxu0 %v8826_v59  ;;  %911 = vmatprep.subr.bf16.mxu1 %v8830_v62  ;;  %v56_v62 = vld [vmem:[#allocation2 + $0x70] sm:$0xff]  ;;  %v8080_v27 = vcombine.low %v8672_v6, %v8674_v7  ;;  %v8914_v30 = vcombine.low %v8883_v46, %v8885_v3  ;;  %v106_v6 = vld [vmem:[%s11138_s2] sm:$0xff]  ;;  %v8079_v7 = vcombine.low %v8687_v16, %v8689_v17  ;;  %v107_v16 = vld [vmem:[%s11138_s2 + $0x8] sm:$0xff] }
  0x39   :  { %v72_v59 = vld [vmem:[#allocation2 + $0xf0] sm:$0xff]  ;;  %2458 = vperm.xlu0 %8533, %v106_v6   ;;  %v11189_v6 = vld [vmem:[#allocation13_spill] sm:$0xff] }
  0x3a   :  { %8071 = vmatmul.mubr.msk.bf16.vlgmr.msra.gmra.mxu0 %vm422_vm0, %v8709_v28  ;;  %8072 = vmatmul.mubr.msk.bf16.vlgmr.msra.gmra.mxu1 %vm422_vm0, %v8709_v28  ;;  %v8919_v31 = vcombine.high %v56_v62, %v72_v59  ;;  %v8165_v17 = vld [vmem:[%s11140_s4 + $0x10] sm:$0xff] }
  0x3b   :  { %869 = vmatpush1.bf16.msra.mxu0 %v8833_v63  ;;  %912 = vmatpush1.bf16.msra.mxu1 %v8837_v23 }
  0x3c   :  { %870 = vmatprep.subr.bf16.mxu0 %v8840_v44  ;;  %913 = vmatprep.subr.bf16.mxu1 %v8843_v26  ;;  %v8872_v26 = vld [vmem:[#allocation2 + $0x178] sm:$0xff] }
  0x3d   :  { %888 = vmatprep.mubr.bf16.mxu0 %v11162_v0  ;;  %931 = vmatprep.mubr.bf16.mxu1 %v11162_v0  ;;  %v8874_v44 = vld [vmem:[#allocation2 + $0x1f8] sm:$0xff]  ;;  %v8877_v0 = vcombine.low %v56_v62, %v72_v59  ;;  %v11186_v59 = vld [vmem:[#allocation12_spill] sm:$0xff]  ;;  %v11187_v62 = vld [vmem:[#allocation10_spill] sm:$0xff] }
  0x3e   :  { %2463 = vperm.xlu0 %8533, %v107_v16   ;;  %v11191_v16 = vld [vmem:[#allocation15_spill] sm:$0xff] }
  0x3f   :  { %871 = vmatpush1.bf16.msra.mxu0 %v8847_v12  ;;  %914 = vmatpush1.bf16.msra.mxu1 %v8853_v13 }
  0x40   :  { %954 = vmatprep.subr.bf16.mxu0 %v8856_v37  ;;  %997 = vmatprep.subr.bf16.mxu1 %v8860_v38  ;;  %v8900_v37 = vcombine.low %v8872_v26, %v8874_v44 }
  0x42   :  { %8073 = vmatmul.mubr.msk.bf16.vlgmr.msra.gmra.mxu0 %vm422_vm0, %v8709_v28  ;;  %8074 = vmatmul.mubr.msk.bf16.vlgmr.msra.gmra.mxu1 %vm422_vm0, %v8709_v28 }
  0x43   :  { %955 = vmatpush1.bf16.msra.mxu0 %v8863_v55  ;;  %998 = vmatpush1.bf16.msra.mxu1 %v8867_v53 }
  0x44   :  { %956 = vmatprep.subr.bf16.mxu0 %v8870_v54  ;;  %999 = vmatprep.subr.bf16.mxu1 %v8877_v0 }
  0x45   :  { %974 = vmatprep.mubr.bf16.mxu0 %v11183_v60  ;;  %1017 = vmatprep.mubr.bf16.mxu1 %v11183_v60 }
  0x46   :  { %6430 = vperm.xlu0 %8533, %v8165_v17   ;;  %v11192_v17 = vld [vmem:[#allocation16_spill] sm:$0xff] }
  0x47   :  { %957 = vmatpush1.bf16.msra.mxu0 %v8887_v22  ;;  %1000 = vmatpush1.bf16.msra.mxu1 %v8895_v45 }
  0x48   :  { %1040 = vmatprep.subr.bf16.mxu0 %v8900_v37  ;;  %1099 = vmatprep.subr.bf16.mxu1 %v8682_v10  ;;  %v8937_v10 = vld [vmem:[%s11137_s1] sm:$0xff]  }
  0x4a   :  { %8075 = vmatmul.mubr.msk.bf16.vlgmr.msra.gmra.mxu0 %vm422_vm0, %v8709_v28  ;;  %8076 = vmatmul.mubr.msk.bf16.vlgmr.msra.gmra.mxu1 %vm422_vm0, %v8709_v28 }
  0x4b   :  { %1041 = vmatpush1.bf16.msra.mxu0 %v8905_v2  ;;  %1100 = vmatpush1.bf16.msra.mxu1 %v8080_v27  ;;  %v11188_v27 = vld [vmem:[#allocation11_spill] sm:$0xff] }
  0x4c   :  { %1042 = vmatprep.subr.bf16.mxu0 %v8914_v30  ;;  %1101 = vmatprep.subr.bf16.mxu1 %v8697_v19  ;;  %v7967_v19 = vld [vmem:[%s11142_s6] sm:$0xff] }
  0x4d   :  { %1060 = vmatprep.mubr.bf16.mxu0 %v11183_v60  ;;  %1119 = vmatprep.mubr.bf16.mxu1 %v11183_v60 }
  0x4e   :  { %7971 = vperm.xlu0 %8533, %v7967_v19   ;;  %v11193_v19 = vld [vmem:[#allocation17_spill] sm:$0xff] }
  0x4f   :  { %1043 = vmatpush1.bf16.msra.mxu0 %v8919_v31  ;;  %1102 = vmatpush1.bf16.msra.mxu1 %v8079_v7  ;;  %v11190_v7 = vld [vmem:[#allocation14_spill] sm:$0xff] }
  0x50   :  { %1142 = vmatprep.subr.bf16.mxu0 %v8676_v8  ;;  %1185 = vmatprep.subr.bf16.mxu1 %v8713_v32 }
  0x52   :  { %8077 = vmatmul.mubr.msk.bf16.vlgmr.msra.gmra.mxu0 %vm422_vm0, %v8709_v28  ;;  %8081 = vmatmul.mubr.msk.bf16.vlgmr.msra.gmra.mxu1 %vm422_vm0, %v8937_v10  ;;  %v11184_v28 = vld [vmem:[#allocation8_spill] sm:$0xff] }
  0x53   :  { %1143 = vmatpush1.bf16.msra.mxu0 %v8670_v4  ;;  %1186 = vmatpush1.bf16.msra.mxu1 %v8678_v9 }
  0x54   :  { %1144 = vmatprep.subr.bf16.mxu0 %v8701_v20  ;;  %1187 = vmatprep.subr.bf16.mxu1 %v8727_v40 }
  0x55   :  { %1162 = vmatprep.mubr.bf16.mxu0 %v11183_v60  ;;  %1205 = vmatprep.mubr.bf16.mxu1 %v11183_v60 }
  0x57   :  { %1145 = vmatpush1.bf16.msra.mxu0 %v8685_v14  ;;  %1188 = vmatpush1.bf16.msra.mxu1 %v8693_v18 }
  0x58   :  { %1228 = vmatprep.subr.bf16.mxu0 %v8717_v33  ;;  %1271 = vmatprep.subr.bf16.mxu1 %v8743_v48 }
  0x5a   :  { %8082 = vmatmul.mubr.msk.bf16.vlgmr.msra.gmra.mxu0 %vm422_vm0, %v8937_v10  ;;  %8083 = vmatmul.mubr.msk.bf16.vlgmr.msra.gmra.mxu1 %vm422_vm0, %v8937_v10 }
  0x5b   :  { %1229 = vmatpush1.bf16.msra.mxu0 %v8704_v24  ;;  %1272 = vmatpush1.bf16.msra.mxu1 %v8711_v29 }
  0x5c   :  { %1230 = vmatprep.subr.bf16.mxu0 %v8733_v41  ;;  %1273 = vmatprep.subr.bf16.mxu1 %v8757_v56 }
  0x5d   :  { %1248 = vmatprep.mubr.bf16.mxu0 %v11183_v60  ;;  %1291 = vmatprep.mubr.bf16.mxu1 %v11183_v60 }
  0x5f   :  { %1231 = vmatpush1.bf16.msra.mxu0 %v8720_v34  ;;  %1274 = vmatpush1.bf16.msra.mxu1 %v8723_v35 }
  0x60   :  { %1314 = vmatprep.subr.bf16.mxu0 %v8747_v49  ;;  %1357 = vmatprep.subr.bf16.mxu1 %v8773_v1 }
  0x62   :  { %8084 = vmatmul.mubr.msk.bf16.vlgmr.msra.gmra.mxu0 %vm422_vm0, %v8937_v10  ;;  %8085 = vmatmul.mubr.msk.bf16.vlgmr.msra.gmra.mxu1 %vm422_vm0, %v8937_v10 }
  0x63   :  { %1315 = vmatpush1.bf16.msra.mxu0 %v8736_v42  ;;  %1358 = vmatpush1.bf16.msra.mxu1 %v8740_v43 }
  0x64   :  { %1316 = vmatprep.subr.bf16.mxu0 %v8763_v57  ;;  %1359 = vmatprep.subr.bf16.mxu1 %v8787_v21 }
  0x65   :  { %1334 = vmatprep.mubr.bf16.mxu0 %v11183_v60  ;;  %1377 = vmatprep.mubr.bf16.mxu1 %v11183_v60 }
  0x67   :  { %1317 = vmatpush1.bf16.msra.mxu0 %v8750_v50  ;;  %1360 = vmatpush1.bf16.msra.mxu1 %v8753_v51 }
  0x68   :  { %1400 = vmatprep.subr.bf16.mxu0 %v8777_v5  ;;  %1443 = vmatprep.subr.bf16.mxu1 %v8803_v36 }
  0x6a   :  { %8086 = vmatmul.mubr.msk.bf16.vlgmr.msra.gmra.mxu0 %vm422_vm0, %v8937_v10  ;;  %8087 = vmatmul.mubr.msk.bf16.vlgmr.msra.gmra.mxu1 %vm422_vm0, %v8937_v10 }
  0x6b   :  { %1401 = vmatpush1.bf16.msra.mxu0 %v8766_v58  ;;  %1444 = vmatpush1.bf16.msra.mxu1 %v8770_v61 }
  0x6c   :  { %1402 = vmatprep.subr.bf16.mxu0 %v8793_v25  ;;  %1445 = vmatprep.subr.bf16.mxu1 %v8817_v52 }
  0x6d   :  { %1420 = vmatprep.mubr.bf16.mxu0 %v11183_v60  ;;  %1463 = vmatprep.mubr.bf16.mxu1 %v11183_v60 }
  0x6f   :  { %1403 = vmatpush1.bf16.msra.mxu0 %v8780_v11  ;;  %1446 = vmatpush1.bf16.msra.mxu1 %v8783_v15 }
  0x70   :  { %1486 = vmatprep.subr.bf16.mxu0 %v8807_v39  ;;  %1529 = vmatprep.subr.bf16.mxu1 %v8833_v63 }
  0x72   :  { %8088 = vmatmul.mubr.msk.bf16.vlgmr.msra.gmra.mxu0 %vm422_vm0, %v8937_v10  ;;  %8089 = vmatmul.mubr.msk.bf16.vlgmr.msra.gmra.mxu1 %vm422_vm0, %v8937_v10 }
  0x73   :  { %1487 = vmatpush1.bf16.msra.mxu0 %v11184_v28  ;;  %1530 = vmatpush1.bf16.msra.mxu1 %v11185_v47 }
  0x74   :  { %1488 = vmatprep.subr.bf16.mxu0 %v11186_v59  ;;  %1531 = vmatprep.subr.bf16.mxu1 %v8847_v12 }
  0x75   :  { %1506 = vmatprep.mubr.bf16.mxu0 %v11183_v60  ;;  %1549 = vmatprep.mubr.bf16.mxu1 %v11183_v60 }
  0x77   :  { %1489 = vmatpush1.bf16.msra.mxu0 %v11187_v62  ;;  %1532 = vmatpush1.bf16.msra.mxu1 %v11188_v27 }
  0x78   :  { %1572 = vmatprep.subr.bf16.mxu0 %v8837_v23  ;;  %1615 = vmatprep.subr.bf16.mxu1 %v8863_v55 }
  0x7a   :  { %8090 = vmatmul.mubr.msk.bf16.vlgmr.msra.gmra.mxu0 %vm422_vm0, %v8937_v10  ;;  %8091 = vmatmul.mubr.msk.bf16.vlgmr.msra.gmra.mxu1 %vm422_vm0, %v8937_v10 }
  0x7b   :  { %1573 = vmatpush1.bf16.msra.mxu0 %v11189_v6  ;;  %1616 = vmatpush1.bf16.msra.mxu1 %v11190_v7 }
  0x7c   :  { %1574 = vmatprep.subr.bf16.mxu0 %v8853_v13  ;;  %1617 = vmatprep.subr.bf16.mxu1 %v8887_v22 }
  0x7d   :  { %1592 = vmatprep.mubr.bf16.mxu0 %v11183_v60  ;;  %1635 = vmatprep.mubr.bf16.mxu1 %v11183_v60 }
  0x7f   :  { %1575 = vmatpush1.bf16.msra.mxu0 %v11191_v16  ;;  %1618 = vmatpush1.bf16.msra.mxu1 %v11192_v17 }
  0x80   :  { %1658 = vmatprep.subr.bf16.mxu0 %v8867_v53  ;;  %1701 = vmatprep.subr.bf16.mxu1 %v8905_v2 }
  0x82   :  { %8092 = vmatmul.mubr.msk.bf16.vlgmr.msra.gmra.mxu0 %vm422_vm0, %v8937_v10  ;;  %8093 = vmatmul.mubr.msk.bf16.vlgmr.msra.gmra.mxu1 %vm422_vm0, %v8937_v10 }
  0x83   :  { %1659 = vmatpush1.bf16.msra.mxu0 %v11193_v19  ;;  %1702 = vmatpush1.bf16.msra.mxu1 %v8860_v38 }
  0x84   :  { %1660 = vmatprep.subr.bf16.mxu0 %v8895_v45  ;;  %1703 = vmatprep.subr.bf16.mxu1 %v8919_v31 }
  0x85   :  { %1678 = vmatprep.mubr.bf16.mxu0 %v11183_v60  ;;  %1721 = vmatprep.mubr.bf16.mxu1 %v11183_v60 }
  0x87   :  { %1661 = vmatpush1.bf16.msra.mxu0 %v8870_v54  ;;  %1704 = vmatpush1.bf16.msra.mxu1 %v8877_v0 }
  0x88   :  { %1763 = vmatprep.subr.bf16.mxu0 %v8676_v8  ;;  %1806 = vmatprep.subr.bf16.mxu1 %v8713_v32  ;;  %v9061_v8 = vld [vmem:[%s11137_s1 + $0x10] sm:$0xff]  }
  0x8a   :  { %8094 = vmatmul.mubr.msk.bf16.vlgmr.msra.gmra.mxu0 %vm422_vm0, %v8937_v10  ;;  %8095 = vmatmul.mubr.msk.bf16.vlgmr.msra.gmra.mxu1 %vm422_vm0, %v8937_v10 }
  0x8b   :  { %1764 = vmatpush1.bf16.msra.mxu0 %v8670_v4  ;;  %1807 = vmatpush1.bf16.msra.mxu1 %v8678_v9  ;;  %v11194_v4 = vcombine.high %v8872_v26, %v8874_v44  ;;  %v11195_v9 = vcombine.high %v8883_v46, %v8885_v3 }
  0x8c   :  { %1765 = vmatprep.subr.bf16.mxu0 %v8701_v20  ;;  %1808 = vmatprep.subr.bf16.mxu1 %v8727_v40 }
  0x8d   :  { %1783 = vmatprep.mubr.bf16.mxu0 %v11183_v60  ;;  %1826 = vmatprep.mubr.bf16.mxu1 %v11183_v60 }
  0x8f   :  { %1766 = vmatpush1.bf16.msra.mxu0 %v8685_v14  ;;  %1809 = vmatpush1.bf16.msra.mxu1 %v8693_v18 }
  0x90   :  { %1849 = vmatprep.subr.bf16.mxu0 %v8717_v33  ;;  %1892 = vmatprep.subr.bf16.mxu1 %v8743_v48 }
  0x92   :  { %8101 = vmatmul.mubr.msk.bf16.vlgmr.msra.gmra.mxu0 %vm422_vm0, %v9061_v8  ;;  %8102 = vmatmul.mubr.msk.bf16.vlgmr.msra.gmra.mxu1 %vm422_vm0, %v9061_v8 }
  0x93   :  { %1850 = vmatpush1.bf16.msra.mxu0 %v8704_v24  ;;  %1893 = vmatpush1.bf16.msra.mxu1 %v8711_v29 }
  0x94   :  { %1851 = vmatprep.subr.bf16.mxu0 %v8733_v41  ;;  %1894 = vmatprep.subr.bf16.mxu1 %v8757_v56 }
  0x95   :  { %1869 = vmatprep.mubr.bf16.mxu0 %v11183_v60  ;;  %1912 = vmatprep.mubr.bf16.mxu1 %v11183_v60 }
  0x97   :  { %1852 = vmatpush1.bf16.msra.mxu0 %v8720_v34  ;;  %1895 = vmatpush1.bf16.msra.mxu1 %v8723_v35 }
  0x98   :  { %1935 = vmatprep.subr.bf16.mxu0 %v8747_v49  ;;  %1978 = vmatprep.subr.bf16.mxu1 %v8773_v1 }
  0x9a   :  { %8103 = vmatmul.mubr.msk.bf16.vlgmr.msra.gmra.mxu0 %vm422_vm0, %v9061_v8  ;;  %8104 = vmatmul.mubr.msk.bf16.vlgmr.msra.gmra.mxu1 %vm422_vm0, %v9061_v8 }
  0x9b   :  { %1936 = vmatpush1.bf16.msra.mxu0 %v8736_v42  ;;  %1979 = vmatpush1.bf16.msra.mxu1 %v8740_v43 }
  0x9c   :  { %1937 = vmatprep.subr.bf16.mxu0 %v8763_v57  ;;  %1980 = vmatprep.subr.bf16.mxu1 %v8787_v21 }
  0x9d   :  { %1955 = vmatprep.mubr.bf16.mxu0 %v11183_v60  ;;  %1998 = vmatprep.mubr.bf16.mxu1 %v11183_v60 }
  0x9f   :  { %1938 = vmatpush1.bf16.msra.mxu0 %v8750_v50  ;;  %1981 = vmatpush1.bf16.msra.mxu1 %v8753_v51 }
  0xa0   :  { %2021 = vmatprep.subr.bf16.mxu0 %v8777_v5  ;;  %2064 = vmatprep.subr.bf16.mxu1 %v8803_v36 }
  0xa2   :  { %8105 = vmatmul.mubr.msk.bf16.vlgmr.msra.gmra.mxu0 %vm422_vm0, %v9061_v8  ;;  %8106 = vmatmul.mubr.msk.bf16.vlgmr.msra.gmra.mxu1 %vm422_vm0, %v9061_v8 }
  0xa3   :  { %2022 = vmatpush1.bf16.msra.mxu0 %v8766_v58  ;;  %2065 = vmatpush1.bf16.msra.mxu1 %v8770_v61 }
  0xa4   :  { %2023 = vmatprep.subr.bf16.mxu0 %v8793_v25  ;;  %2066 = vmatprep.subr.bf16.mxu1 %v8817_v52 }
  0xa5   :  { %2041 = vmatprep.mubr.bf16.mxu0 %v11183_v60  ;;  %2084 = vmatprep.mubr.bf16.mxu1 %v11183_v60 }
  0xa7   :  { %2024 = vmatpush1.bf16.msra.mxu0 %v8780_v11  ;;  %2067 = vmatpush1.bf16.msra.mxu1 %v8783_v15 }
  0xa8   :  { %2107 = vmatprep.subr.bf16.mxu0 %v8807_v39  ;;  %2150 = vmatprep.subr.bf16.mxu1 %v8833_v63 }
  0xaa   :  { %8107 = vmatmul.mubr.msk.bf16.vlgmr.msra.gmra.mxu0 %vm422_vm0, %v9061_v8  ;;  %8108 = vmatmul.mubr.msk.bf16.vlgmr.msra.gmra.mxu1 %vm422_vm0, %v9061_v8 }
  0xab   :  { %2108 = vmatpush1.bf16.msra.mxu0 %v11184_v28  ;;  %2151 = vmatpush1.bf16.msra.mxu1 %v11185_v47 }
  0xac   :  { %2109 = vmatprep.subr.bf16.mxu0 %v11186_v59  ;;  %2152 = vmatprep.subr.bf16.mxu1 %v8847_v12 }
  0xad   :  { %2127 = vmatprep.mubr.bf16.mxu0 %v11183_v60  ;;  %2170 = vmatprep.mubr.bf16.mxu1 %v11183_v60 }
  0xaf   :  { %2110 = vmatpush1.bf16.msra.mxu0 %v11187_v62  ;;  %2153 = vmatpush1.bf16.msra.mxu1 %v11188_v27 }
  0xb0   :  { %2193 = vmatprep.subr.bf16.mxu0 %v8837_v23  ;;  %2236 = vmatprep.subr.bf16.mxu1 %v8863_v55 }
  0xb2   :  { %8109 = vmatmul.mubr.msk.bf16.vlgmr.msra.gmra.mxu0 %vm422_vm0, %v9061_v8  ;;  %8110 = vmatmul.mubr.msk.bf16.vlgmr.msra.gmra.mxu1 %vm422_vm0, %v9061_v8 }
  0xb3   :  { %2194 = vmatpush1.bf16.msra.mxu0 %v11189_v6  ;;  %2237 = vmatpush1.bf16.msra.mxu1 %v11190_v7 }
  0xb4   :  { %2195 = vmatprep.subr.bf16.mxu0 %v8853_v13  ;;  %2238 = vmatprep.subr.bf16.mxu1 %v8887_v22 }
  0xb5   :  { %2213 = vmatprep.mubr.bf16.mxu0 %v11183_v60  ;;  %2256 = vmatprep.mubr.bf16.mxu1 %v11183_v60 }
  0xb7   :  { %2196 = vmatpush1.bf16.msra.mxu0 %v11191_v16  ;;  %2239 = vmatpush1.bf16.msra.mxu1 %v11192_v17 }
  0xb8   :  { %2279 = vmatprep.subr.bf16.mxu0 %v8867_v53  ;;  %2322 = vmatprep.subr.bf16.mxu1 %v8905_v2 }
  0xba   :  { %8111 = vmatmul.mubr.msk.bf16.vlgmr.msra.gmra.mxu0 %vm422_vm0, %v9061_v8  ;;  %8112 = vmatmul.mubr.msk.bf16.vlgmr.msra.gmra.mxu1 %vm422_vm0, %v9061_v8 }
  0xbb   :  { %2280 = vmatpush1.bf16.msra.mxu0 %v11193_v19  ;;  %2323 = vmatpush1.bf16.msra.mxu1 %v8860_v38 }
  0xbc   :  { %2281 = vmatprep.subr.bf16.mxu0 %v8895_v45  ;;  %2324 = vmatprep.subr.bf16.mxu1 %v8919_v31 }
  0xbd   :  { %2299 = vmatprep.mubr.bf16.mxu0 %v11183_v60  ;;  %2342 = vmatprep.mubr.bf16.mxu1 %v11183_v60 }
  0xbf   :  { %2282 = vmatpush1.bf16.msra.mxu0 %v8870_v54  ;;  %2325 = vmatpush1.bf16.msra.mxu1 %v8877_v0 }
  0xc0   :  { %2365 = vmatprep.subr.bf16.mxu0 %v11194_v4 }
  0xc2   :  { %8113 = vmatmul.mubr.msk.bf16.vlgmr.msra.gmra.mxu0 %vm422_vm0, %v9061_v8  ;;  %8114 = vmatmul.mubr.msk.bf16.vlgmr.msra.gmra.mxu1 %vm422_vm0, %v9061_v8 }
  0xc3   :  { %2366 = vmatpush1.bf16.msra.mxu0 %v8900_v37  ;;  %2385 = vmatprep.mubr.bf16.mxu0 %v11183_v60 }
  0xc4   :  { %2367 = vmatprep.subr.bf16.mxu0 %v11195_v9  ;;  %2664 = vmatprep.mubr.bf16.mxu1 %v11183_v60 }
  0xc7   :  { %2368 = vmatpush1.bf16.msra.mxu0 %v8914_v30 }
  0xca   :  { %8115 = vmatmul.mubr.msk.bf16.vlgmr.msra.gmra.mxu0 %vm422_vm0, %v9061_v8 }
  0xcb   :  { %2707 = vmatprep.mubr.bf16.mxu0 %v11183_v60 }
  0xda   :  { %v460_v0 = vpop.f32.mrf.mxu0  ;;  %v9166_v14 = vpop.f32.mrf.mxu1 }
  0xdc   :  { %v462_v18 = vpop.f32.mrf.mxu0  ;;  %v9168_v20 = vpop.f32.mrf.mxu1 }
  0xde   :  { %v464_v24 = vpop.f32.mrf.mxu0  ;;  %v9170_v29 = vpop.f32.mrf.mxu1 }
  0xe0   :  { %v9172_v32 = vpop.f32.mrf.mxu0  ;;  %v9174_v33 = vpop.f32.mrf.mxu1 }
  0xe2   :  { %v546_v34 = vpop.f32.mrf.mxu0  ;;  %v9176_v35 = vpop.f32.mrf.mxu1 }
  0xe4   :  { %v9178_v40 = vpop.f32.mrf.mxu0  ;;  %v9180_v41 = vpop.f32.mrf.mxu1 }
  0xe6   :  { %v9182_v42 = vpop.f32.mrf.mxu0  ;;  %v9184_v43 = vpop.f32.mrf.mxu1 }
  0xe8   :  { %v9186_v48 = vpop.f32.mrf.mxu0  ;;  %v9188_v49 = vpop.f32.mrf.mxu1 }
  0xea   :  { %v9190_v50 = vpop.f32.mrf.mxu0  ;;  %v9192_v51 = vpop.f32.mrf.mxu1 }
  0xec   :  { %v9194_v56 = vpop.f32.mrf.mxu0  ;;  %v9196_v57 = vpop.f32.mrf.mxu1 }
  0xee   :  { %v9198_v58 = vpop.f32.mrf.mxu0  ;;  %v9200_v61 = vpop.f32.mrf.mxu1 }
  0xf0   :  { %v9202_v1 = vpop.f32.mrf.mxu0  ;;  %v9204_v5 = vpop.f32.mrf.mxu1 }
  0xf2   :  { %v9206_v11 = vpop.f32.mrf.mxu0  ;;  %v9208_v15 = vpop.f32.mrf.mxu1 }
  0xf4   :  { %v9210_v21 = vpop.f32.mrf.mxu0  ;;  %v9212_v25 = vpop.f32.mrf.mxu1 }
  0xf6   :  { %v9214_v26 = vpop.f32.mrf.mxu0  ;;  %v9216_v36 = vpop.f32.mrf.mxu1 }
  0xf8   :  { %v9218_v39 = vpop.f32.mrf.mxu0  ;;  %v9220_v44 = vpop.f32.mrf.mxu1 }
  0xf9   :  { %11196 = vst [vmem:[#allocation8_spill] sm:$0xff] %v9220_v44 }
  0xfa   :  { %v9222_v52 = vpop.f32.mrf.mxu0  ;;  %v9224_v55 = vpop.f32.mrf.mxu1 }
  0xfb   :  { %11197 = vst [vmem:[#allocation9_spill] sm:$0xff] %v9224_v55 }
  0xfc   :  { %v9226_v63 = vpop.f32.mrf.mxu0  ;;  %v9228_v23 = vpop.f32.mrf.mxu1 }
  0xfe   :  { %v9230_v12 = vpop.f32.mrf.mxu0  ;;  %v9232_v13 = vpop.f32.mrf.mxu1 }
  0xff   :  { %11198 = vst [vmem:[#allocation12_spill] sm:$0xff] %v9230_v12  ;;  %11199 = vst [vmem:[#allocation10_spill] sm:$0xff] %v9232_v13 }
 0x100   :  { %v9234_v37 = vpop.f32.mrf.mxu0  ;;  %v9236_v38 = vpop.f32.mrf.mxu1 }
 0x101   :  { %11200 = vst [vmem:[#allocation11_spill] sm:$0xff] %v9234_v37  ;;  %11201 = vst [vmem:[#allocation13_spill] sm:$0xff] %v9236_v38 }
 0x102   :  { %v9238_v53 = vpop.f32.mrf.mxu0  ;;  %v9240_v54 = vpop.f32.mrf.mxu1 }
 0x103   :  { %11202 = vst [vmem:[#allocation14_spill] sm:$0xff] %v9240_v54 }
 0x104   :  { %v9242_v45 = vpop.f32.mrf.mxu0  ;;  %v9244_v46 = vpop.f32.mrf.mxu1 }
 0x106   :  { %v9246_v3 = vpop.f32.mrf.mxu0  ;;  %v9248_v22 = vpop.f32.mrf.mxu1 }
 0x107   :  { %11203 = vst [vmem:[#allocation15_spill] sm:$0xff] %v9246_v3  ;;  %11204 = vst [vmem:[#allocation16_spill] sm:$0xff] %v9248_v22 }
 0x108   :  { %v9250_v2 = vpop.f32.mrf.mxu0  ;;  %v9252_v30 = vpop.f32.mrf.mxu1 }
 0x109   :  { %11205 = vst [vmem:[#allocation17_spill] sm:$0xff] %v9250_v2  ;;  %11206 = vst [vmem:[#allocation18_spill] sm:$0xff] %v9252_v30 }
 0x10a   :  { %v9254_v31 = vpop.f32.mrf.mxu0  ;;  %v9256_v10 = vpop.f32.mrf.mxu1 }
 0x10b   :  { %11207 = vst [vmem:[#allocation19_spill] sm:$0xff] %v9256_v10 }
 0x10c   :  { %v9258_v28 = vpop.f32.mrf.mxu0  ;;  %v9260_v47 = vpop.f32.mrf.mxu1 }
 0x10e   :  { %v9262_v59 = vpop.f32.mrf.mxu0  ;;  %v9264_v62 = vpop.f32.mrf.mxu1 }
 0x10f   :  { %11208 = vst [vmem:[#allocation20_spill] sm:$0xff] %v9262_v59  ;;  %11209 = vst [vmem:[#allocation21_spill] sm:$0xff] %v9264_v62 }
 0x110   :  { %v9266_v27 = vpop.f32.mrf.mxu0  ;;  %v9268_v6 = vpop.f32.mrf.mxu1 }
 0x111   :  { %11210 = vst [vmem:[#allocation22_spill] sm:$0xff] %v9266_v27  ;;  %11211 = vst [vmem:[#allocation23_spill] sm:$0xff] %v9268_v6 }
 0x112   :  { %v9270_v7 = vpop.f32.mrf.mxu0  ;;  %v1121_v16 = vpop.f32.mrf.mxu1 }
 0x113   :  { %v9272_v17 = vadd.f32 %v1121_v16, %v460_v0 }
 0x114   :  { %v9274_v19 = vpop.f32.mrf.mxu0  ;;  %v1123_v8 = vpop.f32.mrf.mxu1 }
 0x115   :  { %v9276_v4 = vadd.f32 %v1123_v8, %v462_v18 }
 0x116   :  { %v9278_v9 = vpop.f32.mrf.mxu0  ;;  %v1125_v10 = vpop.f32.mrf.mxu1 }
 0x117   :  { %11212 = vst [vmem:[#allocation24_spill] sm:$0xff] %v9278_v9  ;;  %v9280_v30 = vadd.f32 %v1125_v10, %v464_v24 }
 0x118   :  { %v9282_v62 = vpop.f32.mrf.mxu0  ;;  %v9284_v27 = vpop.f32.mrf.mxu1 }
 0x119   :  { %11213 = vst [vmem:[#allocation25_spill] sm:$0xff] %v9282_v62 }
 0x11a   :  { %v9286_v6 = vpop.f32.mrf.mxu0  ;;  %v1207_v59 = vpop.f32.mrf.mxu1 }
 0x11b   :  { %v9288_v22 = vadd.f32 %v1207_v59, %v546_v34 }
 0x11c   :  { %v1166_v0 = vpop.f32.mrf.mxu0  ;;  %v1209_v18 = vpop.f32.mrf.mxu1 }
 0x11d   :  { %v9291_v16 = vadd.f32 %v1166_v0, %v9168_v20  ;;  %v9294_v8 = vadd.f32 %v1209_v18, %v9178_v40 }
 0x11e   :  { %v9296_v9 = vpop.f32.mrf.mxu0  ;;  %v9298_v24 = vpop.f32.mrf.mxu1 }
 0x120   :  { %v9300_v10 = vpop.f32.mrf.mxu0  ;;  %v9302_v62 = vpop.f32.mrf.mxu1 }
 0x122   :  { %v9304_v54 = vpop.f32.mrf.mxu0  ;;  %v1293_v34 = vpop.f32.mrf.mxu1 }
 0x123   :  { %v9307_v59 = vadd.f32 %v1293_v34, %v9190_v50 }
 0x124   :  { %v1252_v20 = vpop.f32.mrf.mxu0  ;;  %v1295_v40 = vpop.f32.mrf.mxu1 }
 0x125   :  { %11214 = vst [vmem:[#allocation26_spill] sm:$0xff] %v9307_v59  ;;  %v9310_v0 = vadd.f32 %v1252_v20, %v9180_v41  ;;  %v9313_v18 = vadd.f32 %v1295_v40, %v9194_v56 }
 0x126   :  { %v9315_v2 = vpop.f32.mrf.mxu0  ;;  %v9317_v38 = vpop.f32.mrf.mxu1 }
 0x127   :  { %11215 = vst [vmem:[#allocation27_spill] sm:$0xff] %v9310_v0  ;;  %11216 = vst [vmem:[#allocation28_spill] sm:$0xff] %v9313_v18 }
 0x128   :  { %v9319_v3 = vpop.f32.mrf.mxu0  ;;  %v9321_v13 = vpop.f32.mrf.mxu1 }
 0x12a   :  { %v9323_v55 = vpop.f32.mrf.mxu0  ;;  %v1379_v50 = vpop.f32.mrf.mxu1 }
 0x12b   :  { %v9326_v34 = vadd.f32 %v1379_v50, %v9206_v11 }
 0x12c   :  { %v1338_v41 = vpop.f32.mrf.mxu0  ;;  %v1381_v56 = vpop.f32.mrf.mxu1 }
 0x12d   :  { %11217 = vst [vmem:[#allocation29_spill] sm:$0xff] %v9326_v34  ;;  %v9329_v20 = vadd.f32 %v1338_v41, %v9196_v57  ;;  %v9332_v40 = vadd.f32 %v1381_v56, %v9210_v21 }
 0x12e   :  { %v9334_v37 = vpop.f32.mrf.mxu0  ;;  %v9336_v60 = vpop.f32.mrf.mxu1 }
 0x12f   :  { %11218 = vst [vmem:[#allocation30_spill] sm:$0xff] %v9329_v20  ;;  %11219 = vst [vmem:[#allocation31_spill] sm:$0xff] %v9332_v40 }
 0x130   :  { %v9338_v18 = vpop.f32.mrf.mxu0  ;;  %v9340_v0 = vpop.f32.mrf.mxu1 }
 0x132   :  { %v9342_v59 = vpop.f32.mrf.mxu0  ;;  %v1465_v11 = vpop.f32.mrf.mxu1 }
 0x133   :  { %v9345_v50 = vadd.f32 %v1465_v11, %v9222_v52 }
 0x134   :  { %v1424_v57 = vpop.f32.mrf.mxu0  ;;  %v1467_v21 = vpop.f32.mrf.mxu1 }
 0x135   :  { %11220 = vst [vmem:[#allocation32_spill] sm:$0xff] %v9345_v50  ;;  %v9348_v41 = vadd.f32 %v1424_v57, %v9212_v25  ;;  %v9351_v56 = vadd.f32 %v1467_v21, %v9226_v63 }
 0x136   :  { %v9353_v40 = vpop.f32.mrf.mxu0  ;;  %v9355_v34 = vpop.f32.mrf.mxu1 }
 0x137   :  { %11221 = vst [vmem:[#allocation33_spill] sm:$0xff] %v9348_v41  ;;  %11222 = vst [vmem:[#allocation34_spill] sm:$0xff] %v9351_v56 }
 0x138   :  { %v9357_v20 = vpop.f32.mrf.mxu0  ;;  %v9359_v44 = vpop.f32.mrf.mxu1 }
 0x139   :  { %11223 = vst [vmem:[#allocation35_spill] sm:$0xff] %v9359_v44 }
 0x13a   :  { %v9361_v12 = vpop.f32.mrf.mxu0  ;;  %v1551_v52 = vpop.f32.mrf.mxu1 }
 0x13b   :  { %11224 = vst [vmem:[#allocation36_spill] sm:$0xff] %v9361_v12  ;;  %v9364_v11 = vadd.f32 %v1551_v52, %v9238_v53 }
 0x13c   :  { %v1510_v25 = vpop.f32.mrf.mxu0  ;;  %v1553_v63 = vpop.f32.mrf.mxu1 }
 0x13d   :  { %11225 = vst [vmem:[#allocation37_spill] sm:$0xff] %v9364_v11  ;;  %v9367_v57 = vadd.f32 %v1510_v25, %v9228_v23  ;;  %v9370_v21 = vadd.f32 %v1553_v63, %v9242_v45 }
 0x13e   :  { %v9372_v56 = vpop.f32.mrf.mxu0  ;;  %v9374_v41 = vpop.f32.mrf.mxu1 }
 0x13f   :  { %11226 = vst [vmem:[#allocation38_spill] sm:$0xff] %v9367_v57  ;;  %11227 = vst [vmem:[#allocation39_spill] sm:$0xff] %v9370_v21 }
 0x140   :  { %v9376_v50 = vpop.f32.mrf.mxu0  ;;  %v9378_v44 = vpop.f32.mrf.mxu1 }
 0x141   :  { %11228 = vst [vmem:[#allocation40_spill] sm:$0xff] %v9378_v44 }
 0x142   :  { %v9380_v12 = vpop.f32.mrf.mxu0  ;;  %v1637_v53 = vpop.f32.mrf.mxu1 }
 0x143   :  { %11229 = vst [vmem:[#allocation41_spill] sm:$0xff] %v9380_v12  ;;  %v9383_v52 = vadd.f32 %v1637_v53, %v9254_v31 }
 0x144   :  { %v1596_v23 = vpop.f32.mrf.mxu0  ;;  %v1639_v45 = vpop.f32.mrf.mxu1 }
 0x145   :  { %11230 = vst [vmem:[#allocation42_spill] sm:$0xff] %v9383_v52  ;;  %v9386_v25 = vadd.f32 %v1596_v23, %v9244_v46  ;;  %v9389_v63 = vadd.f32 %v1639_v45, %v9258_v28 }
 0x146   :  { %v9391_v21 = vpop.f32.mrf.mxu0  ;;  %v9393_v11 = vpop.f32.mrf.mxu1 }
 0x147   :  { %11231 = vst [vmem:[#allocation43_spill] sm:$0xff] %v9386_v25  ;;  %11232 = vst [vmem:[#allocation44_spill] sm:$0xff] %v9389_v63 }
 0x148   :  { %v9395_v57 = vpop.f32.mrf.mxu0  ;;  %v9397_v44 = vpop.f32.mrf.mxu1 }
 0x149   :  { %11233 = vst [vmem:[#allocation45_spill] sm:$0xff] %v9397_v44 }
 0x14a   :  { %v9399_v12 = vpop.f32.mrf.mxu0  ;;  %v1723_v31 = vpop.f32.mrf.mxu1 }
 0x14b   :  { %v9402_v53 = vadd.f32 %v1723_v31, %v9270_v7  ;;  %v1165_v7 = vadd.f32 %v9286_v6, %v9166_v14  ;;  %v9420_v31 = vpop.permute.xlu0 %2458  ;;  %v1171_v6 = vadd.f32 %v9300_v10, %v9174_v33 }
 0x14c   :  { %v1682_v46 = vpop.f32.mrf.mxu0  ;;  %v1725_v28 = vpop.f32.mrf.mxu1 }
 0x14d   :  { %11234 = vst [vmem:[#allocation46_spill] sm:$0xff] %v9402_v53  ;;  %v9405_v23 = vadd.f32 %v1682_v46, %v9260_v47  ;;  %v9408_v45 = vadd.f32 %v1725_v28, %v9274_v19  ;;  %v1128_v28 = vadd.f32 %v9284_v27, %v9172_v32  ;;  %v1255_v32 = vadd.f32 %v9315_v2, %v9184_v43 }
 0x14e   :  { %v9410_v63 = vpop.f32.mrf.mxu0  ;;  %v9412_v25 = vpop.f32.mrf.mxu1 }
 0x14f   :  { %11235 = vst [vmem:[#allocation47_spill] sm:$0xff] %v9405_v23  ;;  %11236 = vst [vmem:[#allocation48_spill] sm:$0xff] %v9408_v45  ;;  %v1169_v45 = vadd.f32 %v9296_v9, %v9170_v29  ;;  %v9440_v29 = vadd.f32 %v9317_v38, %v9198_v58  ;;  %v9455_v58 = vpop.permute.xlu0 %2463 }
 0x150   :  { %11237 = vst [vmem:[#allocation49_spill] sm:$0xff] %v9412_v25  ;;  %v9414_v52 = vpop.f32.mrf.mxu0  ;;  %v9416_v44 = vpop.f32.mrf.mxu1 }
 0x151   :  { %11238 = vst [vmem:[#allocation50_spill] sm:$0xff] %v9416_v44  ;;  %v1212_v44 = vadd.f32 %v9298_v24, %v9182_v42  ;;  %v1257_v42 = vadd.f32 %v9319_v3, %v9188_v49  ;;  %v9459_v49 = vadd.f32 %v9334_v37, %v9200_v61 }
 0x152   :  { %v1785_v53 = vpop.f32.mrf.mxu0  ;;  %v1828_v46 = vpop.f32.mrf.mxu1 }
 0x153   :  { %v2396_v47 = vadd.f32 %v1785_v53, %v9272_v17  ;;  %v2398_v23 = vadd.f32 %v1828_v46, %v1165_v7  ;;  %v1214_v17 = vadd.f32 %v9302_v62, %v9186_v48  ;;  %v1251_v53 = vadd.f32 %v9304_v54, %v9176_v35 }
 0x154   :  { %v1787_v19 = vpop.f32.mrf.mxu0  ;;  %v1830_v14 = vpop.f32.mrf.mxu1  ;;  %v9448_v48 = vadd.f32 %v9321_v13, %v9202_v1  ;;  %v9452_v35 = vadd.f32 %v9323_v55, %v9192_v51  ;;  %v9465_v51 = vadd.f32 %v9336_v60, %v9214_v26 }
 0x155   :  { %v2397_v25 = vadd.f32 %v1787_v19, %v9276_v4  ;;  %v2466_v4 = vadd.f32 %v9420_v31, %v2396_v47  ;;  %v2468_v43 = vadd.f32 %v9420_v31, %v2398_v23  ;;  %v2399_v55 = vadd.f32 %v1830_v14, %v9291_v16 }
 0x156   :  { %v1789_v27 = vpop.f32.mrf.mxu0  ;;  %v1832_v9 = vpop.f32.mrf.mxu1 }
 0x157   :  { %v2426_v33 = vadd.f32 %v1789_v27, %v9280_v30  ;;  %v2428_v38 = vadd.f32 %v1832_v9, %v1169_v45  ;;  %v2467_v3 = vadd.f32 %v9420_v31, %v2397_v25  ;;  %v2526_v10 = vmax.f32 %v2466_v4, 0.0 }
 0x158   :  { %v1791_v54 = vpop.f32.mrf.mxu0  ;;  %v1834_v13 = vpop.f32.mrf.mxu1  ;;  %v9473_v45 = vadd.f32 %v9338_v18, %v9204_v5  ;;  %v2528_v7 = vmax.f32 %v2468_v43, 0.0 }
 0x159   :  { %v2496_v2 = vadd.f32 %v9455_v58, %v2426_v33  ;;  %v2427_v1 = vadd.f32 %v1791_v54, %v1128_v28  ;;  %v2498_v30 = vadd.f32 %v9455_v58, %v2428_v38  ;;  %v2429_v62 = vadd.f32 %v1834_v13, %v1171_v6 }
 0x15a   :  { %v1871_v24 = vpop.f32.mrf.mxu0  ;;  %v1914_v23 = vpop.f32.mrf.mxu1  ;;  %v2527_v16 = vmax.f32 %v2467_v3, 0.0  ;;  %v9480_v6 = vadd.f32 %v9340_v0, %v9218_v39  ;;  %v9495_v39 = vadd.f32 %v9353_v40, %v9216_v36  ;;  %v11239_v0 = vld [vmem:[#allocation12_spill] sm:$0xff] }
 0x15b   :  { %v2556_v61 = vmax.f32 %v2496_v2, 0.0  ;;  %v2497_v37 = vadd.f32 %v9455_v58, %v2427_v1  ;;  %v2400_v25 = vadd.f32 %v1871_v24, %v9288_v22  ;;  %v2558_v60 = vmax.f32 %v2498_v30, 0.0 }
 0x15c   :  { %v2402_v26 = vadd.f32 %v1914_v23, %v1251_v53  ;;  %v1873_v47 = vpop.f32.mrf.mxu0  ;;  %v1916_v14 = vpop.f32.mrf.mxu1  ;;  %v2469_v22 = vadd.f32 %v9420_v31, %v2399_v55  ;;  %v2499_v5 = vadd.f32 %v9455_v58, %v2429_v62  ;;  %v9488_v53 = vadd.f32 %v9342_v59, %v9208_v15  ;;  %v9506_v59 = vld [vmem:[%s11139_s3 + $0x8] sm:$0xff]  }
 0x15d   :  { %v9475_v46 = vpack.c.bf16 %v2556_v61, %v2526_v10  ;;  %v2557_v19 = vmax.f32 %v2497_v37, 0.0  ;;  %v2401_v28 = vadd.f32 %v1873_v47, %v9294_v8  ;;  %v9484_v27 = vpack.c.bf16 %v2558_v60, %v2528_v7  ;;  %v11242_v23 = vld [vmem:[#allocation27_spill] sm:$0xff] }
 0x15e   :  { %v1875_v18 = vpop.f32.mrf.mxu0  ;;  %v2470_v8 = vadd.f32 %v9420_v31, %v2400_v25  ;;  %v1918_v9 = vpop.f32.mrf.mxu1  ;;  %v9499_v43 = vadd.f32 %v9355_v34, %v11239_v0  ;;  %v2472_v38 = vadd.f32 %v9420_v31, %v2402_v26  ;;  %v2559_v1 = vmax.f32 %v2499_v5, 0.0 }
 0x15f   :  { %v9490_v4 = vpack.c.bf16 %v2557_v19, %v2527_v16  ;;  %v2430_v33 = vadd.f32 %v1875_v18, %v1212_v44  ;;  %v2432_v54 = vadd.f32 %v1918_v9, %v1255_v32  ;;  %2646 = vmatprep.subr.bf16.mxu1 %v9484_v27  ;;  %v11240_v44 = vld [vmem:[#allocation8_spill] sm:$0xff]  ;;  %v2471_v36 = vadd.f32 %v9420_v31, %v2401_v28  ;;  %v11245_v18 = vld [vmem:[#allocation11_spill] sm:$0xff] }
 0x160   :  { %v1877_v15 = vpop.f32.mrf.mxu0  ;;  %v9510_v3 = vadd.f32 %v9357_v20, %v11240_v44  ;;  %v1920_v2 = vpop.f32.mrf.mxu1  ;;  %v2529_v32 = vmax.f32 %v2469_v22, 0.0  ;;  %v2530_v62 = vmax.f32 %v2470_v8, 0.0  ;;  %v11241_v20 = vld [vmem:[#allocation26_spill] sm:$0xff]  ;;  %v2532_v25 = vmax.f32 %v2472_v38, 0.0  ;;  %v11243_v16 = vld [vmem:[#allocation28_spill] sm:$0xff]  ;;  %v11246_v8 = vld [vmem:[#allocation35_spill] sm:$0xff] }
 0x161   :  { %v2500_v34 = vadd.f32 %v9455_v58, %v2430_v33  ;;  %v2431_v40 = vadd.f32 %v1877_v15, %v1214_v17  ;;  %2647 = vmatpush1.bf16.msra.mxu1 %v9490_v4  ;;  %v2502_v13 = vadd.f32 %v9455_v58, %v2432_v54  ;;  %v2433_v55 = vadd.f32 %v1920_v2, %v1257_v42  ;;  %v11247_v38 = vld [vmem:[#allocation9_spill] sm:$0xff]  ;;  %v11248_v54 = vld [vmem:[#allocation36_spill] sm:$0xff] }
 0x162   :  { %v1957_v30 = vpop.f32.mrf.mxu0  ;;  %v2000_v37 = vpop.f32.mrf.mxu1  ;;  %v2403_v7 = vadd.f32 %v1916_v14, %v11242_v23  ;;  %v2531_v47 = vmax.f32 %v2471_v36, 0.0  ;;  %v11244_v5 = vmov 0   ;;  %v9528_v33 = vadd.f32 %v11246_v8, %v11245_v18  ;;  %v11252_v8 = vld [vmem:[#allocation31_spill] sm:$0xff] }
 0x163   :  { %v2560_v24 = vmax.f32 %v2500_v34, 0.0  ;;  %v2501_v10 = vadd.f32 %v9455_v58, %v2431_v40  ;;  %v2404_v61 = vadd.f32 %v1957_v30, %v11241_v20  ;;  %v2562_v17 = vmax.f32 %v2502_v13, 0.0 }
 0x164   :  { %v2406_v60 = vadd.f32 %v2000_v37, %v9452_v35  ;;  %v1959_v26 = vpop.f32.mrf.mxu0  ;;  %8119 = vmatmul.mubr.msk.bf16.vlgmr.msra.gmra.mxu1 %vm2628_vm1, %v9506_v59  ;;  %v2002_v28 = vpop.f32.mrf.mxu1  ;;  %v9530_v14 = vpack.c.bf16 %v2559_v1, %v2529_v32  ;;  %v2503_v35 = vadd.f32 %v9455_v58, %v2433_v55  ;;  %v9537_v15 = vadd.f32 %v11248_v54, %v11247_v38  ;;  %v11249_v55 = vld [vmem:[#allocation10_spill] sm:$0xff] }
 0x165   :  { %v2561_v42 = vmax.f32 %v2501_v10, 0.0  ;;  %v2405_v19 = vadd.f32 %v1959_v26, %v11243_v16  ;;  %v9523_v22 = vpack.c.bf16 %v2560_v24, %v2530_v62  ;;  %2750 = vmatprep.mubr.bf16.mxu1 %v11244_v5  ;;  %v9533_v0 = vpack.c.bf16 %v2562_v17, %v2532_v25 }
 0x166   :  { %v1961_v9 = vpop.f32.mrf.mxu0  ;;  %v2474_v36 = vadd.f32 %v9420_v31, %v2404_v61  ;;  %v2004_v40 = vpop.f32.mrf.mxu1  ;;  %v2473_v2 = vadd.f32 %v9420_v31, %v2403_v7  ;;  %v2476_v32 = vadd.f32 %v9420_v31, %v2406_v60  ;;  %v9551_v30 = vadd.f32 %v9372_v56, %v11249_v55  ;;  %v11251_v60 = vld [vmem:[#allocation29_spill] sm:$0xff] }
 0x167   :  { %v9539_v44 = vpack.c.bf16 %v2561_v42, %v2531_v47  ;;  %v2434_v34 = vadd.f32 %v1961_v9, %v9440_v29  ;;  %2689 = vmatprep.subr.bf16.mxu0 %v9523_v22  ;;  %v2436_v1 = vadd.f32 %v2004_v40, %v9459_v49  ;;  %2732 = vmatprep.subr.bf16.mxu1 %v9533_v0  ;;  %v2563_v20 = vmax.f32 %v2503_v35, 0.0  ;;  %v11250_v49 = vld [vmem:[#allocation30_spill] sm:$0xff] }
 0x168   :  { %v1963_v13 = vpop.f32.mrf.mxu0  ;;  %2690 = vmatpush1.bf16.msra.mxu0 %v9530_v14  ;;  %v2475_v29 = vadd.f32 %v9420_v31, %v2405_v19  ;;  %v2006_v10 = vpop.f32.mrf.mxu1  ;;  %v2407_v61 = vadd.f32 %v2002_v28, %v11250_v49  ;;  %v2534_v7 = vmax.f32 %v2474_v36, 0.0  ;;  %v2536_v42 = vmax.f32 %v2476_v32, 0.0  ;;  %v11255_v49 = vld [vmem:[#allocation17_spill] sm:$0xff] }
 0x169   :  { %v2504_v62 = vadd.f32 %v9455_v58, %v2434_v34  ;;  %v2435_v24 = vadd.f32 %v1963_v13, %v9448_v48  ;;  %2733 = vmatpush1.bf16.msra.mxu1 %v9539_v44  ;;  %v2506_v37 = vadd.f32 %v9455_v58, %v2436_v1  ;;  %v2437_v25 = vadd.f32 %v2006_v10, %v9473_v45 }
 0x16a   :  { %v2043_v23 = vpop.f32.mrf.mxu0  ;;  %v2086_v47 = vpop.f32.mrf.mxu1  ;;  %v2533_v48 = vmax.f32 %v2473_v2, 0.0  ;;  %v2535_v45 = vmax.f32 %v2475_v29, 0.0  ;;  %v2477_v36 = vadd.f32 %v9420_v31, %v2407_v61  ;;  %v11253_v2 = vld [vmem:[#allocation15_spill] sm:$0xff]  ;;  %v11256_v61 = vld [vmem:[#allocation40_spill] sm:$0xff] }
 0x16b   :  { %v2564_v56 = vmax.f32 %v2504_v62, 0.0  ;;  %v2505_v17 = vadd.f32 %v9455_v58, %v2435_v24  ;;  %v2408_v26 = vadd.f32 %v2043_v23, %v11251_v60  ;;  %8120 = vmatmul.mubr.msk.bf16.vlgmr.msra.gmra.mxu0 %vm2628_vm1, %v9506_v59  ;;  %v2566_v16 = vmax.f32 %v2506_v37, 0.0  ;;  %v11254_v62 = vld [vmem:[#allocation13_spill] sm:$0xff] }
 0x16c   :  { %v2410_v19 = vadd.f32 %v2086_v47, %v9488_v53  ;;  %v2045_v28 = vpop.f32.mrf.mxu0  ;;  %8121 = vmatmul.mubr.msk.bf16.vlgmr.msra.gmra.mxu1 %vm2628_vm1, %v9506_v59  ;;  %2793 = vmatprep.mubr.bf16.mxu0 %v11244_v5  ;;  %v2088_v9 = vpop.f32.mrf.mxu1  ;;  %v9572_v54 = vpack.c.bf16 %v2563_v20, %v2533_v48  ;;  %v2507_v53 = vadd.f32 %v9455_v58, %v2437_v25 }
 0x16d   :  { %v2565_v18 = vmax.f32 %v2505_v17, 0.0  ;;  %v2409_v35 = vadd.f32 %v2045_v28, %v11252_v8  ;;  %v9569_v38 = vpack.c.bf16 %v2564_v56, %v2534_v7  ;;  %2836 = vmatprep.mubr.bf16.mxu1 %v11244_v5  ;;  %v9576_v40 = vpack.c.bf16 %v2566_v16, %v2536_v42  ;;  %v11257_v42 = vld [vmem:[#allocation32_spill] sm:$0xff]  ;;  %v11258_v28 = vld [vmem:[#allocation33_spill] sm:$0xff] }
 0x16e   :  { %v2047_v34 = vpop.f32.mrf.mxu0  ;;  %v9580_v32 = vadd.f32 %v9374_v41, %v11253_v2  ;;  %v2478_v13 = vadd.f32 %v9420_v31, %v2408_v26  ;;  %v2090_v29 = vpop.f32.mrf.mxu1  ;;  %v1515_v24 = vadd.f32 %v9376_v50, %v11254_v62  ;;  %v2480_v10 = vadd.f32 %v9420_v31, %v2410_v19 }
 0x16f   :  { %v9582_v1 = vpack.c.bf16 %v2565_v18, %v2535_v45  ;;  %v2438_v55 = vadd.f32 %v2047_v34, %v9465_v51  ;;  %2775 = vmatprep.subr.bf16.mxu0 %v9569_v38  ;;  %v2440_v20 = vadd.f32 %v2090_v29, %v9495_v39  ;;  %2818 = vmatprep.subr.bf16.mxu1 %v9576_v40  ;;  %v2537_v7 = vmax.f32 %v2477_v36, 0.0 }
 0x170   :  { %v2049_v41 = vpop.f32.mrf.mxu0  ;;  %2776 = vmatpush1.bf16.msra.mxu0 %v9572_v54  ;;  %v9595_v37 = vadd.f32 %v11256_v61, %v11255_v49  ;;  %v2479_v51 = vadd.f32 %v9420_v31, %v2409_v35  ;;  %v2092_v50 = vpop.f32.mrf.mxu1  ;;  %v2567_v39 = vmax.f32 %v2507_v53, 0.0  ;;  %v2538_v26 = vmax.f32 %v2478_v13, 0.0  ;;  %v11259_v53 = vld [vmem:[#allocation34_spill] sm:$0xff] }
 0x171   :  { %v2508_v25 = vadd.f32 %v9455_v58, %v2438_v55  ;;  %v2439_v23 = vadd.f32 %v2049_v41, %v9480_v6  ;;  %2819 = vmatpush1.bf16.msra.mxu1 %v9582_v1  ;;  %v2510_v56 = vadd.f32 %v9455_v58, %v2440_v20  ;;  %v2441_v17 = vadd.f32 %v2092_v50, %v9510_v3  ;;  %v11260_v55 = vld [vmem:[#allocation14_spill] sm:$0xff]  ;;  %v11262_v41 = vld [vmem:[#allocation16_spill] sm:$0xff] }
 0x172   :  { %v2129_v60 = vpop.f32.mrf.mxu0  ;;  %v2172_v19 = vpop.f32.mrf.mxu1  ;;  %v2540_v6 = vmax.f32 %v2480_v10, 0.0  ;;  %v2411_v45 = vadd.f32 %v2088_v9, %v11258_v28  ;;  %v2539_v3 = vmax.f32 %v2479_v51, 0.0  ;;  %v11261_v9 = vld [vmem:[#allocation41_spill] sm:$0xff]  ;;  %v9618_v62 = vpack.c.bf16 %v2567_v39, %v2537_v7 }
 0x173   :  { %v2568_v47 = vmax.f32 %v2508_v25, 0.0  ;;  %v2509_v48 = vadd.f32 %v9455_v58, %v2439_v23  ;;  %v2412_v16 = vadd.f32 %v2129_v60, %v11257_v42  ;;  %8122 = vmatmul.mubr.msk.bf16.vlgmr.msra.gmra.mxu0 %vm2628_vm1, %v9506_v59  ;;  %v2570_v18 = vmax.f32 %v2510_v56, 0.0 }
 0x174   :  { %v2414_v8 = vadd.f32 %v2172_v19, %v9537_v15  ;;  %v2131_v35 = vpop.f32.mrf.mxu0  ;;  %8123 = vmatmul.mubr.msk.bf16.vlgmr.msra.gmra.mxu1 %vm2628_vm1, %v9506_v59  ;;  %2879 = vmatprep.mubr.bf16.mxu0 %v11244_v5  ;;  %v2174_v2 = vpop.f32.mrf.mxu1  ;;  %v1595_v29 = vadd.f32 %v11261_v9, %v11260_v55  ;;  %v2511_v15 = vadd.f32 %v9455_v58, %v2441_v17  ;;  %v11266_v55 = vld [vmem:[#allocation39_spill] sm:$0xff] }
 0x175   :  { %v2569_v36 = vmax.f32 %v2509_v48, 0.0  ;;  %v2413_v34 = vadd.f32 %v2131_v35, %v11259_v53  ;;  %v9613_v13 = vpack.c.bf16 %v2568_v47, %v2538_v26  ;;  %2922 = vmatprep.mubr.bf16.mxu1 %v11244_v5  ;;  %v9621_v20 = vpack.c.bf16 %v2570_v18, %v2540_v6  ;;  %v11265_v18 = vld [vmem:[#allocation37_spill] sm:$0xff] }
 0x176   :  { %v2133_v10 = vpop.f32.mrf.mxu0  ;;  %v1599_v49 = vadd.f32 %v9391_v21, %v11262_v41  ;;  %v2482_v51 = vadd.f32 %v9420_v31, %v2412_v16  ;;  %v2176_v23 = vpop.f32.mrf.mxu1  ;;  %v2481_v50 = vadd.f32 %v9420_v31, %v2411_v45  ;;  %v2484_v7 = vadd.f32 %v9420_v31, %v2414_v8  ;;  %v11263_v21 = vld [vmem:[#allocation20_spill] sm:$0xff] }
 0x177   :  { %v9625_v61 = vpack.c.bf16 %v2569_v36, %v2539_v3  ;;  %v2442_v25 = vadd.f32 %v2133_v10, %v9499_v43  ;;  %2861 = vmatprep.subr.bf16.mxu0 %v9613_v13  ;;  %v2444_v39 = vadd.f32 %v2176_v23, %v9551_v30  ;;  %2904 = vmatprep.subr.bf16.mxu1 %v9621_v20  ;;  %v2571_v48 = vmax.f32 %v2511_v15, 0.0  ;;  %v11264_v30 = vld [vmem:[#allocation38_spill] sm:$0xff] }
 0x178   :  { %v2135_v56 = vpop.f32.mrf.mxu0  ;;  %2862 = vmatpush1.bf16.msra.mxu0 %v9618_v62  ;;  %v9637_v17 = vadd.f32 %v9393_v11, %v11263_v21  ;;  %v2483_v43 = vadd.f32 %v9420_v31, %v2413_v34  ;;  %v2178_v47 = vpop.f32.mrf.mxu1  ;;  %v2415_v42 = vadd.f32 %v2174_v2, %v11264_v30  ;;  %v2542_v28 = vmax.f32 %v2482_v51, 0.0 }
 0x179   :  { %v2512_v60 = vadd.f32 %v9455_v58, %v2442_v25  ;;  %v2443_v26 = vadd.f32 %v2135_v56, %v9528_v33  ;;  %2905 = vmatpush1.bf16.msra.mxu1 %v9625_v61  ;;  %v2514_v16 = vadd.f32 %v9455_v58, %v2444_v39  ;;  %v2445_v19 = vadd.f32 %v2178_v47, %v1515_v24 }
 0x17a   :  { %v2215_v6 = vpop.f32.mrf.mxu0  ;;  %v2258_v35 = vpop.f32.mrf.mxu1  ;;  %v2541_v33 = vmax.f32 %v2481_v50, 0.0  ;;  %v2544_v3 = vmax.f32 %v2484_v7, 0.0  ;;  %v2543_v24 = vmax.f32 %v2483_v43, 0.0  ;;  %v2485_v51 = vadd.f32 %v9420_v31, %v2415_v42  ;;  %v11267_v50 = vld [vmem:[#allocation18_spill] sm:$0xff] }
 0x17b   :  { %v2572_v45 = vmax.f32 %v2512_v60, 0.0  ;;  %v2513_v11 = vadd.f32 %v9455_v58, %v2443_v26  ;;  %v2416_v8 = vadd.f32 %v2215_v6, %v11265_v18  ;;  %8124 = vmatmul.mubr.msk.bf16.vlgmr.msra.gmra.mxu0 %vm2628_vm1, %v9506_v59  ;;  %v2574_v36 = vmax.f32 %v2514_v16, 0.0  ;;  %v11268_v60 = vld [vmem:[#allocation22_spill] sm:$0xff]  ;;  %v11269_v26 = vld [vmem:[#allocation45_spill] sm:$0xff] }
 0x17c   :  { %v2418_v53 = vadd.f32 %v2258_v35, %v1595_v29  ;;  %v2217_v34 = vpop.f32.mrf.mxu0  ;;  %8125 = vmatmul.mubr.msk.bf16.vlgmr.msra.gmra.mxu1 %vm2628_vm1, %v9506_v59  ;;  %2965 = vmatprep.mubr.bf16.mxu0 %v11244_v5  ;;  %v2260_v15 = vpop.f32.mrf.mxu1  ;;  %v9656_v41 = vpack.c.bf16 %v2571_v48, %v2541_v33  ;;  %v2515_v29 = vadd.f32 %v9455_v58, %v2445_v19 }
 0x17d   :  { %v2573_v2 = vmax.f32 %v2513_v11, 0.0  ;;  %v2417_v9 = vadd.f32 %v2217_v34, %v11266_v55  ;;  %v9653_v10 = vpack.c.bf16 %v2572_v45, %v2542_v28  ;;  %3008 = vmatprep.mubr.bf16.mxu1 %v11244_v5  ;;  %v9660_v23 = vpack.c.bf16 %v2574_v36, %v2544_v3  ;;  %v11272_v34 = vld [vmem:[#allocation43_spill] sm:$0xff] }
 0x17e   :  { %v2219_v25 = vpop.f32.mrf.mxu0  ;;  %v1601_v7 = vadd.f32 %v9395_v57, %v11267_v50  ;;  %v2486_v56 = vadd.f32 %v9420_v31, %v2416_v8  ;;  %v2262_v43 = vpop.f32.mrf.mxu1  ;;  %v1644_v47 = vadd.f32 %v11269_v26, %v11268_v60  ;;  %v2488_v48 = vadd.f32 %v9420_v31, %v2418_v53  ;;  %v11270_v57 = vld [vmem:[#allocation19_spill] sm:$0xff] }
 0x17f   :  { %v9664_v39 = vpack.c.bf16 %v2573_v2, %v2543_v24  ;;  %v2446_v21 = vadd.f32 %v2219_v25, %v9580_v32  ;;  %2947 = vmatprep.subr.bf16.mxu0 %v9653_v10  ;;  %v2448_v30 = vadd.f32 %v2262_v43, %v1599_v49  ;;  %2990 = vmatprep.subr.bf16.mxu1 %v9660_v23  ;;  %v2545_v45 = vmax.f32 %v2485_v51, 0.0  ;;  %v11273_v25 = vld [vmem:[#allocation44_spill] sm:$0xff] }
 0x180   :  { %v2221_v42 = vpop.f32.mrf.mxu0  ;;  %2948 = vmatpush1.bf16.msra.mxu0 %v9656_v41  ;;  %v1681_v16 = vadd.f32 %v9399_v12, %v11270_v57  ;;  %v2487_v19 = vadd.f32 %v9420_v31, %v2417_v9  ;;  %v2264_v28 = vpop.f32.mrf.mxu1  ;;  %v2575_v11 = vmax.f32 %v2515_v29, 0.0  ;;  %v2546_v35 = vmax.f32 %v2486_v56, 0.0  ;;  %v11271_v12 = vld [vmem:[#allocation42_spill] sm:$0xff] }
 0x181   :  { %v2516_v32 = vadd.f32 %v9455_v58, %v2446_v21  ;;  %v2447_v6 = vadd.f32 %v2221_v42, %v9595_v37  ;;  %2991 = vmatpush1.bf16.msra.mxu1 %v9664_v39  ;;  %v2518_v49 = vadd.f32 %v9455_v58, %v2448_v30  ;;  %v2449_v18 = vadd.f32 %v2264_v28, %v1601_v7  ;;  %v11274_v21 = vld [vmem:[#allocation21_spill] sm:$0xff]  ;;  %v11275_v30 = vld [vmem:[#allocation23_spill] sm:$0xff] }
 0x182   :  { %v2301_v8 = vpop.f32.mrf.mxu0  ;;  %v2344_v53 = vpop.f32.mrf.mxu1  ;;  %v2548_v37 = vmax.f32 %v2488_v48, 0.0  ;;  %v2419_v24 = vadd.f32 %v2260_v15, %v11272_v34  ;;  %v2547_v51 = vmax.f32 %v2487_v19, 0.0  ;;  %v1685_v15 = vadd.f32 %v9410_v63, %v11274_v21 }
 0x183   :  { %v2576_v33 = vmax.f32 %v2516_v32, 0.0  ;;  %v2517_v3 = vadd.f32 %v9455_v58, %v2447_v6  ;;  %v2420_v36 = vadd.f32 %v2301_v8, %v11271_v12  ;;  %8126 = vmatmul.mubr.msk.bf16.vlgmr.msra.gmra.mxu0 %vm2628_vm1, %v9506_v59  ;;  %v2578_v2 = vmax.f32 %v2518_v49, 0.0  ;;  %v11277_v8 = vld [vmem:[#allocation49_spill] sm:$0xff] }
 0x184   :  { %v2422_v55 = vadd.f32 %v2344_v53, %v1681_v16  ;;  %v2303_v9 = vpop.f32.mrf.mxu0  ;;  %8127 = vmatmul.mubr.msk.bf16.vlgmr.msra.gmra.mxu1 %vm2628_vm1, %v9506_v59  ;;  %3051 = vmatprep.mubr.bf16.mxu0 %v11244_v5  ;;  %v2346_v7 = vpop.f32.mrf.mxu1  ;;  %v9695_v43 = vpack.c.bf16 %v2575_v11, %v2545_v45  ;;  %v2519_v60 = vadd.f32 %v9455_v58, %v2449_v18 }
 0x185   :  { %v2577_v29 = vmax.f32 %v2517_v3, 0.0  ;;  %v2421_v50 = vadd.f32 %v2303_v9, %v11273_v25  ;;  %v9690_v56 = vpack.c.bf16 %v2576_v33, %v2546_v35  ;;  %3094 = vmatprep.mubr.bf16.mxu1 %v11244_v5  ;;  %v9698_v48 = vpack.c.bf16 %v2578_v2, %v2548_v37 }
 0x186   :  { %v2305_v26 = vpop.f32.mrf.mxu0  ;;  %v1687_v42 = vadd.f32 %v9414_v52, %v11275_v30  ;;  %v2490_v16 = vadd.f32 %v9420_v31, %v2420_v36  ;;  %v2348_v32 = vpop.f32.mrf.mxu1  ;;  %v2489_v63 = vadd.f32 %v9420_v31, %v2419_v24  ;;  %v2492_v6 = vadd.f32 %v9420_v31, %v2422_v55  ;;  %v11278_v24 = vld [vmem:[#allocation46_spill] sm:$0xff] }
 0x187   :  { %v9702_v57 = vpack.c.bf16 %v2577_v29, %v2547_v51  ;;  %v2450_v19 = vadd.f32 %v2305_v26, %v9637_v17  ;;  %3033 = vmatprep.subr.bf16.mxu0 %v9690_v56  ;;  %v2452_v28 = vadd.f32 %v2348_v32, %v1685_v15  ;;  %3076 = vmatprep.subr.bf16.mxu1 %v9698_v48  ;;  %v11276_v17 = vld [vmem:[#allocation24_spill] sm:$0xff]  ;;  %v2579_v33 = vmax.f32 %v2519_v60, 0.0  ;;  %v11279_v51 = vld [vmem:[#allocation47_spill] sm:$0xff] }
 0x188   :  { %v2307_v45 = vpop.f32.mrf.mxu0  ;;  %3034 = vmatpush1.bf16.msra.mxu0 %v9695_v43  ;;  %v2491_v52 = vadd.f32 %v9420_v31, %v2421_v50  ;;  %v2350_v18 = vpop.f32.mrf.mxu1  ;;  %v1728_v35 = vadd.f32 %v11277_v8, %v11276_v17  ;;  %v2550_v53 = vmax.f32 %v2490_v16, 0.0  ;;  %v2549_v55 = vmax.f32 %v2489_v63, 0.0  ;;  %v11280_v60 = vld [vmem:[#allocation48_spill] sm:$0xff]  ;;  %v2617_v32 = vld [vmem:[%s11140_s4 + $0x8] sm:$0xff]  ;;  %v8166_v17 = vld [vmem:[%s11140_s4 + $0x18] sm:$0xff] }
 0x189   :  { %v2520_v11 = vadd.f32 %v9455_v58, %v2450_v19  ;;  %v2451_v49 = vadd.f32 %v2307_v45, %v1644_v47  ;;  %3077 = vmatpush1.bf16.msra.mxu1 %v9702_v57  ;;  %v2522_v3 = vadd.f32 %v9455_v58, %v2452_v28  ;;  %v2453_v12 = vadd.f32 %v2350_v18, %v1687_v42  ;;  %v2616_v47 = vld [vmem:[%s11140_s4] sm:$0xff] }
 0x18a   :  { %v2387_v36 = vpop.f32.mrf.mxu0  ;;  %v2552_v9 = vmax.f32 %v2492_v6, 0.0  ;;  %v2423_v29 = vadd.f32 %v2346_v7, %v11279_v51  ;;  %v2551_v21 = vmax.f32 %v2491_v52, 0.0  ;;  %4515 = vperm.xlu1 %8534, %v2616_v47   ;;  %v9734_v42 = vpack.c.bf16 %v2579_v33, %v2549_v55  ;;  %v7968_v33 = vld [vmem:[%s11142_s6 + $0x8] sm:$0xff] }
 0x18b   :  { %v2580_v37 = vmax.f32 %v2520_v11, 0.0  ;;  %v2521_v34 = vadd.f32 %v9455_v58, %v2451_v49  ;;  %v2424_v2 = vadd.f32 %v2387_v36, %v11278_v24  ;;  %8128 = vmatmul.mubr.msk.bf16.vlgmr.msra.gmra.mxu0 %vm2628_vm1, %v9506_v59  ;;  %v2582_v25 = vmax.f32 %v2522_v3, 0.0 }
 0x18c   :  { %v2389_v50 = vpop.f32.mrf.mxu0  ;;  %8129 = vmatmul.mubr.msk.bf16.vlgmr.msra.gmra.mxu1 %vm2628_vm1, %v9506_v59  ;;  %3137 = vmatprep.mubr.bf16.mxu0 %v11244_v5  ;;  %v2523_v7 = vadd.f32 %v9455_v58, %v2453_v12  ;;  %v2493_v45 = vadd.f32 %v9420_v31, %v2423_v29 }
 0x18d   :  { %v2581_v15 = vmax.f32 %v2521_v34, 0.0  ;;  %v9729_v26 = vadd.f32 %v2389_v50, %v11280_v60  ;;  %v9731_v30 = vpack.c.bf16 %v2580_v37, %v2550_v53  ;;  %3180 = vmatprep.mubr.bf16.mxu1 %v11244_v5  ;;  %v9737_v19 = vpack.c.bf16 %v2582_v25, %v2552_v9 }
 0x18e   :  { %v2391_v16 = vpop.f32.mrf.mxu0  ;;  %v2494_v6 = vadd.f32 %v9420_v31, %v2424_v2  ;;  %4520 = vperm.xlu1 %8534, %v2617_v32   ;;  %v2583_v11 = vmax.f32 %v2523_v7, 0.0  ;;  %v2553_v8 = vmax.f32 %v2493_v45, 0.0 }
 0x18f   :  { %v9742_v63 = vpack.c.bf16 %v2581_v15, %v2551_v21  ;;  %v2454_v28 = vadd.f32 %v2391_v16, %v1728_v35  ;;  %3119 = vmatprep.subr.bf16.mxu0 %v9731_v30  ;;  %3162 = vmatprep.subr.bf16.mxu1 %v9737_v19 }
 0x190   :  { %3120 = vmatpush1.bf16.msra.mxu0 %v9734_v42  ;;  %v2554_v49 = vmax.f32 %v2494_v6, 0.0 }
 0x191   :  { %v2524_v52 = vadd.f32 %v9455_v58, %v2454_v28  ;;  %3163 = vmatpush1.bf16.msra.mxu1 %v9742_v63 }
 0x192   :  { %3256 = vmatprep.subr.bf16.mxu1 %v9490_v4  ;;  %v9764_v4 = vpack.c.bf16 %v2583_v11, %v2553_v8  ;;  %6435 = vperm.xlu1 %8534, %v8166_v17  }
 0x193   :  { %v2584_v18 = vmax.f32 %v2524_v52, 0.0  ;;  %8130 = vmatmul.mubr.msk.bf16.vlgmr.msra.gmra.mxu0 %vm2628_vm1, %v9506_v59 }
 0x194   :  { %8131 = vmatmul.mubr.msk.bf16.vlgmr.msra.gmra.mxu1 %vm2628_vm1, %v9506_v59  ;;  %3223 = vmatprep.mubr.bf16.mxu0 %v11244_v5 }
 0x195   :  { %3257 = vmatpush1.bf16.msra.mxu1 %v9475_v46  ;;  %v9761_v35 = vpack.c.bf16 %v2584_v18, %v2554_v49  ;;  %3274 = vmatprep.mubr.bf16.mxu1 %v11244_v5  ;;  %v8539_v46 = vld [vmem:[%s11139_s3] sm:$0xff]  }
 0x196   :  { %3342 = vmatprep.subr.bf16.mxu1 %v9539_v44  ;;  %7976 = vperm.xlu1 %8534, %v7968_v33  }
 0x197   :  { %3205 = vmatprep.subr.bf16.mxu0 %v9761_v35 }
 0x198   :  { %3206 = vmatpush1.bf16.msra.mxu0 %v9764_v4 }
 0x199   :  { %3299 = vmatprep.subr.bf16.mxu0 %v9530_v14 }
 0x19b   :  { %8132 = vmatmul.mubr.msk.bf16.vlgmr.msra.gmra.mxu0 %vm2628_vm1, %v9506_v59  ;;  %v8540_v59 = vld [vmem:[%s11139_s3 + $0x10] sm:$0xff]  }
 0x19c   :  { %8134 = vmatmul.mubr.msk.bf16.vlgmr.msra.gmra.mxu1 %vm2628_vm1, %v8539_v46  ;;  %3300 = vmatpush1.bf16.msra.mxu0 %v9484_v27 }
 0x19d   :  { %3343 = vmatpush1.bf16.msra.mxu1 %v9523_v22  ;;  %3385 = vmatprep.subr.bf16.mxu0 %v9572_v54 }
 0x19e   :  { %3428 = vmatprep.subr.bf16.mxu1 %v9582_v1  ;;  %3317 = vmatprep.mubr.bf16.mxu0 %v11244_v5 }
 0x19f   :  { %3360 = vmatprep.mubr.bf16.mxu1 %v11244_v5 }
 0x1a3   :  { %8135 = vmatmul.mubr.msk.bf16.vlgmr.msra.gmra.mxu0 %vm2628_vm1, %v8539_v46 }
 0x1a4   :  { %3386 = vmatpush1.bf16.msra.mxu0 %v9533_v0  ;;  %8136 = vmatmul.mubr.msk.bf16.vlgmr.msra.gmra.mxu1 %vm2628_vm1, %v8539_v46 }
 0x1a5   :  { %3429 = vmatpush1.bf16.msra.mxu1 %v9569_v38  ;;  %3471 = vmatprep.subr.bf16.mxu0 %v9618_v62 }
 0x1a6   :  { %3514 = vmatprep.subr.bf16.mxu1 %v9625_v61  ;;  %3403 = vmatprep.mubr.bf16.mxu0 %v11244_v5 }
 0x1a7   :  { %3446 = vmatprep.mubr.bf16.mxu1 %v11244_v5 }
 0x1ab   :  { %8137 = vmatmul.mubr.msk.bf16.vlgmr.msra.gmra.mxu0 %vm2628_vm1, %v8539_v46 }
 0x1ac   :  { %3472 = vmatpush1.bf16.msra.mxu0 %v9576_v40  ;;  %8138 = vmatmul.mubr.msk.bf16.vlgmr.msra.gmra.mxu1 %vm2628_vm1, %v8539_v46 }
 0x1ad   :  { %3515 = vmatpush1.bf16.msra.mxu1 %v9613_v13  ;;  %3557 = vmatprep.subr.bf16.mxu0 %v9656_v41 }
 0x1ae   :  { %3600 = vmatprep.subr.bf16.mxu1 %v9664_v39  ;;  %3489 = vmatprep.mubr.bf16.mxu0 %v11244_v5 }
 0x1af   :  { %3532 = vmatprep.mubr.bf16.mxu1 %v11244_v5 }
 0x1b3   :  { %8139 = vmatmul.mubr.msk.bf16.vlgmr.msra.gmra.mxu0 %vm2628_vm1, %v8539_v46 }
 0x1b4   :  { %3558 = vmatpush1.bf16.msra.mxu0 %v9621_v20  ;;  %8140 = vmatmul.mubr.msk.bf16.vlgmr.msra.gmra.mxu1 %vm2628_vm1, %v8539_v46 }
 0x1b5   :  { %3601 = vmatpush1.bf16.msra.mxu1 %v9653_v10  ;;  %3643 = vmatprep.subr.bf16.mxu0 %v9695_v43 }
 0x1b6   :  { %3686 = vmatprep.subr.bf16.mxu1 %v9702_v57  ;;  %3575 = vmatprep.mubr.bf16.mxu0 %v11244_v5 }
 0x1b7   :  { %3618 = vmatprep.mubr.bf16.mxu1 %v11244_v5 }
 0x1bb   :  { %8141 = vmatmul.mubr.msk.bf16.vlgmr.msra.gmra.mxu0 %vm2628_vm1, %v8539_v46 }
 0x1bc   :  { %3644 = vmatpush1.bf16.msra.mxu0 %v9660_v23  ;;  %8142 = vmatmul.mubr.msk.bf16.vlgmr.msra.gmra.mxu1 %vm2628_vm1, %v8539_v46 }
 0x1bd   :  { %3687 = vmatpush1.bf16.msra.mxu1 %v9690_v56  ;;  %3729 = vmatprep.subr.bf16.mxu0 %v9734_v42 }
 0x1be   :  { %3772 = vmatprep.subr.bf16.mxu1 %v9742_v63  ;;  %3661 = vmatprep.mubr.bf16.mxu0 %v11244_v5 }
 0x1bf   :  { %3704 = vmatprep.mubr.bf16.mxu1 %v11244_v5 }
 0x1c3   :  { %8143 = vmatmul.mubr.msk.bf16.vlgmr.msra.gmra.mxu0 %vm2628_vm1, %v8539_v46 }
 0x1c4   :  { %3730 = vmatpush1.bf16.msra.mxu0 %v9698_v48  ;;  %8144 = vmatmul.mubr.msk.bf16.vlgmr.msra.gmra.mxu1 %vm2628_vm1, %v8539_v46 }
 0x1c5   :  { %3773 = vmatpush1.bf16.msra.mxu1 %v9731_v30  ;;  %3815 = vmatprep.subr.bf16.mxu0 %v9764_v4 }
 0x1c6   :  { %3869 = vmatprep.subr.bf16.mxu1 %v9530_v14  ;;  %3747 = vmatprep.mubr.bf16.mxu0 %v11244_v5  ;;  %v11282_v14 = vld [vmem:[#allocation50_spill] sm:$0xff] }
 0x1c7   :  { %3790 = vmatprep.mubr.bf16.mxu1 %v11244_v5 }
 0x1cb   :  { %8145 = vmatmul.mubr.msk.bf16.vlgmr.msra.gmra.mxu0 %vm2628_vm1, %v8539_v46 }
 0x1cc   :  { %3816 = vmatpush1.bf16.msra.mxu0 %v9737_v19  ;;  %8146 = vmatmul.mubr.msk.bf16.vlgmr.msra.gmra.mxu1 %vm2628_vm1, %v8539_v46 }
 0x1cd   :  { %3870 = vmatpush1.bf16.msra.mxu1 %v9484_v27  ;;  %3912 = vmatprep.subr.bf16.mxu0 %v9539_v44  ;;  %v2393_v27 = vpop.f32.mrf.mxu0 }
 0x1ce   :  { %3955 = vmatprep.subr.bf16.mxu1 %v9572_v54  ;;  %3833 = vmatprep.mubr.bf16.mxu0 %v11244_v5  ;;  %v2495_v54 = vadd.f32 %v9420_v31, %v9729_v26 }
 0x1cf   :  { %3887 = vmatprep.mubr.bf16.mxu1 %v11244_v5 }
 0x1d3   :  { %8147 = vmatmul.mubr.msk.bf16.vlgmr.msra.gmra.mxu0 %vm2628_vm1, %v8539_v46 }
 0x1d4   :  { %3913 = vmatpush1.bf16.msra.mxu0 %v9523_v22  ;;  %8151 = vmatmul.mubr.msk.bf16.vlgmr.msra.gmra.mxu1 %vm2628_vm1, %v8540_v59  ;;  %v11281_v22 = vld [vmem:[#allocation25_spill] sm:$0xff] }
 0x1d5   :  { %3956 = vmatpush1.bf16.msra.mxu1 %v9533_v0  ;;  %3998 = vmatprep.subr.bf16.mxu0 %v9582_v1  ;;  %v1730_v0 = vadd.f32 %v11282_v14, %v11281_v22 }
 0x1d6   :  { %4041 = vmatprep.subr.bf16.mxu1 %v9618_v62  ;;  %3930 = vmatprep.mubr.bf16.mxu0 %v11244_v5 }
 0x1d7   :  { %3973 = vmatprep.mubr.bf16.mxu1 %v11244_v5  ;;  %v2455_v44 = vadd.f32 %v2393_v27, %v1730_v0 }
 0x1db   :  { %8152 = vmatmul.mubr.msk.bf16.vlgmr.msra.gmra.mxu0 %vm2628_vm1, %v8540_v59 }
 0x1dc   :  { %3999 = vmatpush1.bf16.msra.mxu0 %v9569_v38  ;;  %8153 = vmatmul.mubr.msk.bf16.vlgmr.msra.gmra.mxu1 %vm2628_vm1, %v8540_v59  ;;  %v2525_v38 = vadd.f32 %v9455_v58, %v2455_v44  ;;  %v2555_v58 = vmax.f32 %v2495_v54, 0.0 }
 0x1dd   :  { %4042 = vmatpush1.bf16.msra.mxu1 %v9576_v40  ;;  %4084 = vmatprep.subr.bf16.mxu0 %v9625_v61 }
 0x1de   :  { %4127 = vmatprep.subr.bf16.mxu1 %v9656_v41  ;;  %4016 = vmatprep.mubr.bf16.mxu0 %v11244_v5  ;;  %v2585_v40 = vmax.f32 %v2525_v38, 0.0 }
 0x1df   :  { %4059 = vmatprep.mubr.bf16.mxu1 %v11244_v5 }
 0x1e0   :  { %v2615_v1 = vpack.c.bf16 %v2585_v40, %v2555_v58 }
 0x1e3   :  { %8154 = vmatmul.mubr.msk.bf16.vlgmr.msra.gmra.mxu0 %vm2628_vm1, %v8540_v59 }
 0x1e4   :  { %4085 = vmatpush1.bf16.msra.mxu0 %v9613_v13  ;;  %8155 = vmatmul.mubr.msk.bf16.vlgmr.msra.gmra.mxu1 %vm2628_vm1, %v8540_v59 }
 0x1e5   :  { %4128 = vmatpush1.bf16.msra.mxu1 %v9621_v20  ;;  %4170 = vmatprep.subr.bf16.mxu0 %v9664_v39 }
 0x1e6   :  { %4213 = vmatprep.subr.bf16.mxu1 %v9695_v43  ;;  %4102 = vmatprep.mubr.bf16.mxu0 %v11244_v5 }
 0x1e7   :  { %4145 = vmatprep.mubr.bf16.mxu1 %v11244_v5 }
 0x1eb   :  { %8156 = vmatmul.mubr.msk.bf16.vlgmr.msra.gmra.mxu0 %vm2628_vm1, %v8540_v59 }
 0x1ec   :  { %4171 = vmatpush1.bf16.msra.mxu0 %v9653_v10  ;;  %8157 = vmatmul.mubr.msk.bf16.vlgmr.msra.gmra.mxu1 %vm2628_vm1, %v8540_v59 }
 0x1ed   :  { %4214 = vmatpush1.bf16.msra.mxu1 %v9660_v23  ;;  %4256 = vmatprep.subr.bf16.mxu0 %v9702_v57 }
 0x1ee   :  { %4299 = vmatprep.subr.bf16.mxu1 %v9734_v42  ;;  %4188 = vmatprep.mubr.bf16.mxu0 %v11244_v5 }
 0x1ef   :  { %4231 = vmatprep.mubr.bf16.mxu1 %v11244_v5 }
 0x1f3   :  { %8158 = vmatmul.mubr.msk.bf16.vlgmr.msra.gmra.mxu0 %vm2628_vm1, %v8540_v59 }
 0x1f4   :  { %4257 = vmatpush1.bf16.msra.mxu0 %v9690_v56  ;;  %8159 = vmatmul.mubr.msk.bf16.vlgmr.msra.gmra.mxu1 %vm2628_vm1, %v8540_v59 }
 0x1f5   :  { %4300 = vmatpush1.bf16.msra.mxu1 %v9698_v48  ;;  %4342 = vmatprep.subr.bf16.mxu0 %v9742_v63 }
 0x1f6   :  { %4385 = vmatprep.subr.bf16.mxu1 %v9764_v4  ;;  %4274 = vmatprep.mubr.bf16.mxu0 %v11244_v5 }
 0x1f7   :  { %4317 = vmatprep.mubr.bf16.mxu1 %v11244_v5 }
 0x1fb   :  { %8160 = vmatmul.mubr.msk.bf16.vlgmr.msra.gmra.mxu0 %vm2628_vm1, %v8540_v59 }
 0x1fc   :  { %4343 = vmatpush1.bf16.msra.mxu0 %v9731_v30  ;;  %8161 = vmatmul.mubr.msk.bf16.vlgmr.msra.gmra.mxu1 %vm2628_vm1, %v8540_v59 }
 0x1fd   :  { %4386 = vmatpush1.bf16.msra.mxu1 %v9737_v19  ;;  %4428 = vmatprep.subr.bf16.mxu0 %v2615_v1 }
 0x1fe   :  { %4360 = vmatprep.mubr.bf16.mxu0 %v11244_v5  ;;  %4403 = vmatprep.mubr.bf16.mxu1 %v11244_v5 }
 0x203   :  { %8162 = vmatmul.mubr.msk.bf16.vlgmr.msra.gmra.mxu0 %vm2628_vm1, %v8540_v59 }
 0x204   :  { %4429 = vmatpush1.bf16.msra.mxu0 %v9761_v35  ;;  %8163 = vmatmul.mubr.msk.bf16.vlgmr.msra.gmra.mxu1 %vm2628_vm1, %v8540_v59 }
 0x205   :  { %4446 = vmatprep.mubr.bf16.mxu0 %v11244_v5  ;;  %4712 = vmatprep.mubr.bf16.mxu1 %v11244_v5 }
 0x20b   :  { %8164 = vmatmul.mubr.msk.bf16.vlgmr.msra.gmra.mxu0 %vm2628_vm1, %v8540_v59 }
 0x20c   :  { %4755 = vmatprep.mubr.bf16.mxu0 %v11244_v5 }
 0x224   :  { %v2666_v31 = vpop.f32.mrf.mxu1 }
 0x226   :  { %v2668_v13 = vpop.f32.mrf.mxu1 }
 0x228   :  { %v2670_v62 = vpop.f32.mrf.mxu1 }
 0x22a   :  { %v9894_v20 = vpop.f32.mrf.mxu1 }
 0x22b   :  { %v9896_v61 = vpop.f32.mrf.mxu0 }
 0x22c   :  { %v9898_v10 = vpop.f32.mrf.mxu1 }
 0x22d   :  { %v9900_v41 = vpop.f32.mrf.mxu0 }
 0x22e   :  { %v2754_v23 = vpop.f32.mrf.mxu1 }
 0x22f   :  { %v9902_v39 = vpop.f32.mrf.mxu0 }
 0x230   :  { %v9904_v56 = vpop.f32.mrf.mxu1 }
 0x231   :  { %v9906_v43 = vpop.f32.mrf.mxu0 }
 0x232   :  { %v9908_v48 = vpop.f32.mrf.mxu1 }
 0x233   :  { %v9910_v57 = vpop.f32.mrf.mxu0 }
 0x234   :  { %v9912_v3 = vpop.f32.mrf.mxu1 }
 0x235   :  { %v9914_v12 = vpop.f32.mrf.mxu0 }
 0x236   :  { %v2840_v36 = vpop.f32.mrf.mxu1 }
 0x237   :  { %v9916_v53 = vpop.f32.mrf.mxu0 }
 0x238   :  { %v9918_v37 = vpop.f32.mrf.mxu1 }
 0x239   :  { %v9920_v34 = vpop.f32.mrf.mxu0 }
 0x23a   :  { %v9922_v24 = vpop.f32.mrf.mxu1 }
 0x23b   :  { %v9924_v2 = vpop.f32.mrf.mxu0 }
 0x23c   :  { %v9926_v47 = vpop.f32.mrf.mxu1 }
 0x23d   :  { %v9928_v55 = vpop.f32.mrf.mxu0 }
 0x23e   :  { %v2926_v9 = vpop.f32.mrf.mxu1 }
 0x23f   :  { %v9930_v51 = vpop.f32.mrf.mxu0 }
 0x240   :  { %v9932_v29 = vpop.f32.mrf.mxu1 }
 0x241   :  { %v9934_v25 = vpop.f32.mrf.mxu0 }
 0x242   :  { %v9936_v50 = vpop.f32.mrf.mxu1 }
 0x243   :  { %v9938_v21 = vpop.f32.mrf.mxu0 }
 0x244   :  { %v9940_v15 = vpop.f32.mrf.mxu1 }
 0x245   :  { %11283 = vst [vmem:[#allocation12_spill] sm:$0xff] %v9940_v15  ;;  %v9942_v60 = vpop.f32.mrf.mxu0 }
 0x246   :  { %11284 = vst [vmem:[#allocation8_spill] sm:$0xff] %v9942_v60  ;;  %v9944_v26 = vpop.f32.mrf.mxu1 }
 0x247   :  { %v9946_v30 = vpop.f32.mrf.mxu0 }
 0x248   :  { %11285 = vst [vmem:[#allocation26_spill] sm:$0xff] %v9946_v30  ;;  %v9948_v42 = vpop.f32.mrf.mxu1 }
 0x249   :  { %11286 = vst [vmem:[#allocation27_spill] sm:$0xff] %v9948_v42  ;;  %v9950_v7 = vpop.f32.mrf.mxu0 }
 0x24a   :  { %11287 = vst [vmem:[#allocation28_spill] sm:$0xff] %v9950_v7  ;;  %v9952_v16 = vpop.f32.mrf.mxu1 }
 0x24b   :  { %11288 = vst [vmem:[#allocation11_spill] sm:$0xff] %v9952_v16  ;;  %v9954_v19 = vpop.f32.mrf.mxu0 }
 0x24c   :  { %11289 = vst [vmem:[#allocation35_spill] sm:$0xff] %v9954_v19  ;;  %v9956_v32 = vpop.f32.mrf.mxu1 }
 0x24d   :  { %11290 = vst [vmem:[#allocation9_spill] sm:$0xff] %v9956_v32  ;;  %v9958_v63 = vpop.f32.mrf.mxu0 }
 0x24e   :  { %11291 = vst [vmem:[#allocation36_spill] sm:$0xff] %v9958_v63  ;;  %v9960_v6 = vpop.f32.mrf.mxu1 }
 0x24f   :  { %v9962_v28 = vpop.f32.mrf.mxu0 }
 0x250   :  { %11292 = vst [vmem:[#allocation10_spill] sm:$0xff] %v9962_v28  ;;  %v9964_v45 = vpop.f32.mrf.mxu1 }
 0x251   :  { %11293 = vst [vmem:[#allocation30_spill] sm:$0xff] %v9964_v45  ;;  %v9966_v52 = vpop.f32.mrf.mxu0 }
 0x252   :  { %11294 = vst [vmem:[#allocation29_spill] sm:$0xff] %v9966_v52  ;;  %v9968_v11 = vpop.f32.mrf.mxu1 }
 0x253   :  { %11295 = vst [vmem:[#allocation31_spill] sm:$0xff] %v9968_v11  ;;  %v9970_v49 = vpop.f32.mrf.mxu0 }
 0x254   :  { %11296 = vst [vmem:[#allocation15_spill] sm:$0xff] %v9970_v49  ;;  %v9972_v18 = vpop.f32.mrf.mxu1 }
 0x255   :  { %11297 = vst [vmem:[#allocation13_spill] sm:$0xff] %v9972_v18  ;;  %v9974_v17 = vpop.f32.mrf.mxu0 }
 0x256   :  { %11298 = vst [vmem:[#allocation17_spill] sm:$0xff] %v9974_v17  ;;  %v9976_v8 = vpop.f32.mrf.mxu1 }
 0x257   :  { %v9978_v35 = vpop.f32.mrf.mxu0 }
 0x258   :  { %11299 = vst [vmem:[#allocation40_spill] sm:$0xff] %v9978_v35  ;;  %v9980_v4 = vpop.f32.mrf.mxu1 }
 0x259   :  { %11300 = vst [vmem:[#allocation32_spill] sm:$0xff] %v9980_v4  ;;  %v9982_v33 = vpop.f32.mrf.mxu0 }
 0x25a   :  { %11301 = vst [vmem:[#allocation33_spill] sm:$0xff] %v9982_v33  ;;  %v9984_v46 = vpop.f32.mrf.mxu1 }
 0x25b   :  { %11302 = vst [vmem:[#allocation34_spill] sm:$0xff] %v9984_v46  ;;  %v9986_v59 = vpop.f32.mrf.mxu0 }
 0x25c   :  { %11303 = vst [vmem:[#allocation14_spill] sm:$0xff] %v9986_v59  ;;  %v3276_v27 = vpop.f32.mrf.mxu1 }
 0x25d   :  { %v9988_v22 = vadd.f32 %v3276_v27, %v2666_v31  ;;  %v9990_v14 = vpop.f32.mrf.mxu0 }
 0x25e   :  { %v3278_v0 = vpop.f32.mrf.mxu1 }
 0x25f   :  { %v9992_v44 = vadd.f32 %v3278_v0, %v2668_v13  ;;  %v9994_v38 = vpop.f32.mrf.mxu0 }
 0x260   :  { %11304 = vst [vmem:[#allocation41_spill] sm:$0xff] %v9994_v38  ;;  %v3280_v54 = vpop.f32.mrf.mxu1 }
 0x261   :  { %v9996_v40 = vadd.f32 %v3280_v54, %v2670_v62  ;;  %v9998_v58 = vpop.f32.mrf.mxu0 }
 0x262   :  { %11305 = vst [vmem:[#allocation16_spill] sm:$0xff] %v9998_v58  ;;  %v3282_v1 = vpop.f32.mrf.mxu1 }
 0x263   :  { %v3319_v33 = vpop.f32.mrf.mxu0 }
 0x264   :  { %v3362_v46 = vpop.f32.mrf.mxu1 }
 0x265   :  { %v3321_v4 = vpop.f32.mrf.mxu0 }
 0x266   :  { %v3364_v59 = vpop.f32.mrf.mxu1 }
 0x267   :  { %v10000_v35 = vadd.f32 %v3364_v59, %v2754_v23  ;;  %v3323_v31 = vpop.f32.mrf.mxu0 }
 0x268   :  { %v3366_v27 = vpop.f32.mrf.mxu1 }
 0x269   :  { %11306 = vst [vmem:[#allocation20_spill] sm:$0xff] %v10000_v35  ;;  %v3325_v17 = vpop.f32.mrf.mxu0 }
 0x26a   :  { %v3368_v18 = vpop.f32.mrf.mxu1 }
 0x26b   :  { %v3405_v13 = vpop.f32.mrf.mxu0 }
 0x26c   :  { %v3448_v0 = vpop.f32.mrf.mxu1 }
 0x26d   :  { %v3407_v49 = vpop.f32.mrf.mxu0 }
 0x26e   :  { %v3450_v38 = vpop.f32.mrf.mxu1 }
 0x26f   :  { %v10002_v11 = vadd.f32 %v3450_v38, %v2840_v36  ;;  %v10004_v62 = vpop.f32.mrf.mxu0 }
 0x270   :  { %v10006_v54 = vpop.f32.mrf.mxu1 }
 0x271   :  { %11307 = vst [vmem:[#allocation38_spill] sm:$0xff] %v10002_v11  ;;  %v10008_v58 = vpop.f32.mrf.mxu0 }
 0x272   :  { %v10010_v52 = vpop.f32.mrf.mxu1 }
 0x273   :  { %v10012_v23 = vpop.f32.mrf.mxu0 }
 0x274   :  { %v10014_v59 = vpop.f32.mrf.mxu1 }
 0x275   :  { %v10016_v45 = vpop.f32.mrf.mxu0 }
 0x276   :  { %v3536_v28 = vpop.f32.mrf.mxu1 }
 0x277   :  { %v10018_v5 = vadd.f32 %v3536_v28, %v2926_v9  ;;  %v10020_v63 = vpop.f32.mrf.mxu0 }
 0x278   :  { %v10022_v36 = vpop.f32.mrf.mxu1 }
 0x279   :  { %11308 = vst [vmem:[#allocation37_spill] sm:$0xff] %v10018_v5  ;;  %v10024_v38 = vpop.f32.mrf.mxu0 }
 0x27a   :  { %v10026_v11 = vpop.f32.mrf.mxu1 }
 0x27b   :  { %v10028_v32 = vpop.f32.mrf.mxu0 }
 0x27c   :  { %v10030_v19 = vpop.f32.mrf.mxu1 }
 0x27d   :  { %11309 = vst [vmem:[#allocation39_spill] sm:$0xff] %v10030_v19  ;;  %v10032_v35 = vpop.f32.mrf.mxu0 }
 0x27e   :  { %11310 = vst [vmem:[#allocation18_spill] sm:$0xff] %v10032_v35  ;;  %v3622_v16 = vpop.f32.mrf.mxu1 }
 0x27f   :  { %v10035_v7 = vadd.f32 %v3622_v16, %v9944_v26  ;;  %v10037_v9 = vpop.f32.mrf.mxu0 }
 0x280   :  { %v10039_v28 = vpop.f32.mrf.mxu1 }
 0x281   :  { %11311 = vst [vmem:[#allocation22_spill] sm:$0xff] %v10035_v7  ;;  %11312 = vst [vmem:[#allocation45_spill] sm:$0xff] %v10039_v28  ;;  %v10041_v5 = vpop.f32.mrf.mxu0 }
 0x282   :  { %11313 = vst [vmem:[#allocation19_spill] sm:$0xff] %v10041_v5  ;;  %v10043_v42 = vpop.f32.mrf.mxu1 }
 0x283   :  { %11314 = vst [vmem:[#allocation42_spill] sm:$0xff] %v10043_v42  ;;  %v10045_v30 = vpop.f32.mrf.mxu0 }
 0x284   :  { %11315 = vst [vmem:[#allocation43_spill] sm:$0xff] %v10045_v30  ;;  %v10047_v60 = vpop.f32.mrf.mxu1 }
 0x285   :  { %11316 = vst [vmem:[#allocation44_spill] sm:$0xff] %v10047_v60  ;;  %v10049_v15 = vpop.f32.mrf.mxu0 }
 0x286   :  { %11317 = vst [vmem:[#allocation21_spill] sm:$0xff] %v10049_v15  ;;  %v3708_v19 = vpop.f32.mrf.mxu1 }
 0x287   :  { %v10052_v35 = vadd.f32 %v3708_v19, %v9960_v6  ;;  %v10054_v26 = vpop.f32.mrf.mxu0 }
 0x288   :  { %11319 = vst [vmem:[#allocation24_spill] sm:$0xff] %v10054_v26  ;;  %v10056_v16 = vpop.f32.mrf.mxu1  ;;  %v3283_v26 = vadd.f32 %v3282_v1, %v9894_v20  ;;  %v3369_v20 = vadd.f32 %v3368_v18, %v9908_v48  ;;  %v10118_v48 = vadd.f32 %v10008_v58, %v9920_v34  ;;  %v10134_v34 = vadd.f32 %v10014_v59, %v9926_v47 }
 0x289   :  { %11318 = vst [vmem:[#allocation23_spill] sm:$0xff] %v10052_v35  ;;  %11320 = vst [vmem:[#allocation49_spill] sm:$0xff] %v10056_v16  ;;  %v10058_v7 = vpop.f32.mrf.mxu0  ;;  %v10150_v47 = vadd.f32 %v10024_v38, %v9934_v25  ;;  %v11340_v38 = vld [vmem:[#allocation19_spill] sm:$0xff] }
 0x28a   :  { %11321 = vst [vmem:[#allocation46_spill] sm:$0xff] %v10058_v7  ;;  %v10060_v28 = vpop.f32.mrf.mxu1 }
 0x28b   :  { %11322 = vst [vmem:[#allocation47_spill] sm:$0xff] %v10060_v28  ;;  %v10062_v5 = vpop.f32.mrf.mxu0  ;;  %v10081_v28 = vpop.permute.xlu1 %4515 }
 0x28c   :  { %11323 = vst [vmem:[#allocation48_spill] sm:$0xff] %v10062_v5  ;;  %v10064_v42 = vpop.f32.mrf.mxu1 }
 0x28d   :  { %11324 = vst [vmem:[#allocation25_spill] sm:$0xff] %v10064_v42  ;;  %v10066_v30 = vpop.f32.mrf.mxu0 }
 0x28e   :  { %11325 = vst [vmem:[#allocation50_spill] sm:$0xff] %v10066_v30  ;;  %v3794_v60 = vpop.f32.mrf.mxu1 }
 0x28f   :  { %v10069_v15 = vadd.f32 %v3794_v60, %v9976_v8  ;;  %v10071_v19 = vpop.f32.mrf.mxu0 }
 0x290   :  { %11327 = vst [vmem:[#allocation52_spill] sm:$0xff] %v10071_v19  ;;  %v10073_v6 = vpop.f32.mrf.mxu1  ;;  %v3367_v19 = vadd.f32 %v3366_v27, %v9904_v56  ;;  %v10110_v56 = vadd.f32 %v10004_v62, %v9916_v53  ;;  %v11334_v27 = vld [vmem:[#allocation8_spill] sm:$0xff] }
 0x291   :  { %11326 = vst [vmem:[#allocation51_spill] sm:$0xff] %v10069_v15  ;;  %11328 = vst [vmem:[#allocation53_spill] sm:$0xff] %v10073_v6  ;;  %v10075_v35 = vpop.f32.mrf.mxu0  ;;  %v3320_v15 = vadd.f32 %v3319_v33, %v9896_v61  ;;  %v10102_v61 = vadd.f32 %v3407_v49, %v9914_v12 }
 0x292   :  { %11329 = vst [vmem:[#allocation54_spill] sm:$0xff] %v10075_v35  ;;  %v10077_v16 = vpop.f32.mrf.mxu1  ;;  %v3363_v35 = vadd.f32 %v3362_v46, %v9898_v10 }
 0x293   :  { %11330 = vst [vmem:[#allocation55_spill] sm:$0xff] %v10077_v16  ;;  %v10079_v7 = vpop.f32.mrf.mxu0  ;;  %v3322_v16 = vadd.f32 %v3321_v4, %v9900_v41  ;;  %v10146_v4 = vadd.f32 %v10022_v36, %v9932_v29  ;;  %v11332_v29 = vld [vmem:[#allocation12_spill] sm:$0xff] }
 0x294   :  { %11331 = vst [vmem:[#allocation56_spill] sm:$0xff] %v10079_v7  ;;  %v3889_v5 = vpop.f32.mrf.mxu1  ;;  %v3324_v7 = vadd.f32 %v3323_v31, %v9902_v39  ;;  %v11339_v36 = vld [vmem:[#allocation28_spill] sm:$0xff] }
 0x295   :  { %v4457_v42 = vadd.f32 %v3889_v5, %v9988_v22  ;;  %v3837_v30 = vpop.f32.mrf.mxu0  ;;  %v3326_v5 = vadd.f32 %v3325_v17, %v9906_v43  ;;  %v10114_v43 = vadd.f32 %v10006_v54, %v9918_v37  ;;  %v11337_v54 = vld [vmem:[#allocation27_spill] sm:$0xff] }
 0x296   :  { %v10086_v60 = vadd.f32 %v3837_v30, %v9990_v14  ;;  %v3891_v8 = vpop.f32.mrf.mxu1  ;;  %v3406_v30 = vadd.f32 %v3405_v13, %v9910_v57  ;;  %v10099_v14 = vadd.f32 %v3448_v0, %v9912_v3  ;;  %v10122_v57 = vadd.f32 %v10010_v52, %v9922_v24  ;;  %v10124_v3 = vpop.permute.xlu1 %4520  ;;  %v11336_v13 = vld [vmem:[#allocation26_spill] sm:$0xff] }
 0x297   :  { %v10092_v6 = vpop.f32.mrf.mxu0  ;;  %v4523_v10 = vadd.f32 %v10081_v28, %v4457_v42  ;;  %v10128_v42 = vadd.f32 %v10012_v23, %v9924_v2  ;;  %v4458_v53 = vadd.f32 %v3891_v8, %v9992_v44  ;;  %v10138_v24 = vadd.f32 %v10016_v45, %v9928_v55  ;;  %v11333_v45 = vld [vmem:[#allocation39_spill] sm:$0xff]  ;;  %v11338_v23 = vld [vmem:[#allocation45_spill] sm:$0xff] }
 0x298   :  { %v3893_v22 = vpop.f32.mrf.mxu1  ;;  %v10142_v52 = vadd.f32 %v10020_v63, %v9930_v51  ;;  %v10154_v55 = vadd.f32 %v10026_v11, %v9936_v50  ;;  %v10158_v51 = vadd.f32 %v10028_v32, %v9938_v21  ;;  %v10162_v58 = vadd.f32 %v11333_v45, %v11332_v29  ;;  %v11335_v50 = vld [vmem:[#allocation18_spill] sm:$0xff] }
 0x299   :  { %v4485_v41 = vadd.f32 %v3893_v22, %v9996_v40  ;;  %v10106_v39 = vpop.f32.mrf.mxu0  ;;  %v4579_v33 = vmax.f32 %v4523_v10, 0.0  ;;  %v10170_v11 = vadd.f32 %v11335_v50, %v11334_v27  ;;  %v10174_v21 = vadd.f32 %v10037_v9, %v11336_v13  ;;  %v11341_v10 = vld [vmem:[#allocation11_spill] sm:$0xff] }
 0x29a   :  { %v3895_v12 = vpop.f32.mrf.mxu1  ;;  %v10179_v59 = vadd.f32 %v11338_v23, %v11337_v54 }
 0x29b   :  { %v4551_v37 = vadd.f32 %v10124_v3, %v4485_v41  ;;  %v4486_v49 = vadd.f32 %v3895_v12, %v3283_v26  ;;  %v3932_v18 = vpop.f32.mrf.mxu0  ;;  %v10183_v26 = vadd.f32 %v11340_v38, %v11339_v36  ;;  %v11342_v41 = vld [vmem:[#allocation42_spill] sm:$0xff]  ;;  %v11347_v38 = vld [vmem:[#allocation44_spill] sm:$0xff] }
 0x29c   :  { %v4459_v2 = vadd.f32 %v3932_v18, %v3320_v15  ;;  %v3975_v17 = vpop.f32.mrf.mxu1  ;;  %v10188_v9 = vadd.f32 %v11342_v41, %v11341_v10  ;;  %v10220_v41 = vld [vmem:[%s11139_s3 + $0x20] sm:$0xff]  }
 0x29d   :  { %v4607_v46 = vmax.f32 %v4551_v37, 0.0  ;;  %v4461_v44 = vadd.f32 %v3975_v17, %v3363_v35  ;;  %v3934_v40 = vpop.f32.mrf.mxu0  ;;  %v4524_v35 = vadd.f32 %v10081_v28, %v4458_v53  ;;  %v4552_v25 = vadd.f32 %v10124_v3, %v4486_v49 }
 0x29e   :  { %v4460_v15 = vadd.f32 %v3934_v40, %v3322_v16  ;;  %v3977_v63 = vpop.f32.mrf.mxu1  ;;  %v4525_v32 = vadd.f32 %v10081_v28, %v4459_v2 }
 0x29f   :  { %v10165_v1 = vpack.c.bf16 %v4607_v46, %v4579_v33  ;;  %v3936_v31 = vpop.f32.mrf.mxu0  ;;  %v4527_v16 = vadd.f32 %v10081_v28, %v4461_v44  ;;  %v4580_v49 = vmax.f32 %v4524_v35, 0.0  ;;  %v4608_v18 = vmax.f32 %v4552_v25, 0.0 }
 0x2a0   :  { %v4487_v0 = vadd.f32 %v3936_v31, %v3324_v7  ;;  %v3979_v62 = vpop.f32.mrf.mxu1  ;;  %v4526_v12 = vadd.f32 %v10081_v28, %v4460_v15  ;;  %v4581_v46 = vmax.f32 %v4525_v32, 0.0  ;;  %v11343_v31 = vld [vmem:[#allocation20_spill] sm:$0xff]  ;;  %v11344_v32 = vld [vmem:[#allocation35_spill] sm:$0xff] }
 0x2a1   :  { %v4489_v8 = vadd.f32 %v3979_v62, %v3367_v19  ;;  %v3938_v22 = vpop.f32.mrf.mxu0  ;;  %v4583_v45 = vmax.f32 %v4527_v16, 0.0  ;;  %v4462_v27 = vadd.f32 %v3977_v63, %v11343_v31  ;;  %v11345_v62 = vld [vmem:[#allocation43_spill] sm:$0xff] }
 0x2a2   :  { %v4553_v7 = vadd.f32 %v10124_v3, %v4487_v0  ;;  %v4488_v53 = vadd.f32 %v3938_v22, %v3326_v5  ;;  %v3981_v37 = vpop.f32.mrf.mxu1  ;;  %v4582_v13 = vmax.f32 %v4526_v12, 0.0  ;;  %v10201_v54 = vadd.f32 %v11345_v62, %v11344_v32 }
 0x2a3   :  { %v4555_v2 = vadd.f32 %v10124_v3, %v4489_v8  ;;  %v4490_v17 = vadd.f32 %v3981_v37, %v3369_v20  ;;  %v4018_v33 = vpop.f32.mrf.mxu0  ;;  %v4528_v12 = vadd.f32 %v10081_v28, %v4462_v27 }
 0x2a4   :  { %v4609_v44 = vmax.f32 %v4553_v7, 0.0  ;;  %v4554_v19 = vadd.f32 %v10124_v3, %v4488_v53  ;;  %v4463_v40 = vadd.f32 %v4018_v33, %v3406_v30  ;;  %v4061_v29 = vpop.f32.mrf.mxu1  ;;  %v10203_v30 = vpack.c.bf16 %v4608_v18, %v4580_v49  ;;  %v11349_v49 = vld [vmem:[#allocation21_spill] sm:$0xff] }
 0x2a5   :  { %v4611_v15 = vmax.f32 %v4555_v2, 0.0  ;;  %v4465_v50 = vadd.f32 %v4061_v29, %v10099_v14  ;;  %v4020_v5 = vpop.f32.mrf.mxu0  ;;  %v4556_v23 = vadd.f32 %v10124_v3, %v4490_v17  ;;  %v11346_v14 = vld [vmem:[#allocation9_spill] sm:$0xff] }
 0x2a6   :  { %v4610_v35 = vmax.f32 %v4554_v19, 0.0  ;;  %v4464_v25 = vadd.f32 %v4020_v5, %v10102_v61  ;;  %v4063_v0 = vpop.f32.mrf.mxu1  ;;  %v10197_v20 = vpack.c.bf16 %v4609_v44, %v4581_v46  ;;  %v10210_v16 = vadd.f32 %v11347_v38, %v11346_v14 }
 0x2a7   :  { %v4022_v63 = vpop.f32.mrf.mxu0  ;;  %v10206_v36 = vpack.c.bf16 %v4611_v15, %v4583_v45  ;;  %v4529_v61 = vadd.f32 %v10081_v28, %v4463_v40  ;;  %v4531_v7 = vadd.f32 %v10081_v28, %v4465_v50  ;;  %v4612_v44 = vmax.f32 %v4556_v23, 0.0 }
 0x2a8   :  { %v10212_v8 = vpack.c.bf16 %v4610_v35, %v4582_v13  ;;  %v4491_v22 = vadd.f32 %v4022_v63, %v10110_v56  ;;  %v4065_v10 = vpop.f32.mrf.mxu1  ;;  %4694 = vmatprep.subr.bf16.mxu1 %v10197_v20  ;;  %v11348_v56 = vld [vmem:[#allocation36_spill] sm:$0xff]  ;;  %v4530_v2 = vadd.f32 %v10081_v28, %v4464_v25 }
 0x2a9   :  { %v4493_v53 = vadd.f32 %v4065_v10, %v10114_v43  ;;  %v4024_v37 = vpop.f32.mrf.mxu0  ;;  %4695 = vmatpush1.bf16.msra.mxu1 %v10203_v30  ;;  %4737 = vmatprep.subr.bf16.mxu0 %v10206_v36  ;;  %v10229_v18 = vadd.f32 %v11349_v49, %v11348_v56  ;;  %v11350_v43 = vld [vmem:[#allocation38_spill] sm:$0xff]  ;;  %v4585_v31 = vmax.f32 %v4529_v61, 0.0  ;;  %v4587_v13 = vmax.f32 %v4531_v7, 0.0 }
 0x2aa   :  { %v4557_v17 = vadd.f32 %v10124_v3, %v4491_v22  ;;  %v4492_v33 = vadd.f32 %v4024_v37, %v10118_v48  ;;  %v4067_v46 = vpop.f32.mrf.mxu1  ;;  %4738 = vmatpush1.bf16.msra.mxu0 %v10212_v8  ;;  %v4466_v19 = vadd.f32 %v4063_v0, %v11350_v43  ;;  %v4584_v48 = vmax.f32 %v4528_v12, 0.0  ;;  %v11352_v10 = vld [vmem:[#allocation10_spill] sm:$0xff]  ;;  %v11353_v12 = vld [vmem:[#allocation24_spill] sm:$0xff]  ;;  %v11356_v43 = vld [vmem:[#allocation29_spill] sm:$0xff] }
 0x2ab   :  { %v4559_v40 = vadd.f32 %v10124_v3, %v4493_v53  ;;  %v4494_v29 = vadd.f32 %v4067_v46, %v10122_v57  ;;  %v4104_v45 = vpop.f32.mrf.mxu0  ;;  %v11351_v57 = vmov 0   ;;  %v4586_v32 = vmax.f32 %v4530_v2, 0.0  ;;  %v11354_v49 = vld [vmem:[#allocation30_spill] sm:$0xff]  ;;  %v11355_v2 = vld [vmem:[#allocation49_spill] sm:$0xff] }
 0x2ac   :  { %v4613_v27 = vmax.f32 %v4557_v17, 0.0  ;;  %v4558_v15 = vadd.f32 %v10124_v3, %v4492_v33  ;;  %v4467_v50 = vadd.f32 %v4104_v45, %v10128_v42  ;;  %v4147_v5 = vpop.f32.mrf.mxu1  ;;  %8172 = vmatmul.mubr.msk.bf16.vlgmr.msra.gmra.mxu1 %vm2628_vm1, %v10220_v41  ;;  %v10250_v14 = vpack.c.bf16 %v4612_v44, %v4584_v48 }
 0x2ad   :  { %v4615_v35 = vmax.f32 %v4559_v40, 0.0  ;;  %v4469_v25 = vadd.f32 %v4147_v5, %v10134_v34  ;;  %v4106_v0 = vpop.f32.mrf.mxu0  ;;  %8173 = vmatmul.mubr.msk.bf16.vlgmr.msra.gmra.mxu0 %vm2628_vm1, %v10220_v41  ;;  %4798 = vmatprep.mubr.bf16.mxu1 %v11351_v57  ;;  %v4532_v38 = vadd.f32 %v10081_v28, %v4466_v19  ;;  %v4560_v34 = vadd.f32 %v10124_v3, %v4494_v29  ;;  %v11357_v19 = vld [vmem:[#allocation46_spill] sm:$0xff] }
 0x2ae   :  { %v4614_v62 = vmax.f32 %v4558_v15, 0.0  ;;  %v4468_v23 = vadd.f32 %v4106_v0, %v10138_v24  ;;  %v4149_v42 = vpop.f32.mrf.mxu1  ;;  %v10247_v63 = vpack.c.bf16 %v4613_v27, %v4585_v31  ;;  %4841 = vmatprep.mubr.bf16.mxu0 %v11351_v57  ;;  %v10258_v7 = vadd.f32 %v11353_v12, %v11352_v10 }
 0x2af   :  { %v4108_v61 = vpop.f32.mrf.mxu0  ;;  %v10254_v22 = vpack.c.bf16 %v4615_v35, %v4587_v13  ;;  %v4533_v24 = vadd.f32 %v10081_v28, %v4467_v50  ;;  %v10267_v17 = vadd.f32 %v11355_v2, %v11354_v49  ;;  %v4535_v33 = vadd.f32 %v10081_v28, %v4469_v25 }
 0x2b0   :  { %v10260_v53 = vpack.c.bf16 %v4614_v62, %v4586_v32  ;;  %v4495_v37 = vadd.f32 %v4108_v61, %v10142_v52  ;;  %v4151_v56 = vpop.f32.mrf.mxu1  ;;  %4780 = vmatprep.subr.bf16.mxu1 %v10247_v63  ;;  %v10275_v40 = vadd.f32 %v11357_v19, %v11356_v43  ;;  %v4534_v52 = vadd.f32 %v10081_v28, %v4468_v23  ;;  %v11358_v32 = vld [vmem:[#allocation37_spill] sm:$0xff] }
 0x2b1   :  { %v4497_v46 = vadd.f32 %v4151_v56, %v10146_v4  ;;  %v4110_v44 = vpop.f32.mrf.mxu0  ;;  %4781 = vmatpush1.bf16.msra.mxu1 %v10250_v14  ;;  %4823 = vmatprep.subr.bf16.mxu0 %v10254_v22  ;;  %v4588_v27 = vmax.f32 %v4532_v38, 0.0  ;;  %v4616_v4 = vmax.f32 %v4560_v34, 0.0  ;;  %v4589_v48 = vmax.f32 %v4533_v24, 0.0  ;;  %v11359_v24 = vld [vmem:[#allocation31_spill] sm:$0xff] }
 0x2b2   :  { %v4561_v29 = vadd.f32 %v10124_v3, %v4495_v37  ;;  %v4496_v45 = vadd.f32 %v4110_v44, %v10150_v47  ;;  %v4153_v31 = vpop.f32.mrf.mxu1  ;;  %4824 = vmatpush1.bf16.msra.mxu0 %v10260_v53  ;;  %v4591_v47 = vmax.f32 %v4535_v33, 0.0  ;;  %v4470_v62 = vadd.f32 %v4149_v42, %v11358_v32  ;;  %v11360_v42 = vld [vmem:[#allocation47_spill] sm:$0xff] }
 0x2b3   :  { %v4563_v15 = vadd.f32 %v10124_v3, %v4497_v46  ;;  %v4498_v50 = vadd.f32 %v4153_v31, %v10154_v55  ;;  %v4190_v5 = vpop.f32.mrf.mxu0  ;;  %v4590_v55 = vmax.f32 %v4534_v52, 0.0  ;;  %v10298_v37 = vadd.f32 %v11360_v42, %v11359_v24  ;;  %v11361_v33 = vld [vmem:[#allocation15_spill] sm:$0xff]  ;;  %v11362_v46 = vld [vmem:[#allocation48_spill] sm:$0xff] }
 0x2b4   :  { %v4617_v13 = vmax.f32 %v4561_v29, 0.0  ;;  %v4562_v35 = vadd.f32 %v10124_v3, %v4496_v45  ;;  %v4471_v25 = vadd.f32 %v4190_v5, %v10158_v51  ;;  %v4233_v0 = vpop.f32.mrf.mxu1  ;;  %8174 = vmatmul.mubr.msk.bf16.vlgmr.msra.gmra.mxu1 %vm2628_vm1, %v10220_v41  ;;  %v10307_v44 = vadd.f32 %v11362_v46, %v11361_v33 }
 0x2b5   :  { %v4619_v23 = vmax.f32 %v4563_v15, 0.0  ;;  %v4473_v38 = vadd.f32 %v4233_v0, %v10162_v58  ;;  %v4192_v34 = vpop.f32.mrf.mxu0  ;;  %8175 = vmatmul.mubr.msk.bf16.vlgmr.msra.gmra.mxu0 %vm2628_vm1, %v10220_v41  ;;  %4884 = vmatprep.mubr.bf16.mxu1 %v11351_v57  ;;  %v10300_v58 = vpack.c.bf16 %v4616_v4, %v4588_v27  ;;  %v4564_v56 = vadd.f32 %v10124_v3, %v4498_v50  ;;  %v11363_v4 = vld [vmem:[#allocation13_spill] sm:$0xff] }
 0x2b6   :  { %v4618_v61 = vmax.f32 %v4562_v35, 0.0  ;;  %v4472_v51 = vadd.f32 %v4192_v34, %v10170_v11  ;;  %v4235_v10 = vpop.f32.mrf.mxu1  ;;  %v10293_v12 = vpack.c.bf16 %v4617_v13, %v4589_v48  ;;  %4927 = vmatprep.mubr.bf16.mxu0 %v11351_v57  ;;  %v4537_v43 = vadd.f32 %v10081_v28, %v4471_v25  ;;  %v11364_v15 = vld [vmem:[#allocation25_spill] sm:$0xff] }
 0x2b7   :  { %v4194_v49 = vpop.f32.mrf.mxu0  ;;  %v10303_v2 = vpack.c.bf16 %v4619_v23, %v4591_v47  ;;  %v4536_v29 = vadd.f32 %v10081_v28, %v4470_v62  ;;  %v4539_v45 = vadd.f32 %v10081_v28, %v4473_v38  ;;  %v10321_v50 = vadd.f32 %v11364_v15, %v11363_v4  ;;  %v11368_v15 = vld [vmem:[#allocation40_spill] sm:$0xff] }
 0x2b8   :  { %v10309_v11 = vpack.c.bf16 %v4618_v61, %v4590_v55  ;;  %v4499_v19 = vadd.f32 %v4194_v49, %v10174_v21  ;;  %v4237_v52 = vpop.f32.mrf.mxu1  ;;  %4866 = vmatprep.subr.bf16.mxu1 %v10293_v12  ;;  %v4538_v21 = vadd.f32 %v10081_v28, %v4472_v51  ;;  %v4620_v35 = vmax.f32 %v4564_v56, 0.0 }
 0x2b9   :  { %v4501_v31 = vadd.f32 %v4237_v52, %v10179_v59  ;;  %v4196_v27 = vpop.f32.mrf.mxu0  ;;  %4867 = vmatpush1.bf16.msra.mxu1 %v10300_v58  ;;  %4909 = vmatprep.subr.bf16.mxu0 %v10303_v2  ;;  %v11365_v59 = vld [vmem:[#allocation22_spill] sm:$0xff]  ;;  %v4593_v62 = vmax.f32 %v4537_v43, 0.0  ;;  %v4595_v61 = vmax.f32 %v4539_v45, 0.0  ;;  %v11366_v52 = vld [vmem:[#allocation17_spill] sm:$0xff] }
 0x2ba   :  { %v4565_v5 = vadd.f32 %v10124_v3, %v4499_v19  ;;  %v4500_v48 = vadd.f32 %v4196_v27, %v10183_v26  ;;  %v4239_v13 = vpop.f32.mrf.mxu1  ;;  %4910 = vmatpush1.bf16.msra.mxu0 %v10309_v11  ;;  %v4474_v25 = vadd.f32 %v4235_v10, %v11365_v59  ;;  %v4592_v26 = vmax.f32 %v4536_v29, 0.0  ;;  %v11367_v29 = vld [vmem:[#allocation50_spill] sm:$0xff]  ;;  %v11370_v59 = vld [vmem:[#allocation32_spill] sm:$0xff] }
 0x2bb   :  { %v4567_v0 = vadd.f32 %v10124_v3, %v4501_v31  ;;  %v4502_v47 = vadd.f32 %v4239_v13, %v10188_v9  ;;  %v4276_v32 = vpop.f32.mrf.mxu0  ;;  %v4594_v9 = vmax.f32 %v4538_v21, 0.0  ;;  %v3752_v45 = vadd.f32 %v11367_v29, %v11366_v52  ;;  %v11369_v21 = vld [vmem:[#allocation52_spill] sm:$0xff] }
 0x2bc   :  { %v4621_v23 = vmax.f32 %v4565_v5, 0.0  ;;  %v4566_v38 = vadd.f32 %v10124_v3, %v4500_v48  ;;  %v4475_v34 = vadd.f32 %v4276_v32, %v10201_v54  ;;  %v4319_v55 = vpop.f32.mrf.mxu1  ;;  %8176 = vmatmul.mubr.msk.bf16.vlgmr.msra.gmra.mxu1 %vm2628_vm1, %v10220_v41  ;;  %v10342_v33 = vpack.c.bf16 %v4620_v35, %v4592_v26 }
 0x2bd   :  { %v4623_v51 = vmax.f32 %v4567_v0, 0.0  ;;  %v4477_v10 = vadd.f32 %v4319_v55, %v10210_v16  ;;  %v4278_v24 = vpop.f32.mrf.mxu0  ;;  %8177 = vmatmul.mubr.msk.bf16.vlgmr.msra.gmra.mxu0 %vm2628_vm1, %v10220_v41  ;;  %4970 = vmatprep.mubr.bf16.mxu1 %v11351_v57  ;;  %v4540_v46 = vadd.f32 %v10081_v28, %v4474_v25  ;;  %v4568_v16 = vadd.f32 %v10124_v3, %v4502_v47  ;;  %v11371_v25 = vld [vmem:[#allocation53_spill] sm:$0xff] }
 0x2be   :  { %v4622_v42 = vmax.f32 %v4566_v38, 0.0  ;;  %v4476_v56 = vadd.f32 %v4278_v24, %v10229_v18  ;;  %v4321_v54 = vpop.f32.mrf.mxu1  ;;  %v10339_v49 = vpack.c.bf16 %v4621_v23, %v4593_v62  ;;  %5013 = vmatprep.mubr.bf16.mxu0 %v11351_v57  ;;  %v4541_v18 = vadd.f32 %v10081_v28, %v4475_v34 }
 0x2bf   :  { %v4280_v43 = vpop.f32.mrf.mxu0  ;;  %v10346_v19 = vpack.c.bf16 %v4623_v51, %v4595_v61  ;;  %v3754_v5 = vadd.f32 %v11369_v21, %v11368_v15  ;;  %v4543_v48 = vadd.f32 %v10081_v28, %v4477_v10  ;;  %v3797_v0 = vadd.f32 %v11371_v25, %v11370_v59 }
 0x2c0   :  { %v10350_v31 = vpack.c.bf16 %v4622_v42, %v4594_v9  ;;  %v4503_v27 = vadd.f32 %v4280_v43, %v10258_v7  ;;  %v4323_v4 = vpop.f32.mrf.mxu1  ;;  %4952 = vmatprep.subr.bf16.mxu1 %v10339_v49  ;;  %v4542_v7 = vadd.f32 %v10081_v28, %v4476_v56  ;;  %v4596_v23 = vmax.f32 %v4540_v46, 0.0  ;;  %v11372_v9 = vld [vmem:[#allocation23_spill] sm:$0xff] }
 0x2c1   :  { %v4505_v13 = vadd.f32 %v4323_v4, %v10267_v17  ;;  %v4282_v35 = vpop.f32.mrf.mxu0  ;;  %4953 = vmatpush1.bf16.msra.mxu1 %v10342_v33  ;;  %4995 = vmatprep.subr.bf16.mxu0 %v10346_v19  ;;  %v4624_v38 = vmax.f32 %v4568_v16, 0.0  ;;  %v4597_v26 = vmax.f32 %v4541_v18, 0.0  ;;  %v4478_v42 = vadd.f32 %v4321_v54, %v11372_v9  ;;  %v11373_v18 = vld [vmem:[#allocation33_spill] sm:$0xff] }
 0x2c2   :  { %v4569_v47 = vadd.f32 %v10124_v3, %v4503_v27  ;;  %v4504_v32 = vadd.f32 %v4282_v35, %v10275_v40  ;;  %v4325_v62 = vpop.f32.mrf.mxu1  ;;  %4996 = vmatpush1.bf16.msra.mxu0 %v10350_v31  ;;  %v4599_v40 = vmax.f32 %v4543_v48, 0.0  ;;  %v11374_v27 = vld [vmem:[#allocation54_spill] sm:$0xff] }
 0x2c3   :  { %v4571_v17 = vadd.f32 %v10124_v3, %v4505_v13  ;;  %v4506_v34 = vadd.f32 %v4325_v62, %v10298_v37  ;;  %v4362_v55 = vpop.f32.mrf.mxu0  ;;  %v4598_v37 = vmax.f32 %v4542_v7, 0.0  ;;  %v3756_v54 = vadd.f32 %v11374_v27, %v11373_v18  ;;  %v11375_v48 = vld [vmem:[#allocation34_spill] sm:$0xff]  ;;  %v11376_v13 = vld [vmem:[#allocation55_spill] sm:$0xff] }
 0x2c4   :  { %v4625_v61 = vmax.f32 %v4569_v47, 0.0  ;;  %v4570_v51 = vadd.f32 %v10124_v3, %v4504_v32  ;;  %v4479_v10 = vadd.f32 %v4362_v55, %v10307_v44  ;;  %v4405_v24 = vpop.f32.mrf.mxu1  ;;  %8178 = vmatmul.mubr.msk.bf16.vlgmr.msra.gmra.mxu1 %vm2628_vm1, %v10220_v41  ;;  %v10383_v4 = vpack.c.bf16 %v4624_v38, %v4596_v23  ;;  %v11377_v38 = vld [vmem:[#allocation14_spill] sm:$0xff] }
 0x2c5   :  { %v4627_v56 = vmax.f32 %v4571_v17, 0.0  ;;  %v4481_v46 = vadd.f32 %v4405_v24, %v10321_v50  ;;  %v4364_v16 = vpop.f32.mrf.mxu0  ;;  %8179 = vmatmul.mubr.msk.bf16.vlgmr.msra.gmra.mxu0 %vm2628_vm1, %v10220_v41  ;;  %5056 = vmatprep.mubr.bf16.mxu1 %v11351_v57  ;;  %v4572_v50 = vadd.f32 %v10124_v3, %v4506_v34  ;;  %v3799_v35 = vadd.f32 %v11376_v13, %v11375_v48  ;;  %v11378_v17 = vld [vmem:[#allocation56_spill] sm:$0xff] }
 0x2c6   :  { %v4626_v43 = vmax.f32 %v4570_v51, 0.0  ;;  %v4480_v52 = vadd.f32 %v4364_v16, %v3752_v45  ;;  %v4407_v44 = vpop.f32.mrf.mxu1  ;;  %v10378_v29 = vpack.c.bf16 %v4625_v61, %v4597_v26  ;;  %5099 = vmatprep.mubr.bf16.mxu0 %v11351_v57  ;;  %v4545_v45 = vadd.f32 %v10081_v28, %v4479_v10  ;;  %v11379_v51 = vld [vmem:[#allocation41_spill] sm:$0xff] }
 0x2c7   :  { %v4366_v15 = vpop.f32.mrf.mxu0  ;;  %v10386_v21 = vpack.c.bf16 %v4627_v56, %v4599_v40  ;;  %v4544_v47 = vadd.f32 %v10081_v28, %v4478_v42  ;;  %v4547_v32 = vadd.f32 %v10081_v28, %v4481_v46  ;;  %v3836_v34 = vadd.f32 %v11378_v17, %v11377_v38 }
 0x2c8   :  { %v10390_v59 = vpack.c.bf16 %v4626_v43, %v4598_v37  ;;  %v4507_v25 = vadd.f32 %v4366_v15, %v3754_v5  ;;  %v4409_v7 = vpop.f32.mrf.mxu1  ;;  %5038 = vmatprep.subr.bf16.mxu1 %v10378_v29  ;;  %v4546_v55 = vadd.f32 %v10081_v28, %v4480_v52  ;;  %v3840_v10 = vadd.f32 %v10092_v6, %v11379_v51  ;;  %v11380_v52 = vld [vmem:[#allocation51_spill] sm:$0xff] }
 0x2c9   :  { %v4509_v62 = vadd.f32 %v4409_v7, %v3797_v0  ;;  %v4368_v23 = vpop.f32.mrf.mxu0  ;;  %5039 = vmatpush1.bf16.msra.mxu1 %v10383_v4  ;;  %5081 = vmatprep.subr.bf16.mxu0 %v10386_v21  ;;  %v4628_v0 = vmax.f32 %v4572_v50, 0.0  ;;  %v4601_v42 = vmax.f32 %v4545_v45, 0.0  ;;  %v4600_v37 = vmax.f32 %v4544_v47, 0.0 }
 0x2ca   :  { %v4573_v5 = vadd.f32 %v10124_v3, %v4507_v25  ;;  %v4508_v26 = vadd.f32 %v4368_v23, %v3756_v54  ;;  %v4411_v61 = vpop.f32.mrf.mxu1  ;;  %5082 = vmatpush1.bf16.msra.mxu0 %v10390_v59  ;;  %v4603_v43 = vmax.f32 %v4547_v32, 0.0  ;;  %v4482_v18 = vadd.f32 %v4407_v44, %v11380_v52 }
 0x2cb   :  { %v4575_v24 = vadd.f32 %v10124_v3, %v4509_v62  ;;  %v4510_v40 = vadd.f32 %v4411_v61, %v3799_v35  ;;  %v4448_v9 = vpop.f32.mrf.mxu0  ;;  %v4602_v6 = vmax.f32 %v4546_v55, 0.0  ;;  %v10419_v13 = vpack.c.bf16 %v4628_v0, %v4600_v37 }
 0x2cc   :  { %v4629_v56 = vmax.f32 %v4573_v5, 0.0  ;;  %v4574_v46 = vadd.f32 %v10124_v3, %v4508_v26  ;;  %v4483_v16 = vadd.f32 %v4448_v9, %v3836_v34  ;;  %8180 = vmatmul.mubr.msk.bf16.vlgmr.msra.gmra.mxu1 %vm2628_vm1, %v10220_v41 }
 0x2cd   :  { %v4631_v27 = vmax.f32 %v4575_v24, 0.0  ;;  %v4450_v54 = vpop.f32.mrf.mxu0  ;;  %8181 = vmatmul.mubr.msk.bf16.vlgmr.msra.gmra.mxu0 %vm2628_vm1, %v10220_v41  ;;  %5142 = vmatprep.mubr.bf16.mxu1 %v11351_v57  ;;  %v4576_v44 = vadd.f32 %v10124_v3, %v4510_v40 }
 0x2ce   :  { %v4630_v50 = vmax.f32 %v4574_v46, 0.0  ;;  %v10414_v15 = vadd.f32 %v4450_v54, %v10086_v60  ;;  %v10416_v48 = vpack.c.bf16 %v4629_v56, %v4601_v42  ;;  %5185 = vmatprep.mubr.bf16.mxu0 %v11351_v57  ;;  %v4549_v7 = vadd.f32 %v10081_v28, %v4483_v16 }
 0x2cf   :  { %v4452_v35 = vpop.f32.mrf.mxu0  ;;  %v10422_v45 = vpack.c.bf16 %v4631_v27, %v4603_v43  ;;  %v4548_v60 = vadd.f32 %v10081_v28, %v4482_v18  ;;  %v4632_v62 = vmax.f32 %v4576_v44, 0.0 }
 0x2d0   :  { %v10424_v25 = vpack.c.bf16 %v4630_v50, %v4602_v6  ;;  %v4511_v47 = vadd.f32 %v4452_v35, %v3840_v10  ;;  %5124 = vmatprep.subr.bf16.mxu1 %v10416_v48  ;;  %v4605_v23 = vmax.f32 %v4549_v7, 0.0 }
 0x2d1   :  { %5125 = vmatpush1.bf16.msra.mxu1 %v10419_v13  ;;  %5167 = vmatprep.subr.bf16.mxu0 %v10422_v45  ;;  %v4604_v17 = vmax.f32 %v4548_v60, 0.0 }
 0x2d2   :  { %v4577_v32 = vadd.f32 %v10124_v3, %v4511_v47  ;;  %5168 = vmatpush1.bf16.msra.mxu0 %v10424_v25 }
 0x2d3   :  { %5261 = vmatprep.subr.bf16.mxu0 %v10203_v30  ;;  %v10443_v55 = vpack.c.bf16 %v4632_v62, %v4604_v17  ;;  %v8542_v30 = vld [vmem:[%s11139_s3 + $0x18] sm:$0xff]  }
 0x2d4   :  { %v4633_v38 = vmax.f32 %v4577_v32, 0.0  ;;  %8182 = vmatmul.mubr.msk.bf16.vlgmr.msra.gmra.mxu1 %vm2628_vm1, %v10220_v41 }
 0x2d5   :  { %8183 = vmatmul.mubr.msk.bf16.vlgmr.msra.gmra.mxu0 %vm2628_vm1, %v10220_v41  ;;  %5228 = vmatprep.mubr.bf16.mxu1 %v11351_v57 }
 0x2d6   :  { %5262 = vmatpush1.bf16.msra.mxu0 %v10165_v1  ;;  %v10440_v34 = vpack.c.bf16 %v4633_v38, %v4605_v23  ;;  %5279 = vmatprep.mubr.bf16.mxu0 %v11351_v57  ;;  %v8543_v1 = vld [vmem:[%s11139_s3 + $0x28] sm:$0xff]  }
 0x2d7   :  { %5347 = vmatprep.subr.bf16.mxu0 %v10250_v14 }
 0x2d8   :  { %5210 = vmatprep.subr.bf16.mxu1 %v10440_v34 }
 0x2d9   :  { %5211 = vmatpush1.bf16.msra.mxu1 %v10443_v55 }
 0x2da   :  { %5304 = vmatprep.subr.bf16.mxu1 %v10212_v8 }
 0x2dc   :  { %8184 = vmatmul.mubr.msk.bf16.vlgmr.msra.gmra.mxu1 %vm2628_vm1, %v10220_v41 }
 0x2dd   :  { %8186 = vmatmul.mubr.msk.bf16.vlgmr.msra.gmra.mxu0 %vm2628_vm1, %v8542_v30  ;;  %5305 = vmatpush1.bf16.msra.mxu1 %v10197_v20 }
 0x2de   :  { %5348 = vmatpush1.bf16.msra.mxu0 %v10206_v36  ;;  %5390 = vmatprep.subr.bf16.mxu1 %v10260_v53 }
 0x2df   :  { %5433 = vmatprep.subr.bf16.mxu0 %v10300_v58  ;;  %5322 = vmatprep.mubr.bf16.mxu1 %v11351_v57 }
 0x2e0   :  { %5365 = vmatprep.mubr.bf16.mxu0 %v11351_v57 }
 0x2e4   :  { %8187 = vmatmul.mubr.msk.bf16.vlgmr.msra.gmra.mxu1 %vm2628_vm1, %v8542_v30 }
 0x2e5   :  { %5391 = vmatpush1.bf16.msra.mxu1 %v10247_v63  ;;  %8188 = vmatmul.mubr.msk.bf16.vlgmr.msra.gmra.mxu0 %vm2628_vm1, %v8542_v30 }
 0x2e6   :  { %5434 = vmatpush1.bf16.msra.mxu0 %v10254_v22  ;;  %5476 = vmatprep.subr.bf16.mxu1 %v10309_v11 }
 0x2e7   :  { %5519 = vmatprep.subr.bf16.mxu0 %v10342_v33  ;;  %5408 = vmatprep.mubr.bf16.mxu1 %v11351_v57 }
 0x2e8   :  { %5451 = vmatprep.mubr.bf16.mxu0 %v11351_v57 }
 0x2ec   :  { %8189 = vmatmul.mubr.msk.bf16.vlgmr.msra.gmra.mxu1 %vm2628_vm1, %v8542_v30 }
 0x2ed   :  { %5477 = vmatpush1.bf16.msra.mxu1 %v10293_v12  ;;  %8190 = vmatmul.mubr.msk.bf16.vlgmr.msra.gmra.mxu0 %vm2628_vm1, %v8542_v30 }
 0x2ee   :  { %5520 = vmatpush1.bf16.msra.mxu0 %v10303_v2  ;;  %5562 = vmatprep.subr.bf16.mxu1 %v10350_v31 }
 0x2ef   :  { %5605 = vmatprep.subr.bf16.mxu0 %v10383_v4  ;;  %5494 = vmatprep.mubr.bf16.mxu1 %v11351_v57 }
 0x2f0   :  { %5537 = vmatprep.mubr.bf16.mxu0 %v11351_v57 }
 0x2f4   :  { %8191 = vmatmul.mubr.msk.bf16.vlgmr.msra.gmra.mxu1 %vm2628_vm1, %v8542_v30 }
 0x2f5   :  { %5563 = vmatpush1.bf16.msra.mxu1 %v10339_v49  ;;  %8192 = vmatmul.mubr.msk.bf16.vlgmr.msra.gmra.mxu0 %vm2628_vm1, %v8542_v30 }
 0x2f6   :  { %5606 = vmatpush1.bf16.msra.mxu0 %v10346_v19  ;;  %5648 = vmatprep.subr.bf16.mxu1 %v10390_v59 }
 0x2f7   :  { %5691 = vmatprep.subr.bf16.mxu0 %v10419_v13  ;;  %5580 = vmatprep.mubr.bf16.mxu1 %v11351_v57 }
 0x2f8   :  { %5623 = vmatprep.mubr.bf16.mxu0 %v11351_v57 }
 0x2fc   :  { %8193 = vmatmul.mubr.msk.bf16.vlgmr.msra.gmra.mxu1 %vm2628_vm1, %v8542_v30 }
 0x2fd   :  { %5649 = vmatpush1.bf16.msra.mxu1 %v10378_v29  ;;  %8194 = vmatmul.mubr.msk.bf16.vlgmr.msra.gmra.mxu0 %vm2628_vm1, %v8542_v30 }
 0x2fe   :  { %5692 = vmatpush1.bf16.msra.mxu0 %v10386_v21  ;;  %5734 = vmatprep.subr.bf16.mxu1 %v10424_v25 }
 0x2ff   :  { %5777 = vmatprep.subr.bf16.mxu0 %v10443_v55  ;;  %5666 = vmatprep.mubr.bf16.mxu1 %v11351_v57 }
 0x300   :  { %5709 = vmatprep.mubr.bf16.mxu0 %v11351_v57 }
 0x304   :  { %8195 = vmatmul.mubr.msk.bf16.vlgmr.msra.gmra.mxu1 %vm2628_vm1, %v8542_v30 }
 0x305   :  { %5735 = vmatpush1.bf16.msra.mxu1 %v10416_v48  ;;  %8196 = vmatmul.mubr.msk.bf16.vlgmr.msra.gmra.mxu0 %vm2628_vm1, %v8542_v30 }
 0x306   :  { %5778 = vmatpush1.bf16.msra.mxu0 %v10422_v45  ;;  %5831 = vmatprep.subr.bf16.mxu1 %v10212_v8 }
 0x307   :  { %5874 = vmatprep.subr.bf16.mxu0 %v10250_v14  ;;  %5752 = vmatprep.mubr.bf16.mxu1 %v11351_v57 }
 0x308   :  { %5795 = vmatprep.mubr.bf16.mxu0 %v11351_v57 }
 0x30c   :  { %8197 = vmatmul.mubr.msk.bf16.vlgmr.msra.gmra.mxu1 %vm2628_vm1, %v8542_v30 }
 0x30d   :  { %5832 = vmatpush1.bf16.msra.mxu1 %v10197_v20  ;;  %8198 = vmatmul.mubr.msk.bf16.vlgmr.msra.gmra.mxu0 %vm2628_vm1, %v8542_v30  ;;  %v4454_v20 = vpop.f32.mrf.mxu0 }
 0x30e   :  { %5875 = vmatpush1.bf16.msra.mxu0 %v10206_v36  ;;  %5917 = vmatprep.subr.bf16.mxu1 %v10260_v53  ;;  %v11381_v36 = vld [vmem:[#allocation16_spill] sm:$0xff] }
 0x30f   :  { %5960 = vmatprep.subr.bf16.mxu0 %v10300_v58  ;;  %5849 = vmatprep.mubr.bf16.mxu1 %v11351_v57  ;;  %v3842_v8 = vadd.f32 %v10106_v39, %v11381_v36  ;;  %v4550_v39 = vadd.f32 %v10081_v28, %v10414_v15  ;;  %v11170_v28 = vmov 0.0  }
 0x310   :  { %5892 = vmatprep.mubr.bf16.mxu0 %v11351_v57 }
 0x311   :  { %v4512_v41 = vadd.f32 %v4454_v20, %v3842_v8 }
 0x314   :  { %8202 = vmatmul.mubr.msk.bf16.vlgmr.msra.gmra.mxu1 %vm2628_vm1, %v8543_v1 }
 0x315   :  { %5918 = vmatpush1.bf16.msra.mxu1 %v10247_v63  ;;  %8203 = vmatmul.mubr.msk.bf16.vlgmr.msra.gmra.mxu0 %vm2628_vm1, %v8543_v1  ;;  %v4578_v63 = vadd.f32 %v10124_v3, %v4512_v41  ;;  %v4606_v3 = vmax.f32 %v4550_v39, 0.0 }
 0x316   :  { %5961 = vmatpush1.bf16.msra.mxu0 %v10254_v22  ;;  %6003 = vmatprep.subr.bf16.mxu1 %v10309_v11 }
 0x317   :  { %6046 = vmatprep.subr.bf16.mxu0 %v10342_v33  ;;  %5935 = vmatprep.mubr.bf16.mxu1 %v11351_v57  ;;  %v4634_v14 = vmax.f32 %v4578_v63, 0.0 }
 0x318   :  { %5978 = vmatprep.mubr.bf16.mxu0 %v11351_v57 }
 0x319   :  { %v4662_v22 = vpack.c.bf16 %v4634_v14, %v4606_v3 }
 0x31c   :  { %8204 = vmatmul.mubr.msk.bf16.vlgmr.msra.gmra.mxu1 %vm2628_vm1, %v8543_v1 }
 0x31d   :  { %6004 = vmatpush1.bf16.msra.mxu1 %v10293_v12  ;;  %8205 = vmatmul.mubr.msk.bf16.vlgmr.msra.gmra.mxu0 %vm2628_vm1, %v8543_v1 }
 0x31e   :  { %6047 = vmatpush1.bf16.msra.mxu0 %v10303_v2  ;;  %6089 = vmatprep.subr.bf16.mxu1 %v10350_v31 }
 0x31f   :  { %6132 = vmatprep.subr.bf16.mxu0 %v10383_v4  ;;  %6021 = vmatprep.mubr.bf16.mxu1 %v11351_v57 }
 0x320   :  { %6064 = vmatprep.mubr.bf16.mxu0 %v11351_v57 }
 0x324   :  { %8206 = vmatmul.mubr.msk.bf16.vlgmr.msra.gmra.mxu1 %vm2628_vm1, %v8543_v1 }
 0x325   :  { %6090 = vmatpush1.bf16.msra.mxu1 %v10339_v49  ;;  %8207 = vmatmul.mubr.msk.bf16.vlgmr.msra.gmra.mxu0 %vm2628_vm1, %v8543_v1 }
 0x326   :  { %6133 = vmatpush1.bf16.msra.mxu0 %v10346_v19  ;;  %6175 = vmatprep.subr.bf16.mxu1 %v10390_v59 }
 0x327   :  { %6218 = vmatprep.subr.bf16.mxu0 %v10419_v13  ;;  %6107 = vmatprep.mubr.bf16.mxu1 %v11351_v57 }
 0x328   :  { %6150 = vmatprep.mubr.bf16.mxu0 %v11351_v57 }
 0x32c   :  { %8208 = vmatmul.mubr.msk.bf16.vlgmr.msra.gmra.mxu1 %vm2628_vm1, %v8543_v1 }
 0x32d   :  { %6176 = vmatpush1.bf16.msra.mxu1 %v10378_v29  ;;  %8209 = vmatmul.mubr.msk.bf16.vlgmr.msra.gmra.mxu0 %vm2628_vm1, %v8543_v1 }
 0x32e   :  { %6219 = vmatpush1.bf16.msra.mxu0 %v10386_v21  ;;  %6261 = vmatprep.subr.bf16.mxu1 %v10424_v25 }
 0x32f   :  { %6304 = vmatprep.subr.bf16.mxu0 %v10443_v55  ;;  %6193 = vmatprep.mubr.bf16.mxu1 %v11351_v57 }
 0x330   :  { %6236 = vmatprep.mubr.bf16.mxu0 %v11351_v57 }
 0x334   :  { %8210 = vmatmul.mubr.msk.bf16.vlgmr.msra.gmra.mxu1 %vm2628_vm1, %v8543_v1 }
 0x335   :  { %6262 = vmatpush1.bf16.msra.mxu1 %v10416_v48  ;;  %8211 = vmatmul.mubr.msk.bf16.vlgmr.msra.gmra.mxu0 %vm2628_vm1, %v8543_v1 }
 0x336   :  { %6305 = vmatpush1.bf16.msra.mxu0 %v10422_v45  ;;  %6347 = vmatprep.subr.bf16.mxu1 %v4662_v22 }
 0x337   :  { %6279 = vmatprep.mubr.bf16.mxu1 %v11351_v57  ;;  %6322 = vmatprep.mubr.bf16.mxu0 %v11351_v57 }
 0x338   :  { %8369 = vmatprep.subr.bf16.mxu0 %v11170_v28 }
 0x33c   :  { %8212 = vmatmul.mubr.msk.bf16.vlgmr.msra.gmra.mxu1 %vm2628_vm1, %v8543_v1 }
 0x33d   :  { %6348 = vmatpush1.bf16.msra.mxu1 %v10440_v34  ;;  %8213 = vmatmul.mubr.msk.bf16.vlgmr.msra.gmra.mxu0 %vm2628_vm1, %v8543_v1 }
 0x33e   :  { %6365 = vmatprep.mubr.bf16.mxu1 %v11351_v57  ;;  %8375 = vmatprep.subr.bf16.mxu1 %v11170_v28 }
 0x33f   :  { %8371 = vmatprep.mubr.msk.bf16.mxu0 %vm8619_vm2, %v11170_v28 }
 0x344   :  { %8214 = vmatmul.mubr.msk.bf16.vlgmr.msra.gmra.mxu1 %vm2628_vm1, %v8543_v1 }
 0x345   :  { %8377 = vmatprep.mubr.msk.bf16.mxu1 %vm8619_vm2, %v11170_v28 }
 0x36c   :  { %v10566_v53 = vpop.f32.mrf.mxu1 }
 0x36d   :  { %v10568_v12 = vpop.f32.mrf.mxu0 }
 0x36e   :  { %v10570_v58 = vpop.f32.mrf.mxu1 }
 0x36f   :  { %v10572_v57 = vpop.f32.mrf.mxu0 }
 0x370   :  { %v10574_v2 = vpop.f32.mrf.mxu1 }
 0x371   :  { %v10576_v11 = vpop.f32.mrf.mxu0 }
 0x372   :  { %v10578_v49 = vpop.f32.mrf.mxu1 }
 0x373   :  { %v10580_v33 = vpop.f32.mrf.mxu0 }
 0x374   :  { %v10582_v19 = vpop.f32.mrf.mxu1 }
 0x375   :  { %v4843_v31 = vpop.f32.mrf.mxu0 }
 0x376   :  { %v10584_v29 = vpop.f32.mrf.mxu1 }
 0x377   :  { %v10586_v4 = vpop.f32.mrf.mxu0 }
 0x378   :  { %11382 = vst [vmem:[#allocation12_spill] sm:$0xff] %v10586_v4  ;;  %v10588_v21 = vpop.f32.mrf.mxu1 }
 0x379   :  { %11383 = vst [vmem:[#allocation39_spill] sm:$0xff] %v10588_v21  ;;  %v10590_v59 = vpop.f32.mrf.mxu0 }
 0x37a   :  { %11384 = vst [vmem:[#allocation8_spill] sm:$0xff] %v10590_v59  ;;  %v10592_v5 = vpop.f32.mrf.mxu1 }
 0x37b   :  { %11385 = vst [vmem:[#allocation18_spill] sm:$0xff] %v10592_v5  ;;  %v10594_v26 = vpop.f32.mrf.mxu0 }
 0x37c   :  { %11386 = vst [vmem:[#allocation26_spill] sm:$0xff] %v10594_v26  ;;  %v4886_v61 = vpop.f32.mrf.mxu1 }
 0x37d   :  { %v4929_v51 = vpop.f32.mrf.mxu0 }
 0x37e   :  { %v4888_v10 = vpop.f32.mrf.mxu1 }
 0x37f   :  { %v4931_v0 = vpop.f32.mrf.mxu0 }
 0x380   :  { %v4890_v24 = vpop.f32.mrf.mxu1 }
 0x381   :  { %v10596_v40 = vpop.f32.mrf.mxu0 }
 0x382   :  { %v10598_v9 = vpop.f32.mrf.mxu1 }
 0x383   :  { %11387 = vst [vmem:[#allocation27_spill] sm:$0xff] %v10598_v9  ;;  %v10600_v42 = vpop.f32.mrf.mxu0 }
 0x384   :  { %11388 = vst [vmem:[#allocation45_spill] sm:$0xff] %v10600_v42  ;;  %v4972_v56 = vpop.f32.mrf.mxu1 }
 0x385   :  { %v10602_v46 = vpop.f32.mrf.mxu0 }
 0x386   :  { %v4974_v16 = vpop.f32.mrf.mxu1 }
 0x387   :  { %v10604_v37 = vpop.f32.mrf.mxu0 }
 0x388   :  { %v4976_v43 = vpop.f32.mrf.mxu1 }
 0x389   :  { %v10606_v52 = vpop.f32.mrf.mxu0 }
 0x38a   :  { %v10608_v18 = vpop.f32.mrf.mxu1 }
 0x38b   :  { %11389 = vst [vmem:[#allocation28_spill] sm:$0xff] %v10608_v18  ;;  %v10610_v27 = vpop.f32.mrf.mxu0 }
 0x38c   :  { %11390 = vst [vmem:[#allocation19_spill] sm:$0xff] %v10610_v27  ;;  %v5058_v54 = vpop.f32.mrf.mxu1 }
 0x38d   :  { %v10612_v6 = vpop.f32.mrf.mxu0 }
 0x38e   :  { %v10614_v50 = vpop.f32.mrf.mxu1 }
 0x38f   :  { %v10616_v15 = vpop.f32.mrf.mxu0 }
 0x390   :  { %v10618_v48 = vpop.f32.mrf.mxu1 }
 0x391   :  { %v10620_v13 = vpop.f32.mrf.mxu0 }
 0x392   :  { %v10622_v44 = vpop.f32.mrf.mxu1 }
 0x393   :  { %11391 = vst [vmem:[#allocation11_spill] sm:$0xff] %v10622_v44  ;;  %v10624_v35 = vpop.f32.mrf.mxu0 }
 0x394   :  { %v10626_v45 = vpop.f32.mrf.mxu1 }
 0x395   :  { %v10628_v25 = vpop.f32.mrf.mxu0 }
 0x396   :  { %v10630_v7 = vpop.f32.mrf.mxu1 }
 0x397   :  { %v10632_v47 = vpop.f32.mrf.mxu0 }
 0x398   :  { %v10634_v60 = vpop.f32.mrf.mxu1 }
 0x399   :  { %v10636_v32 = vpop.f32.mrf.mxu0 }
 0x39a   :  { %v10638_v62 = vpop.f32.mrf.mxu1 }
 0x39b   :  { %v10640_v23 = vpop.f32.mrf.mxu0 }
 0x39c   :  { %v10642_v38 = vpop.f32.mrf.mxu1 }
 0x39d   :  { %v10644_v17 = vpop.f32.mrf.mxu0 }
 0x39e   :  { %v10646_v34 = vpop.f32.mrf.mxu1 }
 0x39f   :  { %v10648_v55 = vpop.f32.mrf.mxu0 }
 0x3a0   :  { %v10650_v30 = vpop.f32.mrf.mxu1 }
 0x3a1   :  { %v10652_v1 = vpop.f32.mrf.mxu0 }
 0x3a2   :  { %v10654_v20 = vpop.f32.mrf.mxu1 }
 0x3a3   :  { %v10656_v36 = vpop.f32.mrf.mxu0 }
 0x3a4   :  { %v10658_v8 = vpop.f32.mrf.mxu1 }
 0x3a5   :  { %v10660_v41 = vpop.f32.mrf.mxu0 }
 0x3a6   :  { %v10662_v63 = vpop.f32.mrf.mxu1 }
 0x3a7   :  { %v10664_v39 = vpop.f32.mrf.mxu0 }
 0x3a8   :  { %11392 = vst [vmem:[#allocation42_spill] sm:$0xff] %v10664_v39  ;;  %v10666_v14 = vpop.f32.mrf.mxu1 }
 0x3a9   :  { %v10668_v3 = vpop.f32.mrf.mxu0 }
 0x3aa   :  { %11393 = vst [vmem:[#allocation20_spill] sm:$0xff] %v10668_v3  ;;  %v10670_v22 = vpop.f32.mrf.mxu1 }
 0x3ab   :  { %v10672_v28 = vpop.f32.mrf.mxu0 }
 0x3ac   :  { %11394 = vst [vmem:[#allocation35_spill] sm:$0xff] %v10672_v28  ;;  %v5410_v44 = vpop.f32.mrf.mxu1 }
 0x3ad   :  { %v10674_v27 = vadd.f32 %v5410_v44, %v4843_v31  ;;  %v5453_v18 = vpop.f32.mrf.mxu0 }
 0x3ae   :  { %v10676_v42 = vadd.f32 %v5453_v18, %v4886_v61  ;;  %v10678_v9 = vpop.f32.mrf.mxu1 }
 0x3af   :  { %11395 = vst [vmem:[#allocation43_spill] sm:$0xff] %v10678_v9  ;;  %v5455_v4 = vpop.f32.mrf.mxu0 }
 0x3b0   :  { %v10680_v26 = vadd.f32 %v5455_v4, %v4888_v10  ;;  %v10682_v5 = vpop.f32.mrf.mxu1 }
 0x3b1   :  { %v5457_v59 = vpop.f32.mrf.mxu0 }
 0x3b2   :  { %11396 = vst [vmem:[#allocation9_spill] sm:$0xff] %v10680_v26  ;;  %v10684_v21 = vadd.f32 %v5457_v59, %v4890_v24  ;;  %v10686_v3 = vpop.f32.mrf.mxu1 }
 0x3b3   :  { %v10688_v39 = vpop.f32.mrf.mxu0 }
 0x3b4   :  { %11397 = vst [vmem:[#allocation44_spill] sm:$0xff] %v10684_v21  ;;  %11398 = vst [vmem:[#allocation36_spill] sm:$0xff] %v10688_v39  ;;  %v5496_v28 = vpop.f32.mrf.mxu1 }
 0x3b5   :  { %v10690_v31 = vadd.f32 %v5496_v28, %v4929_v51  ;;  %v5539_v44 = vpop.f32.mrf.mxu0 }
 0x3b6   :  { %v10692_v61 = vadd.f32 %v5539_v44, %v4972_v56  ;;  %v5498_v18 = vpop.f32.mrf.mxu1 }
 0x3b7   :  { %v10694_v9 = vadd.f32 %v5498_v18, %v4931_v0  ;;  %v5541_v4 = vpop.f32.mrf.mxu0 }
 0x3b8   :  { %v10696_v10 = vadd.f32 %v5541_v4, %v4974_v16  ;;  %v5500_v26 = vpop.f32.mrf.mxu1 }
 0x3b9   :  { %v10699_v59 = vadd.f32 %v5500_v26, %v10596_v40  ;;  %v5543_v24 = vpop.f32.mrf.mxu0 }
 0x3ba   :  { %v10701_v21 = vadd.f32 %v5543_v24, %v4976_v43  ;;  %v10703_v39 = vpop.f32.mrf.mxu1 }
 0x3bb   :  { %v10705_v28 = vpop.f32.mrf.mxu0 }
 0x3bc   :  { %11399 = vst [vmem:[#allocation21_spill] sm:$0xff] %v10701_v21  ;;  %v5582_v51 = vpop.f32.mrf.mxu1 }
 0x3bd   :  { %v10708_v56 = vadd.f32 %v5582_v51, %v10602_v46  ;;  %v5625_v0 = vpop.f32.mrf.mxu0 }
 0x3be   :  { %v10710_v44 = vadd.f32 %v5625_v0, %v5058_v54  ;;  %v5584_v16 = vpop.f32.mrf.mxu1 }
 0x3bf   :  { %v10713_v18 = vadd.f32 %v5584_v16, %v10604_v37  ;;  %v5627_v26 = vpop.f32.mrf.mxu0 }
 0x3c0   :  { %v10716_v40 = vadd.f32 %v5627_v26, %v10614_v50  ;;  %v5586_v43 = vpop.f32.mrf.mxu1 }
 0x3c1   :  { %v10719_v4 = vadd.f32 %v5586_v43, %v10606_v52  ;;  %v5629_v24 = vpop.f32.mrf.mxu0 }
 0x3c2   :  { %v10722_v21 = vadd.f32 %v5629_v24, %v10618_v48  ;;  %v10724_v46 = vpop.f32.mrf.mxu1 }
 0x3c3   :  { %v10726_v54 = vpop.f32.mrf.mxu0 }
 0x3c4   :  { %11400 = vst [vmem:[#allocation38_spill] sm:$0xff] %v10722_v21  ;;  %v5668_v51 = vpop.f32.mrf.mxu1 }
 0x3c5   :  { %v10729_v37 = vadd.f32 %v5668_v51, %v10612_v6  ;;  %v5711_v0 = vpop.f32.mrf.mxu0 }
 0x3c6   :  { %v10732_v50 = vadd.f32 %v5711_v0, %v10626_v45  ;;  %v5670_v16 = vpop.f32.mrf.mxu1 }
 0x3c7   :  { %v10735_v52 = vadd.f32 %v5670_v16, %v10616_v15  ;;  %v5713_v26 = vpop.f32.mrf.mxu0 }
 0x3c8   :  { %v10738_v48 = vadd.f32 %v5713_v26, %v10630_v7  ;;  %v5672_v43 = vpop.f32.mrf.mxu1 }
 0x3c9   :  { %v10741_v24 = vadd.f32 %v5672_v43, %v10620_v13  ;;  %v5715_v21 = vpop.f32.mrf.mxu0 }
 0x3ca   :  { %v10744_v6 = vadd.f32 %v5715_v21, %v10634_v60  ;;  %v5674_v51 = vpop.f32.mrf.mxu1 }
 0x3cb   :  { %v10747_v45 = vadd.f32 %v5674_v51, %v10624_v35  ;;  %v5717_v0 = vpop.f32.mrf.mxu0 }
 0x3cc   :  { %v10750_v15 = vadd.f32 %v5717_v0, %v10638_v62  ;;  %v5754_v16 = vpop.f32.mrf.mxu1 }
 0x3cd   :  { %v10753_v7 = vadd.f32 %v5754_v16, %v10628_v25  ;;  %v5797_v26 = vpop.f32.mrf.mxu0 }
 0x3ce   :  { %v10756_v13 = vadd.f32 %v5797_v26, %v10642_v38  ;;  %v5756_v43 = vpop.f32.mrf.mxu1  ;;  %v5282_v38 = vadd.f32 %v10644_v17, %v10566_v53 }
 0x3cf   :  { %v10759_v21 = vadd.f32 %v5756_v43, %v10632_v47  ;;  %v5799_v60 = vpop.f32.mrf.mxu0 }
 0x3d0   :  { %v10762_v35 = vadd.f32 %v5799_v60, %v10646_v34  ;;  %v5758_v51 = vpop.f32.mrf.mxu1  ;;  %v5325_v34 = vadd.f32 %v10658_v8, %v10568_v12  ;;  %v5284_v60 = vadd.f32 %v10648_v55, %v10570_v58  ;;  %v10786_v12 = vpop.permute.xlu0 %6430  ;;  %v5288_v58 = vadd.f32 %v10656_v36, %v10578_v49 }
 0x3d1   :  { %v10765_v62 = vadd.f32 %v5758_v51, %v10636_v32  ;;  %v5801_v0 = vpop.f32.mrf.mxu0 }
 0x3d2   :  { %v10768_v25 = vadd.f32 %v5801_v0, %v10650_v30  ;;  %v5760_v16 = vpop.f32.mrf.mxu1  ;;  %v5327_v0 = vadd.f32 %v10662_v63, %v10572_v57 }
 0x3d3   :  { %v10773_v26 = vadd.f32 %v5760_v16, %v10640_v23  ;;  %v5803_v47 = vpop.f32.mrf.mxu0  ;;  %v5286_v23 = vadd.f32 %v10652_v1, %v10574_v2  ;;  %v5368_v2 = vadd.f32 %v10660_v41, %v10582_v19  ;;  %v5331_v1 = vadd.f32 %v10670_v22, %v10580_v33 }
 0x3d4   :  { %11401 = vst [vmem:[#allocation10_spill] sm:$0xff] %v10768_v25  ;;  %v10778_v43 = vadd.f32 %v5803_v47, %v10654_v20  ;;  %v5851_v32 = vpop.f32.mrf.mxu1  ;;  %v5329_v20 = vadd.f32 %v10666_v14, %v10576_v11 }
 0x3d5   :  { %v6376_v30 = vadd.f32 %v5851_v32, %v5282_v38  ;;  %v5894_v51 = vpop.f32.mrf.mxu0  ;;  %v10793_v38 = vpop.permute.xlu1 %6435 }
 0x3d6   :  { %v6378_v53 = vadd.f32 %v5894_v51, %v5325_v34  ;;  %v5853_v17 = vpop.f32.mrf.mxu1  ;;  %v11403_v51 = vld [vmem:[#allocation39_spill] sm:$0xff] }
 0x3d7   :  { %v6377_v16 = vadd.f32 %v5853_v17, %v5284_v60  ;;  %v5896_v25 = vpop.f32.mrf.mxu0  ;;  %v6438_v55 = vadd.f32 %v10786_v12, %v6376_v30 }
 0x3d8   :  { %v6379_v8 = vadd.f32 %v5896_v25, %v5327_v0  ;;  %v5855_v47 = vpop.f32.mrf.mxu1  ;;  %v6440_v34 = vadd.f32 %v10786_v12, %v6378_v53  ;;  %v11402_v25 = vld [vmem:[#allocation42_spill] sm:$0xff]  ;;  %v11404_v0 = vld [vmem:[#allocation20_spill] sm:$0xff] }
 0x3d9   :  { %v6402_v57 = vadd.f32 %v5855_v47, %v5286_v23  ;;  %v5898_v63 = vpop.f32.mrf.mxu0  ;;  %v5370_v32 = vadd.f32 %v11402_v25, %v10584_v29  ;;  %v6439_v49 = vadd.f32 %v10786_v12, %v6377_v16  ;;  %v5372_v17 = vadd.f32 %v11404_v0, %v11403_v51 }
 0x3da   :  { %v6404_v11 = vadd.f32 %v5898_v63, %v5329_v20  ;;  %v5857_v14 = vpop.f32.mrf.mxu1  ;;  %v6441_v19 = vadd.f32 %v10786_v12, %v6379_v8  ;;  %v6490_v53 = vmax.f32 %v6438_v55, 0.0  ;;  %v6492_v16 = vmax.f32 %v6440_v34, 0.0  ;;  %v8544_v34 = vld [vmem:[%s11141_s5] sm:$0xff]  }
 0x3db   :  { %v6464_v36 = vadd.f32 %v10793_v38, %v6402_v57  ;;  %v6403_v60 = vadd.f32 %v5857_v14, %v5288_v58  ;;  %v5900_v30 = vpop.f32.mrf.mxu0  ;;  %v6491_v25 = vmax.f32 %v6439_v49, 0.0 }
 0x3dc   :  { %v6466_v33 = vadd.f32 %v10793_v38, %v6404_v11  ;;  %v6405_v41 = vadd.f32 %v5900_v30, %v5331_v1  ;;  %v5937_v22 = vpop.f32.mrf.mxu1  ;;  %v11405_v1 = vld [vmem:[#allocation8_spill] sm:$0xff] }
 0x3dd   :  { %v6516_v23 = vmax.f32 %v6464_v36, 0.0  ;;  %v6465_v20 = vadd.f32 %v10793_v38, %v6403_v60  ;;  %v6380_v29 = vadd.f32 %v5937_v22, %v5368_v2  ;;  %v5980_v47 = vpop.f32.mrf.mxu0  ;;  %v5415_v55 = vadd.f32 %v10682_v5, %v11405_v1 }
 0x3de   :  { %v6518_v63 = vmax.f32 %v6466_v33, 0.0  ;;  %v6467_v58 = vadd.f32 %v10793_v38, %v6405_v41  ;;  %v6382_v57 = vadd.f32 %v5980_v47, %v10674_v27  ;;  %v5939_v14 = vpop.f32.mrf.mxu1  ;;  %v6493_v36 = vmax.f32 %v6441_v19, 0.0  ;;  %v11406_v33 = vld [vmem:[#allocation18_spill] sm:$0xff]  ;;  %v11407_v41 = vld [vmem:[#allocation35_spill] sm:$0xff] }
 0x3df   :  { %v6542_v51 = vpack.c.bf16 %v6516_v23, %v6490_v53  ;;  %v6517_v8 = vmax.f32 %v6465_v20, 0.0  ;;  %v6381_v0 = vadd.f32 %v5939_v14, %v5370_v32  ;;  %v5982_v11 = vpop.f32.mrf.mxu0  ;;  %v5374_v27 = vadd.f32 %v11407_v41, %v11406_v33 }
 0x3e0   :  { %v6544_v30 = vpack.c.bf16 %v6518_v63, %v6492_v16  ;;  %v6519_v60 = vmax.f32 %v6467_v58, 0.0  ;;  %v5941_v2 = vpop.f32.mrf.mxu1  ;;  %v6442_v49 = vadd.f32 %v10786_v12, %v6380_v29  ;;  %v6444_v5 = vadd.f32 %v10786_v12, %v6382_v57  ;;  %v8545_v16 = vld [vmem:[%s11141_s5 + $0x8] sm:$0xff]  }
 0x3e1   :  { %v6543_v22 = vpack.c.bf16 %v6517_v8, %v6491_v25  ;;  %v6406_v53 = vadd.f32 %v5941_v2, %v5372_v17  ;;  %v5984_v32 = vpop.f32.mrf.mxu0  ;;  %8376 = vmatpush3.bf16.msra.mxu1 %v6542_v51  ;;  %v11408_v47 = vmov 0.0   ;;  %v6443_v63 = vadd.f32 %v10786_v12, %v6381_v0  ;;  %v11409_v17 = vld [vmem:[#allocation26_spill] sm:$0xff] }
 0x3e2   :  { %v6545_v23 = vpack.c.bf16 %v6519_v60, %v6493_v36  ;;  %v6408_v19 = vadd.f32 %v5984_v32, %v5415_v55  ;;  %v5943_v20 = vpop.f32.mrf.mxu1  ;;  %8387 = vmatprep.subr.bf16.mxu1 %v11408_v47  ;;  %v5417_v25 = vadd.f32 %v10686_v3, %v11409_v17  ;;  %v6494_v8 = vmax.f32 %v6442_v49, 0.0  ;;  %v11410_v60 = vld [vmem:[#allocation12_spill] sm:$0xff]  ;;  %v11411_v3 = vld [vmem:[#allocation43_spill] sm:$0xff] }
 0x3e3   :  { %v6468_v58 = vadd.f32 %v10793_v38, %v6406_v53  ;;  %v6407_v14 = vadd.f32 %v5943_v20, %v5374_v27  ;;  %v5986_v29 = vpop.f32.mrf.mxu0  ;;  %8370 = vmatpush3.bf16.msra.mxu0 %v6543_v22  ;;  %v5413_v2 = vadd.f32 %v11411_v3, %v11410_v60  ;;  %v6496_v33 = vmax.f32 %v6444_v5, 0.0  ;;  %v8546_v20 = vld [vmem:[%s11141_s5 + $0x18] sm:$0xff]   ;;  %v11417_v60 = vld [vmem:[#allocation19_spill] sm:$0xff] }
 0x3e4   :  { %v6470_v57 = vadd.f32 %v10793_v38, %v6408_v19  ;;  %v6023_v51 = vpop.f32.mrf.mxu1  ;;  %8378 = vmatmul.mubr.msk.bf16.vlgmr.msra.gmra.mxu1 %vm2628_vm1, %v8544_v34  ;;  %8381 = vmatprep.subr.bf16.mxu0 %v11408_v47  ;;  %v6495_v22 = vmax.f32 %v6443_v63, 0.0  ;;  %v6409_v53 = vadd.f32 %v5986_v29, %v5417_v25  ;;  %v11413_v63 = vld [vmem:[#allocation36_spill] sm:$0xff]  ;;  %v11415_v25 = vld [vmem:[#allocation45_spill] sm:$0xff] }
 0x3e5   :  { %v6520_v1 = vmax.f32 %v6468_v58, 0.0  ;;  %v6469_v55 = vadd.f32 %v10793_v38, %v6407_v14  ;;  %v6384_v0 = vadd.f32 %v6023_v51, %v10676_v42  ;;  %v6066_v36 = vpop.f32.mrf.mxu0  ;;  %8388 = vmatpush3.bf16.msra.mxu1 %v6545_v23  ;;  %8389 = vmatprep.mubr.msk.bf16.mxu1 %vm8619_vm2, %v11408_v47  ;;  %v6383_v23 = vadd.f32 %v5982_v11, %v5413_v2  ;;  %v11414_v29 = vld [vmem:[#allocation44_spill] sm:$0xff] }
 0x3e6   :  { %v6522_v41 = vmax.f32 %v6470_v57, 0.0  ;;  %v6386_v34 = vadd.f32 %v6066_v36, %v10690_v31  ;;  %v6025_v27 = vpop.f32.mrf.mxu1  ;;  %8372 = vmatmul.mubr.msk.bf16.vlgmr.msra.gmra.mxu0 %vm2628_vm1, %v8545_v16  ;;  %8399 = vmatprep.subr.bf16.mxu1 %v11408_v47  ;;  %v11412_v16 = vld [vmem:[#allocation27_spill] sm:$0xff]  ;;  %v5503_v57 = vadd.f32 %v10703_v39, %v11415_v25  ;;  %v8547_v36 = vld [vmem:[%s11141_s5 + $0x10] sm:$0xff]   ;;  %v6471_v3 = vadd.f32 %v10793_v38, %v6409_v53 }
 0x3e7   :  { %v6546_v49 = vpack.c.bf16 %v6520_v1, %v6494_v8  ;;  %v6521_v42 = vmax.f32 %v6469_v55, 0.0  ;;  %v6068_v32 = vpop.f32.mrf.mxu0  ;;  %8382 = vmatpush3.bf16.msra.mxu0 %v6544_v30  ;;  %8383 = vmatprep.mubr.msk.bf16.mxu0 %vm8619_vm2, %v11408_v47  ;;  %v5460_v58 = vadd.f32 %v11413_v63, %v11412_v16  ;;  %v6446_v30 = vadd.f32 %v10786_v12, %v6384_v0 }
 0x3e8   :  { %v10842_v19 = vpack.c.bf16 %v6522_v41, %v6496_v33  ;;  %v6387_v5 = vadd.f32 %v6068_v32, %v10694_v9  ;;  %v6027_v31 = vpop.f32.mrf.mxu1  ;;  %8393 = vmatprep.subr.bf16.mxu0 %v11408_v47  ;;  %v11416_v9 = vld [vmem:[#allocation28_spill] sm:$0xff]  ;;  %v6448_v8 = vadd.f32 %v10786_v12, %v6386_v34  ;;  %v5589_v0 = vadd.f32 %v10724_v46, %v11417_v60  ;;  %v11418_v32 = vld [vmem:[#allocation9_spill] sm:$0xff] }
 0x3e9   :  { %v6547_v14 = vpack.c.bf16 %v6521_v42, %v6495_v22  ;;  %v6410_v17 = vadd.f32 %v6027_v31, %v11414_v29  ;;  %v6070_v11 = vpop.f32.mrf.mxu0  ;;  %v5546_v51 = vadd.f32 %v10705_v28, %v11416_v9  ;;  %v6445_v28 = vadd.f32 %v10786_v12, %v6383_v23  ;;  %v8548_v9 = vld [vmem:[%s11141_s5 + $0x28] sm:$0xff]  }
 0x3ea   :  { %v6412_v1 = vadd.f32 %v6070_v11, %v10699_v59  ;;  %v6029_v55 = vpop.f32.mrf.mxu1  ;;  %v6449_v2 = vadd.f32 %v10786_v12, %v6387_v5  ;;  %v6498_v42 = vmax.f32 %v6446_v30, 0.0  ;;  %v6385_v31 = vadd.f32 %v6025_v27, %v11418_v32 }
 0x3eb   :  { %v6472_v39 = vadd.f32 %v10793_v38, %v6410_v17  ;;  %v6072_v33 = vpop.f32.mrf.mxu0  ;;  %v6411_v59 = vadd.f32 %v6029_v55, %v5460_v58  ;;  %v6500_v16 = vmax.f32 %v6448_v8, 0.0  ;;  %v6523_v27 = vmax.f32 %v6471_v3, 0.0  ;;  %v11420_v55 = vld [vmem:[#allocation21_spill] sm:$0xff] }
 0x3ec   :  { %v6474_v41 = vadd.f32 %v10793_v38, %v6412_v1  ;;  %v6413_v34 = vadd.f32 %v6072_v33, %v5503_v57  ;;  %v6109_v22 = vpop.f32.mrf.mxu1  ;;  %8390 = vmatmul.mubr.msk.bf16.vlgmr.msra.gmra.mxu1 %vm2628_vm1, %v8546_v20  ;;  %v6501_v20 = vmax.f32 %v6449_v2, 0.0  ;;  %v6497_v8 = vmax.f32 %v6445_v28, 0.0 }
 0x3ed   :  { %v6524_v46 = vmax.f32 %v6472_v39, 0.0  ;;  %v6388_v53 = vadd.f32 %v6109_v22, %v10692_v61  ;;  %8400 = vmatpush3.bf16.msra.mxu1 %v6547_v14  ;;  %v6152_v5 = vpop.f32.mrf.mxu0  ;;  %8401 = vmatprep.mubr.msk.bf16.mxu1 %vm8619_vm2, %v11408_v47  ;;  %v6447_v3 = vadd.f32 %v10786_v12, %v6385_v31 }
 0x3ee   :  { %v6526_v23 = vmax.f32 %v6474_v41, 0.0  ;;  %v6475_v63 = vadd.f32 %v10793_v38, %v6413_v34  ;;  %v6390_v58 = vadd.f32 %v6152_v5, %v10708_v56  ;;  %v6111_v29 = vpop.f32.mrf.mxu1  ;;  %8384 = vmatmul.mubr.msk.bf16.vlgmr.msra.gmra.mxu0 %vm2628_vm1, %v8547_v36  ;;  %8411 = vmatprep.subr.bf16.mxu1 %v11408_v47  ;;  %v10886_v56 = vadd.f32 %v10793_v38, %v6411_v59 }
 0x3ef   :  { %v10878_v30 = vpack.c.bf16 %v6524_v46, %v6498_v42  ;;  %v6389_v61 = vadd.f32 %v6111_v29, %v10696_v10  ;;  %8394 = vmatpush3.bf16.msra.mxu0 %v6546_v49  ;;  %v6154_v14 = vpop.f32.mrf.mxu0  ;;  %8395 = vmatprep.mubr.msk.bf16.mxu0 %vm8619_vm2, %v11408_v47  ;;  %v11419_v10 = vld [vmem:[#allocation11_spill] sm:$0xff]  ;;  %v6450_v1 = vadd.f32 %v10786_v12, %v6388_v53 }
 0x3f0   :  { %v10883_v17 = vpack.c.bf16 %v6526_v23, %v6500_v16  ;;  %v6527_v11 = vmax.f32 %v6475_v63, 0.0  ;;  %v6391_v25 = vadd.f32 %v6154_v14, %v10713_v18  ;;  %v6113_v57 = vpop.f32.mrf.mxu1  ;;  %8405 = vmatprep.subr.bf16.mxu0 %v11408_v47  ;;  %v10895_v49 = vadd.f32 %v10726_v54, %v11419_v10  ;;  %v8549_v54 = vld [vmem:[%s11141_s5 + $0x20] sm:$0xff]   ;;  %v8550_v10 = vld [vmem:[%s11141_s5 + $0x38] sm:$0xff]  }
 0x3f1   :  { %v6414_v36 = vadd.f32 %v6113_v57, %v11420_v55  ;;  %v6156_v60 = vpop.f32.mrf.mxu0  ;;  %v6452_v2 = vadd.f32 %v10786_v12, %v6390_v58  ;;  %v6549_v41 = vpack.c.bf16 %v6523_v27, %v6497_v8  ;;  %v6451_v28 = vadd.f32 %v10786_v12, %v6389_v61 }
 0x3f2   :  { %v10900_v18 = vpack.c.bf16 %v6527_v11, %v6501_v20  ;;  %v6416_v39 = vadd.f32 %v6156_v60, %v10719_v4  ;;  %v6115_v33 = vpop.f32.mrf.mxu1  ;;  %v6525_v42 = vmax.f32 %v10886_v56, 0.0  ;;  %v6453_v32 = vadd.f32 %v10786_v12, %v6391_v25 }
 0x3f3   :  { %v6476_v59 = vadd.f32 %v10793_v38, %v6414_v36  ;;  %v6415_v34 = vadd.f32 %v6115_v33, %v5546_v51  ;;  %v6158_v22 = vpop.f32.mrf.mxu0  ;;  %v6502_v53 = vmax.f32 %v6450_v1, 0.0  ;;  %v6504_v51 = vmax.f32 %v6452_v2, 0.0  ;;  %v11421_v1 = vld [vmem:[#allocation38_spill] sm:$0xff]  ;;  %v8551_v33 = vld [vmem:[%s11141_s5 + $0x30] sm:$0xff]  }
 0x3f4   :  { %v6478_v31 = vadd.f32 %v10793_v38, %v6416_v39  ;;  %v6417_v46 = vadd.f32 %v6158_v22, %v5589_v0  ;;  %v6195_v4 = vpop.f32.mrf.mxu1  ;;  %8402 = vmatmul.mubr.msk.bf16.vlgmr.msra.gmra.mxu1 %vm2628_vm1, %v8548_v9  ;;  %v6503_v20 = vmax.f32 %v6451_v28, 0.0  ;;  %v6505_v11 = vmax.f32 %v6453_v32, 0.0 }
 0x3f5   :  { %v6528_v5 = vmax.f32 %v6476_v59, 0.0  ;;  %v6477_v16 = vadd.f32 %v10793_v38, %v6415_v34  ;;  %v6392_v23 = vadd.f32 %v6195_v4, %v10710_v44  ;;  %8412 = vmatpush3.bf16.msra.mxu1 %v6549_v41  ;;  %v6238_v63 = vpop.f32.mrf.mxu0  ;;  %8413 = vmatprep.mubr.msk.bf16.mxu1 %vm8619_vm2, %v11408_v47 }
 0x3f6   :  { %v6530_v58 = vmax.f32 %v6478_v31, 0.0  ;;  %v6479_v29 = vadd.f32 %v10793_v38, %v6417_v46  ;;  %v6394_v0 = vadd.f32 %v6238_v63, %v10729_v37  ;;  %v6197_v27 = vpop.f32.mrf.mxu1  ;;  %8396 = vmatmul.mubr.msk.bf16.vlgmr.msra.gmra.mxu0 %vm2628_vm1, %v8549_v54  ;;  %8423 = vmatprep.subr.bf16.mxu1 %v11408_v47 }
 0x3f7   :  { %v10921_v61 = vpack.c.bf16 %v6528_v5, %v6502_v53  ;;  %v6529_v44 = vmax.f32 %v6477_v16, 0.0  ;;  %v6393_v14 = vadd.f32 %v6197_v27, %v10716_v40  ;;  %8406 = vmatpush3.bf16.msra.mxu0 %v10842_v19  ;;  %v6240_v56 = vpop.f32.mrf.mxu0  ;;  %8407 = vmatprep.mubr.msk.bf16.mxu0 %vm8619_vm2, %v11408_v47  ;;  %v6499_v40 = vmax.f32 %v6447_v3, 0.0 }
 0x3f8   :  { %v10927_v25 = vpack.c.bf16 %v6530_v58, %v6504_v51  ;;  %v6531_v37 = vmax.f32 %v6479_v29, 0.0  ;;  %v6395_v57 = vadd.f32 %v6240_v56, %v10735_v52  ;;  %v6199_v9 = vpop.f32.mrf.mxu1  ;;  %8417 = vmatprep.subr.bf16.mxu0 %v11408_v47  ;;  %v6454_v19 = vadd.f32 %v10786_v12, %v6392_v23 }
 0x3f9   :  { %v10934_v8 = vpack.c.bf16 %v6529_v44, %v6503_v20  ;;  %v6418_v55 = vadd.f32 %v6199_v9, %v11421_v1  ;;  %v6242_v36 = vpop.f32.mrf.mxu0  ;;  %v6456_v2 = vadd.f32 %v10786_v12, %v6394_v0  ;;  %v6551_v54 = vpack.c.bf16 %v6525_v42, %v6499_v40 }
 0x3fa   :  { %v10938_v60 = vpack.c.bf16 %v6531_v37, %v6505_v11  ;;  %v6420_v52 = vadd.f32 %v6242_v36, %v10741_v24  ;;  %v6201_v39 = vpop.f32.mrf.mxu1  ;;  %v6455_v3 = vadd.f32 %v10786_v12, %v6393_v14  ;;  %v6457_v34 = vadd.f32 %v10786_v12, %v6395_v57  ;;  %v8552_v14 = vld [vmem:[%s11141_s5 + $0x48] sm:$0xff]  }
 0x3fb   :  { %v6480_v41 = vadd.f32 %v10793_v38, %v6418_v55  ;;  %v6419_v28 = vadd.f32 %v6201_v39, %v10895_v49  ;;  %v6244_v59 = vpop.f32.mrf.mxu0  ;;  %v6506_v31 = vmax.f32 %v6454_v19, 0.0  ;;  %v6508_v49 = vmax.f32 %v6456_v2, 0.0 }
 0x3fc   :  { %v6482_v22 = vadd.f32 %v10793_v38, %v6420_v52  ;;  %v6421_v32 = vadd.f32 %v6244_v59, %v10747_v45  ;;  %v6281_v24 = vpop.f32.mrf.mxu1  ;;  %8414 = vmatmul.mubr.msk.bf16.vlgmr.msra.gmra.mxu1 %vm2628_vm1, %v8550_v10  ;;  %v6507_v63 = vmax.f32 %v6455_v3, 0.0  ;;  %v6509_v0 = vmax.f32 %v6457_v34, 0.0  ;;  %v8553_v10 = vld [vmem:[%s11141_s5 + $0x40] sm:$0xff]  }
 0x3fd   :  { %v6532_v46 = vmax.f32 %v6480_v41, 0.0  ;;  %v6481_v42 = vadd.f32 %v10793_v38, %v6419_v28  ;;  %v6396_v4 = vadd.f32 %v6281_v24, %v10732_v50  ;;  %8424 = vmatpush3.bf16.msra.mxu1 %v6551_v54  ;;  %v6324_v53 = vpop.f32.mrf.mxu0  ;;  %8425 = vmatprep.mubr.msk.bf16.mxu1 %vm8619_vm2, %v11408_v47 }
 0x3fe   :  { %v6534_v5 = vmax.f32 %v6482_v22, 0.0  ;;  %v6483_v16 = vadd.f32 %v10793_v38, %v6421_v32  ;;  %v6398_v45 = vadd.f32 %v6324_v53, %v10753_v7  ;;  %v6283_v23 = vpop.f32.mrf.mxu1  ;;  %8408 = vmatmul.mubr.msk.bf16.vlgmr.msra.gmra.mxu0 %vm2628_vm1, %v8551_v33  ;;  %8435 = vmatprep.subr.bf16.mxu1 %v11408_v47 }
 0x3ff   :  { %v10960_v51 = vpack.c.bf16 %v6532_v46, %v6506_v31  ;;  %v6533_v50 = vmax.f32 %v6481_v42, 0.0  ;;  %v6397_v58 = vadd.f32 %v6283_v23, %v10738_v48  ;;  %8418 = vmatpush3.bf16.msra.mxu0 %v10878_v30  ;;  %v6326_v29 = vpop.f32.mrf.mxu0  ;;  %8419 = vmatprep.mubr.msk.bf16.mxu0 %vm8619_vm2, %v11408_v47  ;;  %v6458_v30 = vadd.f32 %v10786_v12, %v6396_v4  ;;  %v8554_v31 = vld [vmem:[%s11141_s5 + $0x58] sm:$0xff]  }
 0x400   :  { %v10966_v27 = vpack.c.bf16 %v6534_v5, %v6508_v49  ;;  %v6535_v7 = vmax.f32 %v6483_v16, 0.0  ;;  %v6399_v20 = vadd.f32 %v6326_v29, %v10759_v21  ;;  %v6285_v44 = vpop.f32.mrf.mxu1  ;;  %8429 = vmatprep.subr.bf16.mxu0 %v11408_v47  ;;  %v6460_v57 = vadd.f32 %v10786_v12, %v6398_v45  ;;  %v8555_v49 = vld [vmem:[%s11141_s5 + $0x50] sm:$0xff]  }
 0x401   :  { %v10973_v48 = vpack.c.bf16 %v6533_v50, %v6507_v63  ;;  %v6422_v56 = vadd.f32 %v6285_v44, %v10744_v6  ;;  %v6328_v11 = vpop.f32.mrf.mxu0  ;;  %v6459_v40 = vadd.f32 %v10786_v12, %v6397_v58  ;;  %v8566_v44 = vld [vmem:[%s11141_s5 + $0xb8] sm:$0xff]  }
 0x402   :  { %v10977_v37 = vpack.c.bf16 %v6535_v7, %v6509_v0  ;;  %v6424_v21 = vadd.f32 %v6328_v11, %v10765_v62  ;;  %v6287_v9 = vpop.f32.mrf.mxu1  ;;  %v6461_v6 = vadd.f32 %v10786_v12, %v6399_v20  ;;  %v6510_v62 = vmax.f32 %v6458_v30, 0.0  ;;  %v8561_v0 = vld [vmem:[%s11141_s5 + $0x80] sm:$0xff]   ;;  %v8563_v7 = vld [vmem:[%s11141_s5 + $0x90] sm:$0xff]  }
 0x403   :  { %v6484_v19 = vadd.f32 %v10793_v38, %v6422_v56  ;;  %v6423_v1 = vadd.f32 %v6287_v9, %v10750_v15  ;;  %v6330_v55 = vpop.f32.mrf.mxu0  ;;  %v6512_v15 = vmax.f32 %v6460_v57, 0.0  ;;  %v8565_v20 = vld [vmem:[%s11141_s5 + $0xa0] sm:$0xff]  }
 0x404   :  { %v6486_v36 = vadd.f32 %v10793_v38, %v6424_v21  ;;  %v6425_v2 = vadd.f32 %v6330_v55, %v10773_v26  ;;  %v6367_v52 = vpop.f32.mrf.mxu1  ;;  %8426 = vmatmul.mubr.msk.bf16.vlgmr.msra.gmra.mxu1 %vm2628_vm1, %v8552_v14  ;;  %v6511_v26 = vmax.f32 %v6459_v40, 0.0  ;;  %v8567_v14 = vld [vmem:[%s11141_s5 + $0xb0] sm:$0xff]   ;;  %v8568_v30 = vld [vmem:[%s11141_s5 + $0xc0] sm:$0xff]  }
 0x405   :  { %v6536_v39 = vmax.f32 %v6484_v19, 0.0  ;;  %v6485_v33 = vadd.f32 %v10793_v38, %v6423_v1  ;;  %v6400_v54 = vadd.f32 %v6367_v52, %v10756_v13  ;;  %8436 = vmatpush3.bf16.msra.mxu1 %v10900_v18  ;;  %8437 = vmatprep.mubr.msk.bf16.mxu1 %vm8619_vm2, %v11408_v47  ;;  %v6513_v18 = vmax.f32 %v6461_v6, 0.0 }
 0x406   :  { %v6538_v3 = vmax.f32 %v6486_v36, 0.0  ;;  %v6487_v41 = vadd.f32 %v10793_v38, %v6425_v2  ;;  %v6369_v28 = vpop.f32.mrf.mxu1  ;;  %8420 = vmatmul.mubr.msk.bf16.vlgmr.msra.gmra.mxu0 %vm2628_vm1, %v8553_v10  ;;  %8447 = vmatprep.subr.bf16.mxu1 %v11408_v47 }
 0x407   :  { %v10999_v59 = vpack.c.bf16 %v6536_v39, %v6510_v62  ;;  %v6537_v34 = vmax.f32 %v6485_v33, 0.0  ;;  %v6401_v13 = vadd.f32 %v6369_v28, %v10762_v35  ;;  %8430 = vmatpush3.bf16.msra.mxu0 %v10883_v17  ;;  %8431 = vmatprep.mubr.msk.bf16.mxu0 %vm8619_vm2, %v11408_v47  ;;  %v6462_v42 = vadd.f32 %v10786_v12, %v6400_v54  ;;  %v11422_v35 = vld [vmem:[#allocation10_spill] sm:$0xff] }
 0x408   :  { %v11005_v22 = vpack.c.bf16 %v6538_v3, %v6512_v15  ;;  %v6539_v32 = vmax.f32 %v6487_v41, 0.0  ;;  %v6371_v24 = vpop.f32.mrf.mxu1  ;;  %8441 = vmatprep.subr.bf16.mxu0 %v11408_v47 }
 0x409   :  { %v6563_v46 = vpack.c.bf16 %v6537_v34, %v6511_v26  ;;  %v6426_v4 = vadd.f32 %v6371_v24, %v11422_v35  ;;  %v6463_v5 = vadd.f32 %v10786_v12, %v6401_v13  ;;  %v6514_v23 = vmax.f32 %v6462_v42, 0.0 }
 0x40a   :  { %v11013_v17 = vpack.c.bf16 %v6539_v32, %v6513_v18  ;;  %v6373_v53 = vpop.f32.mrf.mxu1 }
 0x40b   :  { %v6488_v16 = vadd.f32 %v10793_v38, %v6426_v4  ;;  %v6427_v45 = vadd.f32 %v6373_v53, %v10778_v43  ;;  %v6515_v12 = vmax.f32 %v6463_v5, 0.0  ;;  %v8556_v43 = vld [vmem:[%s11141_s5 + $0x68] sm:$0xff]  }
 0x40c   :  { %8438 = vmatmul.mubr.msk.bf16.vlgmr.msra.gmra.mxu1 %vm2628_vm1, %v8554_v31 }
 0x40d   :  { %v6540_v63 = vmax.f32 %v6488_v16, 0.0  ;;  %v6489_v50 = vadd.f32 %v10793_v38, %v6427_v45  ;;  %8448 = vmatpush3.bf16.msra.mxu1 %v10934_v8  ;;  %8449 = vmatprep.mubr.msk.bf16.mxu1 %vm8619_vm2, %v11408_v47  ;;  %v8557_v8 = vld [vmem:[%s11141_s5 + $0x60] sm:$0xff]  }
 0x40e   :  { %8432 = vmatmul.mubr.msk.bf16.vlgmr.msra.gmra.mxu0 %vm2628_vm1, %v8555_v49  ;;  %8459 = vmatprep.subr.bf16.mxu1 %v11408_v47 }
 0x40f   :  { %v6566_v58 = vpack.c.bf16 %v6540_v63, %v6514_v23  ;;  %v6541_v29 = vmax.f32 %v6489_v50, 0.0  ;;  %8442 = vmatpush3.bf16.msra.mxu0 %v10921_v61  ;;  %8443 = vmatprep.mubr.msk.bf16.mxu0 %vm8619_vm2, %v11408_v47  ;;  %v8558_v61 = vld [vmem:[%s11141_s5 + $0x78] sm:$0xff]  }
 0x410   :  { %8453 = vmatprep.subr.bf16.mxu0 %v11408_v47 }
 0x411   :  { %v6567_v38 = vpack.c.bf16 %v6541_v29, %v6515_v12 }
 0x414   :  { %8450 = vmatmul.mubr.msk.bf16.vlgmr.msra.gmra.mxu1 %vm2628_vm1, %v8556_v43 }
 0x415   :  { %8460 = vmatpush3.bf16.msra.mxu1 %v10938_v60  ;;  %8461 = vmatprep.mubr.msk.bf16.mxu1 %vm8619_vm2, %v11408_v47  ;;  %v8559_v60 = vld [vmem:[%s11141_s5 + $0x70] sm:$0xff]  }
 0x416   :  { %8444 = vmatmul.mubr.msk.bf16.vlgmr.msra.gmra.mxu0 %vm2628_vm1, %v8557_v8  ;;  %8471 = vmatprep.subr.bf16.mxu1 %v11408_v47 }
 0x417   :  { %8454 = vmatpush3.bf16.msra.mxu0 %v10927_v25  ;;  %8455 = vmatprep.mubr.msk.bf16.mxu0 %vm8619_vm2, %v11408_v47  ;;  %v8560_v25 = vld [vmem:[%s11141_s5 + $0x88] sm:$0xff]  }
 0x418   :  { %8465 = vmatprep.subr.bf16.mxu0 %v11408_v47 }
 0x41c   :  { %8462 = vmatmul.mubr.msk.bf16.vlgmr.msra.gmra.mxu1 %vm2628_vm1, %v8558_v61 }
 0x41d   :  { %8472 = vmatpush3.bf16.msra.mxu1 %v10973_v48  ;;  %8473 = vmatprep.mubr.msk.bf16.mxu1 %vm8619_vm2, %v11408_v47  ;;  %v8569_v48 = vld [vmem:[%s11141_s5 + $0xc8] sm:$0xff]  }
 0x41e   :  { %8456 = vmatmul.mubr.msk.bf16.vlgmr.msra.gmra.mxu0 %vm2628_vm1, %v8559_v60  ;;  %8483 = vmatprep.subr.bf16.mxu1 %v11408_v47 }
 0x41f   :  { %8466 = vmatpush3.bf16.msra.mxu0 %v10960_v51  ;;  %8467 = vmatprep.mubr.msk.bf16.mxu0 %vm8619_vm2, %v11408_v47  ;;  %v8562_v51 = vld [vmem:[%s11141_s5 + $0x98] sm:$0xff]  }
 0x420   :  { %8477 = vmatprep.subr.bf16.mxu0 %v11408_v47 }
 0x424   :  { %8474 = vmatmul.mubr.msk.bf16.vlgmr.msra.gmra.mxu1 %vm2628_vm1, %v8560_v25 }
 0x425   :  { %8484 = vmatpush3.bf16.msra.mxu1 %v10977_v37  ;;  %8485 = vmatprep.mubr.msk.bf16.mxu1 %vm8619_vm2, %v11408_v47 }
 0x426   :  { %8468 = vmatmul.mubr.msk.bf16.vlgmr.msra.gmra.mxu0 %vm2628_vm1, %v8561_v0  ;;  %8495 = vmatprep.subr.bf16.mxu1 %v11408_v47 }
 0x427   :  { %8478 = vmatpush3.bf16.msra.mxu0 %v10966_v27  ;;  %8479 = vmatprep.mubr.msk.bf16.mxu0 %vm8619_vm2, %v11408_v47  ;;  %v8564_v27 = vld [vmem:[%s11141_s5 + $0xa8] sm:$0xff]   ;;  %s8620_s5 = smov [#allocation5]  }
 0x428   :  { %8489 = vmatprep.subr.bf16.mxu0 %v11408_v47  ;;  %s7988_s10 = sshll.u32 %s8620_s5, 4  ;;  %s7989_s10 = int_to_ptr.vmem [resolvable:$true] %s7988_s10 }
 0x429   :  { %s8590_s11 = scalar_lea.vmem %s7989_s10, 256  ;;  %p8595_p6 = scmp.lt.s32.totalorder %s7989_s10, %s7989_s10 }
 0x42a   :  { %p8591_p5 = scmp.ne.s32.totalorder %s7989_s10, %s8590_s11  ;;  %p8596_p7 = scmp.lt.s32.totalorder %s8590_s11, %s8590_s11 }
 0x42c   :  { %8486 = vmatmul.mubr.msk.bf16.vlgmr.msra.gmra.mxu1 %vm2628_vm1, %v8562_v51  ;;  %p8597_p8 = por %p8596_p7, %p8595_p6 }
 0x42d   :  { %8496 = vmatpush3.bf16.msra.mxu1 %v6563_v46  ;;  %8497 = vmatprep.mubr.msk.bf16.mxu1 %vm8619_vm2, %v11408_v47 }
 0x42e   :  { %8480 = vmatmul.mubr.msk.bf16.vlgmr.msra.gmra.mxu0 %vm2628_vm1, %v8563_v7  ;;  %8507 = vmatprep.subr.bf16.mxu1 %v11408_v47  ;;  %p8598_p9 = pnand %p8597_p8, %p8591_p5 }
 0x42f   :  { %8490 = vmatpush3.bf16.msra.mxu0 %v10999_v59  ;;  %8491 = vmatprep.mubr.msk.bf16.mxu0 %vm8619_vm2, %v11408_v47 }
 0x430   :  { %8501 = vmatprep.subr.bf16.mxu0 %v11408_v47 }
 0x434   :  { %8498 = vmatmul.mubr.msk.bf16.vlgmr.msra.gmra.mxu1 %vm2628_vm1, %v8564_v27 }
 0x435   :  { %8508 = vmatpush3.bf16.msra.mxu1 %v11013_v17  ;;  %8509 = vmatprep.mubr.msk.bf16.mxu1 %vm8619_vm2, %v11408_v47 }
 0x436   :  { %8492 = vmatmul.mubr.msk.bf16.vlgmr.msra.gmra.mxu0 %vm2628_vm1, %v8565_v20  ;;  %8519 = vmatprep.subr.bf16.mxu1 %v11408_v47 }
 0x437   :  { %8502 = vmatpush3.bf16.msra.mxu0 %v11005_v22  ;;  %8503 = vmatprep.mubr.msk.bf16.mxu0 %vm8619_vm2, %v11408_v47 }
 0x438   :  { %8513 = vmatprep.subr.bf16.mxu0 %v11408_v47 }
 0x43c   :  { %8510 = vmatmul.mubr.msk.bf16.vlgmr.msra.gmra.mxu1 %vm2628_vm1, %v8566_v44 }
 0x43d   :  { %8520 = vmatpush3.bf16.msra.mxu1 %v6567_v38  ;;  %8521 = vmatprep.mubr.msk.bf16.mxu1 %vm8619_vm2, %v11408_v47 }
 0x43e   :  { %8504 = vmatmul.mubr.msk.bf16.vlgmr.msra.gmra.mxu0 %vm2628_vm1, %v8567_v14 }
 0x43f   :  { %8514 = vmatpush3.bf16.msra.mxu0 %v6566_v58  ;;  %8515 = vmatprep.mubr.msk.bf16.mxu0 %vm8619_vm2, %v11408_v47 }
 0x444   :  { %8522 = vmatmul.mubr.msk.bf16.vlgmr.msra.gmra.mxu1 %vm2628_vm1, %v8569_v48 }
 0x446   :  { %8516 = vmatmul.mubr.msk.bf16.vlgmr.msra.gmra.mxu0 %vm2628_vm1, %v8568_v30 }
 0x4a4   :  { %v6664_v56 = vpop.f32.mrf.mxu1 }
 0x4a6   :  { %v6615_v11 = vpop.f32.mrf.mxu0  ;;  %v8379_v37 = vpop.f32.mrf.mxu1 }
 0x4a7   :  { %v6665_v24 = vadd.f32 %v6664_v56, %v6615_v11 }
 0x4a8   :  { %v8373_v57 = vpop.f32.mrf.mxu0  ;;  %v6667_v21 = vpop.f32.mrf.mxu1 }
 0x4aa   :  { %v6618_v9 = vpop.f32.mrf.mxu0  ;;  %v8380_v10 = vpop.f32.mrf.mxu1 }
 0x4ab   :  { %v6668_v17 = vadd.f32 %v6667_v21, %v6618_v9 }
 0x4ac   :  { %v8374_v47 = vpop.f32.mrf.mxu0  ;;  %v6770_v40 = vpop.f32.mrf.mxu1 }
 0x4ae   :  { %v6716_v19 = vpop.f32.mrf.mxu0  ;;  %v8391_v1 = vpop.f32.mrf.mxu1 }
 0x4af   :  { %v6723_v42 = vadd.f32 %v6716_v19, %v6665_v24 }
 0x4b0   :  { %v8385_v55 = vpop.f32.mrf.mxu0  ;;  %v6773_v6 = vpop.f32.mrf.mxu1 }
 0x4b1   :  { %v6777_v5 = vadd.f32 %v6770_v40, %v6723_v42 }
 0x4b2   :  { %v6719_v36 = vpop.f32.mrf.mxu0  ;;  %v8392_v2 = vpop.f32.mrf.mxu1 }
 0x4b3   :  { %v6724_v16 = vadd.f32 %v6719_v36, %v6668_v17 }
 0x4b4   :  { %v8386_v52 = vpop.f32.mrf.mxu0  ;;  %v6878_v62 = vpop.f32.mrf.mxu1 }
 0x4b5   :  { %v6778_v58 = vadd.f32 %v6773_v6, %v6724_v16 }
 0x4b6   :  { %v6824_v39 = vpop.f32.mrf.mxu0  ;;  %v8403_v33 = vpop.f32.mrf.mxu1 }
 0x4b7   :  { %v6831_v63 = vadd.f32 %v6824_v39, %v6777_v5 }
 0x4b8   :  { %v8397_v54 = vpop.f32.mrf.mxu0  ;;  %v6881_v15 = vpop.f32.mrf.mxu1 }
 0x4b9   :  { %v6885_v38 = vadd.f32 %v6878_v62, %v6831_v63 }
 0x4ba   :  { %v6827_v3 = vpop.f32.mrf.mxu0  ;;  %v8404_v41 = vpop.f32.mrf.mxu1 }
 0x4bb   :  { %v6832_v8 = vadd.f32 %v6827_v3, %v6778_v58 }
 0x4bc   :  { %v8398_v28 = vpop.f32.mrf.mxu0  ;;  %v6986_v26 = vpop.f32.mrf.mxu1 }
 0x4bd   :  { %v6886_v7 = vadd.f32 %v6881_v15, %v6832_v8 }
 0x4be   :  { %v6932_v59 = vpop.f32.mrf.mxu0  ;;  %v8415_v34 = vpop.f32.mrf.mxu1 }
 0x4bf   :  { %v6939_v25 = vadd.f32 %v6932_v59, %v6885_v38 }
 0x4c0   :  { %v8409_v13 = vpop.f32.mrf.mxu0  ;;  %v6989_v18 = vpop.f32.mrf.mxu1 }
 0x4c1   :  { %v6993_v44 = vadd.f32 %v6986_v26, %v6939_v25 }
 0x4c2   :  { %v6935_v22 = vpop.f32.mrf.mxu0  ;;  %v8416_v32 = vpop.f32.mrf.mxu1 }
 0x4c3   :  { %v6940_v14 = vadd.f32 %v6935_v22, %v6886_v7 }
 0x4c4   :  { %v8410_v31 = vpop.f32.mrf.mxu0  ;;  %v7094_v46 = vpop.f32.mrf.mxu1 }
 0x4c5   :  { %v6994_v57 = vadd.f32 %v6989_v18, %v6940_v14 }
 0x4c6   :  { %v7040_v35 = vpop.f32.mrf.mxu0  ;;  %v8427_v4 = vpop.f32.mrf.mxu1 }
 0x4c7   :  { %v7047_v56 = vadd.f32 %v7040_v35, %v6993_v44 }
 0x4c8   :  { %v8421_v53 = vpop.f32.mrf.mxu0  ;;  %v7097_v49 = vpop.f32.mrf.mxu1 }
 0x4c9   :  { %v7101_v10 = vadd.f32 %v7094_v46, %v7047_v56 }
 0x4ca   :  { %v7043_v45 = vpop.f32.mrf.mxu0  ;;  %v8428_v23 = vpop.f32.mrf.mxu1 }
 0x4cb   :  { %v7048_v47 = vadd.f32 %v7043_v45, %v6994_v57 }
 0x4cc   :  { %v8422_v50 = vpop.f32.mrf.mxu0  ;;  %v7202_v12 = vpop.f32.mrf.mxu1 }
 0x4cd   :  { %v7102_v36 = vadd.f32 %v7097_v49, %v7048_v47 }
 0x4ce   :  { %v7148_v29 = vpop.f32.mrf.mxu0  ;;  %v8439_v43 = vpop.f32.mrf.mxu1 }
 0x4cf   :  { %v7155_v1 = vadd.f32 %v7148_v29, %v7101_v10 }
 0x4d0   :  { %v8433_v61 = vpop.f32.mrf.mxu0  ;;  %v7205_v60 = vpop.f32.mrf.mxu1 }
 0x4d1   :  { %v7209_v62 = vadd.f32 %v7202_v12, %v7155_v1 }
 0x4d2   :  { %v7151_v0 = vpop.f32.mrf.mxu0  ;;  %v8440_v51 = vpop.f32.mrf.mxu1 }
 0x4d3   :  { %v7156_v39 = vadd.f32 %v7151_v0, %v7102_v36 }
 0x4d4   :  { %v8434_v27 = vpop.f32.mrf.mxu0  ;;  %v7310_v20 = vpop.f32.mrf.mxu1 }
 0x4d5   :  { %v7210_v28 = vadd.f32 %v7205_v60, %v7156_v39 }
 0x4d6   :  { %v7256_v48 = vpop.f32.mrf.mxu0  ;;  %v8451_v30 = vpop.f32.mrf.mxu1 }
 0x4d7   :  { %v7263_v15 = vadd.f32 %v7256_v48, %v7209_v62 }
 0x4d8   :  { %v8445_v11 = vpop.f32.mrf.mxu0  ;;  %v7313_v37 = vpop.f32.mrf.mxu1 }
 0x4d9   :  { %v7317_v34 = vadd.f32 %v7310_v20, %v7263_v15 }
 0x4da   :  { %v7259_v21 = vpop.f32.mrf.mxu0  ;;  %v8452_v9 = vpop.f32.mrf.mxu1 }
 0x4db   :  { %v7264_v13 = vadd.f32 %v7259_v21, %v7210_v28 }
 0x4dc   :  { %v8446_v40 = vpop.f32.mrf.mxu0  ;;  %v7418_v19 = vpop.f32.mrf.mxu1 }
 0x4dd   :  { %v7318_v46 = vadd.f32 %v7313_v37, %v7264_v13 }
 0x4de   :  { %v7364_v55 = vpop.f32.mrf.mxu0  ;;  %v8463_v6 = vpop.f32.mrf.mxu1 }
 0x4df   :  { %v7371_v32 = vadd.f32 %v7364_v55, %v7317_v34 }
 0x4e0   :  { %v8457_v2 = vpop.f32.mrf.mxu0  ;;  %v7421_v52 = vpop.f32.mrf.mxu1 }
 0x4e1   :  { %v7425_v4 = vadd.f32 %v7418_v19, %v7371_v32 }
 0x4e2   :  { %v7367_v33 = vpop.f32.mrf.mxu0  ;;  %v8464_v54 = vpop.f32.mrf.mxu1 }
 0x4e3   :  { %v7372_v17 = vadd.f32 %v7367_v33, %v7318_v46  ;;  %v7972_v54 = vpop.permute.xlu0 %7971 }
 0x4e4   :  { %v8458_v3 = vpop.f32.mrf.mxu0  ;;  %v7526_v41 = vpop.f32.mrf.mxu1 }
 0x4e5   :  { %v7426_v23 = vadd.f32 %v7421_v52, %v7372_v17 }
 0x4e6   :  { %v7472_v26 = vpop.f32.mrf.mxu0  ;;  %v8475_v59 = vpop.f32.mrf.mxu1 }
 0x4e7   :  { %v7479_v5 = vadd.f32 %v7472_v26, %v7425_v4 }
 0x4e8   :  { %v8469_v18 = vpop.f32.mrf.mxu0  ;;  %v7529_v22 = vpop.f32.mrf.mxu1 }
 0x4e9   :  { %v7533_v12 = vadd.f32 %v7526_v41, %v7479_v5  ;;  %v7977_v18 = vpop.permute.xlu1 %7976 }
 0x4ea   :  { %v7475_v24 = vpop.f32.mrf.mxu0  ;;  %v8476_v31 = vpop.f32.mrf.mxu1 }
 0x4eb   :  { %v7480_v58 = vadd.f32 %v7475_v24, %v7426_v23 }
 0x4ec   :  { %v8470_v42 = vpop.f32.mrf.mxu0  ;;  %v7634_v35 = vpop.f32.mrf.mxu1 }
 0x4ed   :  { %v7534_v60 = vadd.f32 %v7529_v22, %v7480_v58 }
 0x4ee   :  { %v7580_v53 = vpop.f32.mrf.mxu0  ;;  %v8487_v49 = vpop.f32.mrf.mxu1 }
 0x4ef   :  { %v7587_v38 = vadd.f32 %v7580_v53, %v7533_v12 }
 0x4f0   :  { %v8481_v16 = vpop.f32.mrf.mxu0  ;;  %v7637_v45 = vpop.f32.mrf.mxu1 }
 0x4f1   :  { %v7641_v51 = vadd.f32 %v7634_v35, %v7587_v38 }
 0x4f2   :  { %v7583_v63 = vpop.f32.mrf.mxu0  ;;  %v8488_v50 = vpop.f32.mrf.mxu1 }
 0x4f3   :  { %v7588_v7 = vadd.f32 %v7583_v63, %v7534_v60 }
 0x4f4   :  { %v8482_v29 = vpop.f32.mrf.mxu0  ;;  %v7742_v43 = vpop.f32.mrf.mxu1 }
 0x4f5   :  { %v7642_v30 = vadd.f32 %v7637_v45, %v7588_v7 }
 0x4f6   :  { %v7688_v8 = vpop.f32.mrf.mxu0  ;;  %v8499_v61 = vpop.f32.mrf.mxu1 }
 0x4f7   :  { %v7695_v44 = vadd.f32 %v7688_v8, %v7641_v51 }
 0x4f8   :  { %v8493_v25 = vpop.f32.mrf.mxu0  ;;  %v7745_v0 = vpop.f32.mrf.mxu1 }
 0x4f9   :  { %v7749_v37 = vadd.f32 %v7742_v43, %v7695_v44 }
 0x4fa   :  { %v7691_v27 = vpop.f32.mrf.mxu0  ;;  %v8500_v20 = vpop.f32.mrf.mxu1 }
 0x4fb   :  { %v7696_v57 = vadd.f32 %v7691_v27, %v7642_v30 }
 0x4fc   :  { %v8494_v14 = vpop.f32.mrf.mxu0  ;;  %v7850_v48 = vpop.f32.mrf.mxu1 }
 0x4fd   :  { %v7750_v19 = vadd.f32 %v7745_v0, %v7696_v57 }
 0x4fe   :  { %v7796_v56 = vpop.f32.mrf.mxu0  ;;  %v8511_v11 = vpop.f32.mrf.mxu1 }
 0x4ff   :  { %v7803_v10 = vadd.f32 %v7796_v56, %v7749_v37 }
 0x500   :  { %v8505_v21 = vpop.f32.mrf.mxu0  ;;  %v7853_v9 = vpop.f32.mrf.mxu1 }
 0x501   :  { %v7857_v6 = vadd.f32 %v7850_v48, %v7803_v10 }
 0x502   :  { %v7799_v47 = vpop.f32.mrf.mxu0  ;;  %v8512_v40 = vpop.f32.mrf.mxu1 }
 0x503   :  { %v7804_v36 = vadd.f32 %v7799_v47, %v7750_v19 }
 0x504   :  { %v8506_v1 = vpop.f32.mrf.mxu0  ;;  %v7958_v55 = vpop.f32.mrf.mxu1 }
 0x505   :  { %v7858_v15 = vadd.f32 %v7853_v9, %v7804_v36 }
 0x506   :  { %v7904_v2 = vpop.f32.mrf.mxu0  ;;  %v8523_v52 = vpop.f32.mrf.mxu1 }
 0x507   :  { %v7911_v62 = vadd.f32 %v7904_v2, %v7857_v6 }
 0x508   :  { %v8517_v39 = vpop.f32.mrf.mxu0  ;;  %v7961_v33 = vpop.f32.mrf.mxu1 }
 0x509   :  { %v7965_v3 = vadd.f32 %v7958_v55, %v7911_v62 }
 0x50a   :  { %v7907_v41 = vpop.f32.mrf.mxu0  ;;  %v8524_v28 = vpop.f32.mrf.mxu1 }
 0x50b   :  { %v7979_v26 = vadd.f32 %v7972_v54, %v7965_v3  ;;  %v7912_v59 = vadd.f32 %v7907_v41, %v7858_v15 }
 0x50c   :  { %v8518_v34 = vpop.f32.mrf.mxu0 }
 0x50d   :  { %7981 = vst [vmem:[#allocation5] sm:$0xff] %v7979_v26  ;;  %v7966_v13 = vadd.f32 %v7961_v33, %v7912_v59 }
 0x50f   :  { %v7980_v22 = vadd.f32 %v7977_v18, %v7966_v13 }
 0x511   :  { %7982 = vst [vmem:[#allocation5 + $0x8] sm:$0xff] %v7980_v22 }
 0x512   :  { %8601 = shalt.err (!%p8598_p9)
}
 0x513   :  { %s8621_s12 = smov 8  }
 0x514   :  { %7994 = dma.vmem_to_hbm [thread:$0]  %s7989_s10, 256, %s11143_s7, [#allocation4], %s8616_s28, %s8616_s28, %s8621_s12  }
 0x515   :  { %8612 = dma.done.wait [#allocation4], 256  }
 0x516   :  { %8613 = vsyncadd [#allocation4], 4294967040 }
 0x517   :  { %7998 = vsyncpa [#allocation3], 1 }
 0x518   :  { %7999 = vsyncpa [#allocation4], 1 }

</bundles_post_ra>
